<compile_context>
chip_gen: v6e
topology: v6e:2x2x1
jax: 0.10.0
libtpu: 0.0.40
codegen_flags: <defaults>
</compile_context>

<pallas_src>
import functools

import jax
import jax.numpy as jnp
from jax.experimental import pallas as pl
from jax.experimental.pallas import tpu as pltpu

F32 = jnp.float32


# ---------------------------------------------------------------------------
# Kernel 1: per-node multi-source encoder (conv branches + log linear + fuse/GLU)
# ---------------------------------------------------------------------------

def _conv_branch_last(x_ref, w1, s1, b1, w2, s2, b2, d1, d2):
    """Two-layer causal dilated ConvNet (Conv1d+BN+ReLU+Chomp), last timestep only.

    x_ref: [n, T, Cin]; w1: [K1, Cin, C1]; w2: [K2, C1, C2]; s*/b*: [1, C*].
    Returns [n, C2] = network(x)[:, -1, :].
    """
    n, t_len, cin = x_ref.shape
    k1_taps, _, c1 = w1.shape
    k2_taps, _, c2 = w2.shape

    acc2 = jnp.zeros((n, c2), jnp.float32)
    for k2 in range(k2_taps):
        t1 = (t_len - 1) - (k2_taps - 1 - k2) * d2
        if t1 < 0:
            continue                      # causal zero padding of layer-2 input
        acc1 = jnp.zeros((n, c1), jnp.float32)
        for k1 in range(k1_taps):
            tx = t1 - (k1_taps - 1 - k1) * d1
            if tx < 0:
                continue                  # causal zero padding of layer-1 input
            xk = x_ref[:, tx, :]          # [n, Cin]
            if cin == 1:
                acc1 = acc1 + xk * w1[k1]                 # broadcast outer product
            else:
                acc1 = acc1 + jnp.dot(xk, w1[k1],
                                      preferred_element_type=jnp.float32)
        h1 = jnp.maximum(acc1 * s1 + b1, 0.0)             # BN (eval) + ReLU
        acc2 = acc2 + jnp.dot(h1, w2[k2], preferred_element_type=jnp.float32)
    return jnp.maximum(acc2 * s2 + b2, 0.0)               # BN (eval) + ReLU


def _encoder_kernel(tr_ref, lg_ref, me_ref,
                    tw1_ref, ts1_ref, th1_ref, tw2_ref, ts2_ref, th2_ref,
                    mw1_ref, ms1_ref, mh1_ref, mw2_ref, ms2_ref, mh2_ref,
                    lw_ref, lb_ref,
                    fwt_ref, fwl_ref, fwm_ref, fb_ref,
                    feat_ref):
    # trace branch: ConvNet(1 -> 20 -> 50), last timestep only
    tr_emb = _conv_branch_last(tr_ref, tw1_ref[...], ts1_ref[...], th1_ref[...],
                               tw2_ref[...], ts2_ref[...], th2_ref[...],
                               d1=1, d2=2)
    # metric branch: ConvNet(metric_num -> 64 -> 128), last timestep only
    me_emb = _conv_branch_last(me_ref, mw1_ref[...], ms1_ref[...], mh1_ref[...],
                               mw2_ref[...], ms2_ref[...], mh2_ref[...],
                               d1=1, d2=2)
    # log branch: Linear(event_num -> 64)
    lg_emb = (jnp.dot(lg_ref[...], lw_ref[...],
                      preferred_element_type=jnp.float32) + lb_ref[...])

    # fuse Linear + GLU with pre-split weights (no concat, no lane slicing)
    fwt, fwl, fwm, fb = fwt_ref[...], fwl_ref[...], fwm_ref[...], fb_ref[...]
    ya = (jnp.dot(tr_emb, fwt[0], preferred_element_type=jnp.float32)
          + jnp.dot(lg_emb, fwl[0], preferred_element_type=jnp.float32)
          + jnp.dot(me_emb, fwm[0], preferred_element_type=jnp.float32) + fb[0])
    yb = (jnp.dot(tr_emb, fwt[1], preferred_element_type=jnp.float32)
          + jnp.dot(lg_emb, fwl[1], preferred_element_type=jnp.float32)
          + jnp.dot(me_emb, fwm[1], preferred_element_type=jnp.float32) + fb[1])
    feat_ref[...] = ya * jax.nn.sigmoid(yb)


def encode_nodes(params, traces, logs, metrics):
    n, t_len, _ = traces.shape
    half = params["fuse_b"].shape[-1]

    node_tile = n if n % 128 else 128         # whole-N for small graphs
    grid = (n // node_tile,)

    def tile3(a):
        return pl.BlockSpec((node_tile,) + a.shape[1:], lambda i: (i, 0, 0))

    def tile2(a):
        return pl.BlockSpec((node_tile, a.shape[1]), lambda i: (i, 0))

    def rep(a):                               # full-array block, replicated
        nd = a.ndim
        return pl.BlockSpec(a.shape, lambda i, _nd=nd: (0,) * _nd)

    weights = [params[k] for k in (
        "tr1_w", "tr1_scale", "tr1_shift", "tr2_w", "tr2_scale", "tr2_shift",
        "me1_w", "me1_scale", "me1_shift", "me2_w", "me2_scale", "me2_shift",
        "log_w", "log_b",
        "fuse_w_tr", "fuse_w_lg", "fuse_w_me", "fuse_b")]

    return pl.pallas_call(
        _encoder_kernel,
        out_shape=jax.ShapeDtypeStruct((n, half), F32),
        grid=grid,
        in_specs=[tile3(traces), tile2(logs), tile3(metrics)]
                 + [rep(w) for w in weights],
        out_specs=pl.BlockSpec((node_tile, half), lambda i: (i, 0)),
        compiler_params=pltpu.CompilerParams(
            dimension_semantics=("parallel",)),
    )(traces, logs, metrics, *weights)


# ---------------------------------------------------------------------------
# Kernel 2: GraphModel (2x GATv2 + head maxpool) + GlobalAttentionPooling
# ---------------------------------------------------------------------------

def _gat_maxpool(x, ws, bs, wd, bd, attn, adj, slope):
    """GATv2Conv (dense adjacency) followed by max-pool over heads.

    x: [N, Fin]; ws/wd: [H, Fin, D]; bs/bd/attn: [H, 1, D]; adj: [N, N] with
    adj[v, u] = 1 iff edge u -> v. Returns [N, D].
    """
    num_heads = ws.shape[0]
    out = None
    for h in range(num_heads):
        fs = jnp.dot(x, ws[h], preferred_element_type=jnp.float32) + bs[h]  # src
        fd = jnp.dot(x, wd[h], preferred_element_type=jnp.float32) + bd[h]  # dst
        a_h = attn[h]                                       # [1, D]
        t = fd[:, None, :] + fs[None, :, :]                 # [Ndst, Nsrc, D]
        t = jnp.where(t >= 0, t, slope * t)                 # LeakyReLU
        e = jnp.sum(t * a_h[None, :, :], axis=-1)           # [N, N] logits
        e = jnp.where(adj > 0, e, jnp.float32(-1e30))
        mrow = jnp.max(e, axis=1, keepdims=True)            # edge softmax over src
        pe = jnp.exp(e - mrow) * adj
        alpha = pe / jnp.maximum(jnp.sum(pe, axis=1, keepdims=True), 1e-30)
        r = jnp.dot(alpha, fs, preferred_element_type=jnp.float32)   # [N, D]
        out = r if out is None else jnp.maximum(out, r)     # max-pool over heads
    return out


def _graph_kernel(x_ref, adj_ref, mem_ref,
                  w0s_ref, b0s_ref, w0d_ref, b0d_ref, a0_ref,
                  w1s_ref, b1s_ref, w1d_ref, b1d_ref, a1_ref,
                  gw_ref, gb_ref, out_ref, *, slope):
    adj = adj_ref[...]
    g = _gat_maxpool(x_ref[...], w0s_ref[...], b0s_ref[...], w0d_ref[...],
                     b0d_ref[...], a0_ref[...], adj, slope)
    g = _gat_maxpool(g, w1s_ref[...], b1s_ref[...], w1d_ref[...],
                     b1d_ref[...], a1_ref[...], adj, slope)

    # GlobalAttentionPooling with the gate Linear fused in.
    # Per-graph softmax via membership matmuls (softmax is shift invariant, so
    # a single global max-shift is enough for numerical stability).
    scores = (jnp.dot(g, gw_ref[...], preferred_element_type=jnp.float32)
              + gb_ref[...])                                 # [N, 1]
    scores = scores - jnp.max(scores, axis=0, keepdims=True)
    p = jnp.exp(scores)                                      # [N, 1]
    mem = mem_ref[...]                                       # [B, N]
    denom = jnp.dot(mem, p, preferred_element_type=jnp.float32)       # [B, 1]
    num = jnp.dot(mem, p * g, preferred_element_type=jnp.float32)     # [B, F]
    out_ref[...] = num / jnp.maximum(denom, 1e-30)


def graph_pool(params, feature, adj, membership, negative_slope):
    b = membership.shape[0]
    out_dim = params["gate_w"].shape[0]
    args = (feature, adj, membership,
            params["g0_wsrc"], params["g0_bsrc"], params["g0_wdst"],
            params["g0_bdst"], params["g0_attn"],
            params["g1_wsrc"], params["g1_bsrc"], params["g1_wdst"],
            params["g1_bdst"], params["g1_attn"],
            params["gate_w"], params["gate_b"])
    return pl.pallas_call(
        functools.partial(_graph_kernel, slope=negative_slope),
        out_shape=jax.ShapeDtypeStruct((b, out_dim), F32),
        in_specs=[pl.BlockSpec(memory_space=pltpu.MemorySpace.VMEM)] * len(args),
        out_specs=pl.BlockSpec(memory_space=pltpu.MemorySpace.VMEM),
    )(*args)


# ---------------------------------------------------------------------------
# Parameter init (deterministic, synthetic — mirrors __init__ shapes)
# ---------------------------------------------------------------------------

def init_params(key, event_num, metric_num,
                trace_hiddens=(20, 50), metric_hiddens=(64, 128),
                log_dim=64, fuse_dim=64, graph_hiddens=(64, 128), attn_head=4):
    keys = iter(jax.random.split(key, 64))
    eps = 1e-5

    def unif(shape, fan_in):
        lim = 1.0 / float(fan_in) ** 0.5
        return jax.random.uniform(next(keys), shape, F32, -lim, lim)

    p = {}

    def conv_layer(prefix, cin, cout, ksize):
        w = unif((ksize, cin, cout), cin * ksize)            # [K, Cin, Cout]
        b = unif((cout,), cin * ksize)
        gamma = jax.random.uniform(next(keys), (cout,), F32, 0.5, 1.5)
        beta = unif((cout,), cout)
        mean = jnp.zeros((cout,), F32)
        var = jnp.ones((cout,), F32)
        scale = gamma / jnp.sqrt(var + eps)                  # eval-mode BN fold
        shift = (b - mean) * scale + beta                    # conv bias folded in
        p[prefix + "_w"] = w
        p[prefix + "_scale"] = scale.reshape(1, cout)
        p[prefix + "_shift"] = shift.reshape(1, cout)

    # TraceModel: ConvNet(1, [20, 50], kernels [3, 3], dilation 2**i)
    conv_layer("tr1", 1, trace_hiddens[0], 3)
    conv_layer("tr2", trace_hiddens[0], trace_hiddens[1], 3)
    # MetricModel: ConvNet(metric_num, [64, 128], kernels [3, 3])
    conv_layer("me1", metric_num, metric_hiddens[0], 3)
    conv_layer("me2", metric_hiddens[0], metric_hiddens[1], 3)

    # LogModel: Linear(event_num, log_dim)
    p["log_w"] = unif((event_num, log_dim), event_num)
    p["log_b"] = unif((1, log_dim), event_num)

    # fuse Linear(trace + log + metric -> fuse_dim) + GLU, pre-split by source
    trace_dim, metric_dim = trace_hiddens[1], metric_hiddens[1]
    fuse_in = trace_dim + log_dim + metric_dim
    half = fuse_dim // 2
    fuse_w = unif((fuse_in, fuse_dim), fuse_in)
    fuse_b = unif((fuse_dim,), fuse_in)
    wa, wb = fuse_w[:, :half], fuse_w[:, half:]              # GLU halves
    r0, r1 = trace_dim, trace_dim + log_dim
    p["fuse_w_tr"] = jnp.stack([wa[:r0], wb[:r0]])           # [2, 50, 32]
    p["fuse_w_lg"] = jnp.stack([wa[r0:r1], wb[r0:r1]])       # [2, 64, 32]
    p["fuse_w_me"] = jnp.stack([wa[r1:], wb[r1:]])           # [2, 128, 32]
    p["fuse_b"] = jnp.stack([fuse_b[:half], fuse_b[half:]]).reshape(2, 1, half)

    # GraphModel: GATv2Conv(32->64, heads=4), GATv2Conv(64->128, heads=4)
    feat_in = half
    dims = [feat_in] + list(graph_hiddens)
    for i in range(len(graph_hiddens)):
        cin, cout = dims[i], dims[i + 1]
        wsrc = unif((cin, attn_head * cout), cin)
        bsrc = unif((attn_head * cout,), cin)
        wdst = unif((cin, attn_head * cout), cin)
        bdst = unif((attn_head * cout,), cin)
        # head-major per-head layout: [H, Cin, Cout] weights, [H, 1, Cout] vectors
        p[f"g{i}_wsrc"] = jnp.transpose(wsrc.reshape(cin, attn_head, cout), (1, 0, 2))
        p[f"g{i}_bsrc"] = bsrc.reshape(attn_head, 1, cout)
        p[f"g{i}_wdst"] = jnp.transpose(wdst.reshape(cin, attn_head, cout), (1, 0, 2))
        p[f"g{i}_bdst"] = bdst.reshape(attn_head, 1, cout)
        p[f"g{i}_attn"] = unif((attn_head, cout), cout).reshape(attn_head, 1, cout)

    # GlobalAttentionPooling gate: Linear(128, 1)
    p["gate_w"] = unif((graph_hiddens[-1], 1), graph_hiddens[-1])
    p["gate_b"] = unif((1, 1), graph_hiddens[-1])
    return p


# ---------------------------------------------------------------------------
# MultiSourceEncoder forward
# ---------------------------------------------------------------------------

def multi_source_encoder(params, traces, logs, metrics, adj, membership,
                         negative_slope=0.2):
    feature = encode_nodes(params, traces, logs, metrics)           # [N, 32]
    return graph_pool(params, feature, adj, membership, negative_slope)  # [B, 128]


# ---------------------------------------------------------------------------
# Example run
# ---------------------------------------------------------------------------

if __name__ == "__main__":
    key = jax.random.PRNGKey(0)
    k1, k2, k3, kp = jax.random.split(key, 4)

    B, node_num, T = 2, 4, 8            # B graphs, node_num nodes each, window T
    event_num, metric_num = 10, 6
    N = B * node_num                    # total nodes in the batched graph

    traces = jax.random.normal(k1, (N, T, 1), F32)
    logs = jax.random.normal(k2, (N, event_num), F32)
    metrics = jax.random.normal(k3, (N, T, metric_num), F32)

    # block-diagonal, fully-connected (with self-loops) batched graph
    membership = jnp.zeros((B, N), F32)
    for b in range(B):
        membership = membership.at[b, b * node_num:(b + 1) * node_num].set(1.0)
    adj = membership.T @ membership     # [N, N], adj[v, u] = 1 iff same graph

    params = init_params(kp, event_num, metric_num)

    fwd = jax.jit(multi_source_encoder)
    out = fwd(params, traces, logs, metrics, adj, membership)
    out = jax.block_until_ready(out)

    assert out.shape == (B, 128), out.shape
    assert bool(jnp.all(jnp.isfinite(out)))
    print("KERNEL_OK")
</pallas_src>

<mosaic_0001>
module attributes {stable_mosaic.version = 11 : i64} {
  func.func @_graph_kernel(%arg0: memref<8x32xf32, #tpu.memory_space<vmem>>, %arg1: memref<8x8xf32, #tpu.memory_space<vmem>>, %arg2: memref<2x8xf32, #tpu.memory_space<vmem>>, %arg3: memref<4x32x64xf32, #tpu.memory_space<vmem>>, %arg4: memref<4x1x64xf32, #tpu.memory_space<vmem>>, %arg5: memref<4x32x64xf32, #tpu.memory_space<vmem>>, %arg6: memref<4x1x64xf32, #tpu.memory_space<vmem>>, %arg7: memref<4x1x64xf32, #tpu.memory_space<vmem>>, %arg8: memref<4x64x128xf32, #tpu.memory_space<vmem>>, %arg9: memref<4x1x128xf32, #tpu.memory_space<vmem>>, %arg10: memref<4x64x128xf32, #tpu.memory_space<vmem>>, %arg11: memref<4x1x128xf32, #tpu.memory_space<vmem>>, %arg12: memref<4x1x128xf32, #tpu.memory_space<vmem>>, %arg13: memref<128x1xf32, #tpu.memory_space<vmem>>, %arg14: memref<1x1xf32, #tpu.memory_space<vmem>>, %arg15: memref<2x128xf32, #tpu.memory_space<vmem>>) attributes {dimension_semantics = [], scalar_prefetch = 0 : i64, scratch_operands = 0 : i64, tpu.core_type = #tpu.core_type<tc>} {
    %c0 = arith.constant 0 : index
    %c0_0 = arith.constant 0 : index
    %0 = vector.load %arg1[%c0, %c0_0] : memref<8x8xf32, #tpu.memory_space<vmem>>, vector<8x8xf32>
    %c0_1 = arith.constant 0 : index
    %c0_2 = arith.constant 0 : index
    %1 = vector.load %arg0[%c0_1, %c0_2] : memref<8x32xf32, #tpu.memory_space<vmem>>, vector<8x32xf32>
    %c0_3 = arith.constant 0 : index
    %c0_4 = arith.constant 0 : index
    %c0_5 = arith.constant 0 : index
    %2 = vector.load %arg3[%c0_3, %c0_4, %c0_5] : memref<4x32x64xf32, #tpu.memory_space<vmem>>, vector<4x32x64xf32>
    %c0_6 = arith.constant 0 : index
    %c0_7 = arith.constant 0 : index
    %c0_8 = arith.constant 0 : index
    %3 = vector.load %arg4[%c0_6, %c0_7, %c0_8] : memref<4x1x64xf32, #tpu.memory_space<vmem>>, vector<4x1x64xf32>
    %c0_9 = arith.constant 0 : index
    %c0_10 = arith.constant 0 : index
    %c0_11 = arith.constant 0 : index
    %4 = vector.load %arg5[%c0_9, %c0_10, %c0_11] : memref<4x32x64xf32, #tpu.memory_space<vmem>>, vector<4x32x64xf32>
    %c0_12 = arith.constant 0 : index
    %c0_13 = arith.constant 0 : index
    %c0_14 = arith.constant 0 : index
    %5 = vector.load %arg6[%c0_12, %c0_13, %c0_14] : memref<4x1x64xf32, #tpu.memory_space<vmem>>, vector<4x1x64xf32>
    %c0_15 = arith.constant 0 : index
    %c0_16 = arith.constant 0 : index
    %c0_17 = arith.constant 0 : index
    %6 = vector.load %arg7[%c0_15, %c0_16, %c0_17] : memref<4x1x64xf32, #tpu.memory_space<vmem>>, vector<4x1x64xf32>
    %7 = vector.extract_strided_slice %2 {offsets = [0, 0, 0], sizes = [1, 32, 64], strides = [1, 1, 1]} : vector<4x32x64xf32> to vector<1x32x64xf32>
    %8 = vector.shape_cast %7 : vector<1x32x64xf32> to vector<32x64xf32>
    %cst = arith.constant dense<0.000000e+00> : vector<8x64xf32>
    %9 = tpu.matmul %1, %8, %cst {dimension_numbers = #tpu.dot_dimension_numbers<[1], [0], [0], [1], [0, 0, 1, 1], [], []>} : vector<8x32xf32>, vector<32x64xf32>, vector<8x64xf32> -> vector<8x64xf32>
    %10 = vector.extract_strided_slice %3 {offsets = [0, 0, 0], sizes = [1, 1, 64], strides = [1, 1, 1]} : vector<4x1x64xf32> to vector<1x1x64xf32>
    %11 = vector.shape_cast %10 : vector<1x1x64xf32> to vector<1x64xf32>
    %12 = vector.broadcast %11 : vector<1x64xf32> to vector<8x64xf32>
    %13 = arith.addf %9, %12 : vector<8x64xf32>
    %14 = vector.extract_strided_slice %4 {offsets = [0, 0, 0], sizes = [1, 32, 64], strides = [1, 1, 1]} : vector<4x32x64xf32> to vector<1x32x64xf32>
    %15 = vector.shape_cast %14 : vector<1x32x64xf32> to vector<32x64xf32>
    %cst_18 = arith.constant dense<0.000000e+00> : vector<8x64xf32>
    %16 = tpu.matmul %1, %15, %cst_18 {dimension_numbers = #tpu.dot_dimension_numbers<[1], [0], [0], [1], [0, 0, 1, 1], [], []>} : vector<8x32xf32>, vector<32x64xf32>, vector<8x64xf32> -> vector<8x64xf32>
    %17 = vector.extract_strided_slice %5 {offsets = [0, 0, 0], sizes = [1, 1, 64], strides = [1, 1, 1]} : vector<4x1x64xf32> to vector<1x1x64xf32>
    %18 = vector.shape_cast %17 : vector<1x1x64xf32> to vector<1x64xf32>
    %19 = vector.broadcast %18 : vector<1x64xf32> to vector<8x64xf32>
    %20 = arith.addf %16, %19 : vector<8x64xf32>
    %21 = vector.extract_strided_slice %6 {offsets = [0, 0, 0], sizes = [1, 1, 64], strides = [1, 1, 1]} : vector<4x1x64xf32> to vector<1x1x64xf32>
    %22 = vector.shape_cast %21 : vector<1x1x64xf32> to vector<1x64xf32>
    %23 = vector.shape_cast %20 : vector<8x64xf32> to vector<8x1x64xf32>
    %24 = vector.shape_cast %13 : vector<8x64xf32> to vector<1x8x64xf32>
    %25 = vector.broadcast %23 : vector<8x1x64xf32> to vector<8x8x64xf32>
    %26 = vector.broadcast %24 : vector<1x8x64xf32> to vector<8x8x64xf32>
    %27 = arith.addf %25, %26 : vector<8x8x64xf32>
    %cst_19 = arith.constant 0.000000e+00 : f32
    %28 = vector.broadcast %cst_19 : f32 to vector<8x8x64xf32>
    %29 = arith.cmpf oge, %27, %28 : vector<8x8x64xf32>
    %cst_20 = arith.constant 2.000000e-01 : f32
    %30 = vector.broadcast %cst_20 : f32 to vector<8x8x64xf32>
    %31 = arith.mulf %30, %27 : vector<8x8x64xf32>
    %32 = arith.select %29, %27, %31 : vector<8x8x64xi1>, vector<8x8x64xf32>
    %33 = vector.shape_cast %22 : vector<1x64xf32> to vector<1x1x64xf32>
    %34 = vector.broadcast %33 : vector<1x1x64xf32> to vector<8x8x64xf32>
    %35 = arith.mulf %32, %34 : vector<8x8x64xf32>
    %cst_21 = arith.constant dense<0.000000e+00> : vector<8x8xf32>
    %36 = vector.multi_reduction <add>, %35, %cst_21 [2] : vector<8x8x64xf32> to vector<8x8xf32>
    %cst_22 = arith.constant 0.000000e+00 : f32
    %37 = vector.broadcast %cst_22 : f32 to vector<8x8xf32>
    %38 = arith.cmpf ogt, %0, %37 : vector<8x8xf32>
    %cst_23 = arith.constant -1.000000e+30 : f32
    %39 = vector.broadcast %cst_23 : f32 to vector<8x8xf32>
    %40 = arith.select %38, %36, %39 : vector<8x8xi1>, vector<8x8xf32>
    %cst_24 = arith.constant dense<0xFF800000> : vector<8xf32>
    %41 = vector.multi_reduction <maximumf>, %40, %cst_24 [1] : vector<8x8xf32> to vector<8xf32>
    %42 = vector.shape_cast %41 : vector<8xf32> to vector<8x1xf32>
    %43 = vector.broadcast %42 : vector<8x1xf32> to vector<8x8xf32>
    %44 = arith.subf %40, %43 : vector<8x8xf32>
    %45 = math.exp %44 : vector<8x8xf32>
    %46 = arith.mulf %45, %0 : vector<8x8xf32>
    %cst_25 = arith.constant dense<0.000000e+00> : vector<8xf32>
    %47 = vector.multi_reduction <add>, %46, %cst_25 [1] : vector<8x8xf32> to vector<8xf32>
    %48 = vector.shape_cast %47 : vector<8xf32> to vector<8x1xf32>
    %cst_26 = arith.constant 1.000000e-30 : f32
    %49 = vector.broadcast %cst_26 : f32 to vector<8x1xf32>
    %50 = arith.maximumf %48, %49 : vector<8x1xf32>
    %51 = vector.broadcast %50 : vector<8x1xf32> to vector<8x8xf32>
    %52 = arith.divf %46, %51 : vector<8x8xf32>
    %cst_27 = arith.constant dense<0.000000e+00> : vector<8x64xf32>
    %53 = tpu.matmul %52, %13, %cst_27 {dimension_numbers = #tpu.dot_dimension_numbers<[1], [0], [0], [1], [0, 0, 1, 1], [], []>} : vector<8x8xf32>, vector<8x64xf32>, vector<8x64xf32> -> vector<8x64xf32>
    %54 = vector.extract_strided_slice %2 {offsets = [1, 0, 0], sizes = [1, 32, 64], strides = [1, 1, 1]} : vector<4x32x64xf32> to vector<1x32x64xf32>
    %55 = vector.shape_cast %54 : vector<1x32x64xf32> to vector<32x64xf32>
    %cst_28 = arith.constant dense<0.000000e+00> : vector<8x64xf32>
    %56 = tpu.matmul %1, %55, %cst_28 {dimension_numbers = #tpu.dot_dimension_numbers<[1], [0], [0], [1], [0, 0, 1, 1], [], []>} : vector<8x32xf32>, vector<32x64xf32>, vector<8x64xf32> -> vector<8x64xf32>
    %57 = vector.extract_strided_slice %3 {offsets = [1, 0, 0], sizes = [1, 1, 64], strides = [1, 1, 1]} : vector<4x1x64xf32> to vector<1x1x64xf32>
    %58 = vector.shape_cast %57 : vector<1x1x64xf32> to vector<1x64xf32>
    %59 = vector.broadcast %58 : vector<1x64xf32> to vector<8x64xf32>
    %60 = arith.addf %56, %59 : vector<8x64xf32>
    %61 = vector.extract_strided_slice %4 {offsets = [1, 0, 0], sizes = [1, 32, 64], strides = [1, 1, 1]} : vector<4x32x64xf32> to vector<1x32x64xf32>
    %62 = vector.shape_cast %61 : vector<1x32x64xf32> to vector<32x64xf32>
    %cst_29 = arith.constant dense<0.000000e+00> : vector<8x64xf32>
    %63 = tpu.matmul %1, %62, %cst_29 {dimension_numbers = #tpu.dot_dimension_numbers<[1], [0], [0], [1], [0, 0, 1, 1], [], []>} : vector<8x32xf32>, vector<32x64xf32>, vector<8x64xf32> -> vector<8x64xf32>
    %64 = vector.extract_strided_slice %5 {offsets = [1, 0, 0], sizes = [1, 1, 64], strides = [1, 1, 1]} : vector<4x1x64xf32> to vector<1x1x64xf32>
    %65 = vector.shape_cast %64 : vector<1x1x64xf32> to vector<1x64xf32>
    %66 = vector.broadcast %65 : vector<1x64xf32> to vector<8x64xf32>
    %67 = arith.addf %63, %66 : vector<8x64xf32>
    %68 = vector.extract_strided_slice %6 {offsets = [1, 0, 0], sizes = [1, 1, 64], strides = [1, 1, 1]} : vector<4x1x64xf32> to vector<1x1x64xf32>
    %69 = vector.shape_cast %68 : vector<1x1x64xf32> to vector<1x64xf32>
    %70 = vector.shape_cast %67 : vector<8x64xf32> to vector<8x1x64xf32>
    %71 = vector.shape_cast %60 : vector<8x64xf32> to vector<1x8x64xf32>
    %72 = vector.broadcast %70 : vector<8x1x64xf32> to vector<8x8x64xf32>
    %73 = vector.broadcast %71 : vector<1x8x64xf32> to vector<8x8x64xf32>
    %74 = arith.addf %72, %73 : vector<8x8x64xf32>
    %cst_30 = arith.constant 0.000000e+00 : f32
    %75 = vector.broadcast %cst_30 : f32 to vector<8x8x64xf32>
    %76 = arith.cmpf oge, %74, %75 : vector<8x8x64xf32>
    %cst_31 = arith.constant 2.000000e-01 : f32
    %77 = vector.broadcast %cst_31 : f32 to vector<8x8x64xf32>
    %78 = arith.mulf %77, %74 : vector<8x8x64xf32>
    %79 = arith.select %76, %74, %78 : vector<8x8x64xi1>, vector<8x8x64xf32>
    %80 = vector.shape_cast %69 : vector<1x64xf32> to vector<1x1x64xf32>
    %81 = vector.broadcast %80 : vector<1x1x64xf32> to vector<8x8x64xf32>
    %82 = arith.mulf %79, %81 : vector<8x8x64xf32>
    %cst_32 = arith.constant dense<0.000000e+00> : vector<8x8xf32>
    %83 = vector.multi_reduction <add>, %82, %cst_32 [2] : vector<8x8x64xf32> to vector<8x8xf32>
    %cst_33 = arith.constant 0.000000e+00 : f32
    %84 = vector.broadcast %cst_33 : f32 to vector<8x8xf32>
    %85 = arith.cmpf ogt, %0, %84 : vector<8x8xf32>
    %cst_34 = arith.constant -1.000000e+30 : f32
    %86 = vector.broadcast %cst_34 : f32 to vector<8x8xf32>
    %87 = arith.select %85, %83, %86 : vector<8x8xi1>, vector<8x8xf32>
    %cst_35 = arith.constant dense<0xFF800000> : vector<8xf32>
    %88 = vector.multi_reduction <maximumf>, %87, %cst_35 [1] : vector<8x8xf32> to vector<8xf32>
    %89 = vector.shape_cast %88 : vector<8xf32> to vector<8x1xf32>
    %90 = vector.broadcast %89 : vector<8x1xf32> to vector<8x8xf32>
    %91 = arith.subf %87, %90 : vector<8x8xf32>
    %92 = math.exp %91 : vector<8x8xf32>
    %93 = arith.mulf %92, %0 : vector<8x8xf32>
    %cst_36 = arith.constant dense<0.000000e+00> : vector<8xf32>
    %94 = vector.multi_reduction <add>, %93, %cst_36 [1] : vector<8x8xf32> to vector<8xf32>
    %95 = vector.shape_cast %94 : vector<8xf32> to vector<8x1xf32>
    %cst_37 = arith.constant 1.000000e-30 : f32
    %96 = vector.broadcast %cst_37 : f32 to vector<8x1xf32>
    %97 = arith.maximumf %95, %96 : vector<8x1xf32>
    %98 = vector.broadcast %97 : vector<8x1xf32> to vector<8x8xf32>
    %99 = arith.divf %93, %98 : vector<8x8xf32>
    %cst_38 = arith.constant dense<0.000000e+00> : vector<8x64xf32>
    %100 = tpu.matmul %99, %60, %cst_38 {dimension_numbers = #tpu.dot_dimension_numbers<[1], [0], [0], [1], [0, 0, 1, 1], [], []>} : vector<8x8xf32>, vector<8x64xf32>, vector<8x64xf32> -> vector<8x64xf32>
    %101 = arith.maximumf %53, %100 : vector<8x64xf32>
    %102 = vector.extract_strided_slice %2 {offsets = [2, 0, 0], sizes = [1, 32, 64], strides = [1, 1, 1]} : vector<4x32x64xf32> to vector<1x32x64xf32>
    %103 = vector.shape_cast %102 : vector<1x32x64xf32> to vector<32x64xf32>
    %cst_39 = arith.constant dense<0.000000e+00> : vector<8x64xf32>
    %104 = tpu.matmul %1, %103, %cst_39 {dimension_numbers = #tpu.dot_dimension_numbers<[1], [0], [0], [1], [0, 0, 1, 1], [], []>} : vector<8x32xf32>, vector<32x64xf32>, vector<8x64xf32> -> vector<8x64xf32>
    %105 = vector.extract_strided_slice %3 {offsets = [2, 0, 0], sizes = [1, 1, 64], strides = [1, 1, 1]} : vector<4x1x64xf32> to vector<1x1x64xf32>
    %106 = vector.shape_cast %105 : vector<1x1x64xf32> to vector<1x64xf32>
    %107 = vector.broadcast %106 : vector<1x64xf32> to vector<8x64xf32>
    %108 = arith.addf %104, %107 : vector<8x64xf32>
    %109 = vector.extract_strided_slice %4 {offsets = [2, 0, 0], sizes = [1, 32, 64], strides = [1, 1, 1]} : vector<4x32x64xf32> to vector<1x32x64xf32>
    %110 = vector.shape_cast %109 : vector<1x32x64xf32> to vector<32x64xf32>
    %cst_40 = arith.constant dense<0.000000e+00> : vector<8x64xf32>
    %111 = tpu.matmul %1, %110, %cst_40 {dimension_numbers = #tpu.dot_dimension_numbers<[1], [0], [0], [1], [0, 0, 1, 1], [], []>} : vector<8x32xf32>, vector<32x64xf32>, vector<8x64xf32> -> vector<8x64xf32>
    %112 = vector.extract_strided_slice %5 {offsets = [2, 0, 0], sizes = [1, 1, 64], strides = [1, 1, 1]} : vector<4x1x64xf32> to vector<1x1x64xf32>
    %113 = vector.shape_cast %112 : vector<1x1x64xf32> to vector<1x64xf32>
    %114 = vector.broadcast %113 : vector<1x64xf32> to vector<8x64xf32>
    %115 = arith.addf %111, %114 : vector<8x64xf32>
    %116 = vector.extract_strided_slice %6 {offsets = [2, 0, 0], sizes = [1, 1, 64], strides = [1, 1, 1]} : vector<4x1x64xf32> to vector<1x1x64xf32>
    %117 = vector.shape_cast %116 : vector<1x1x64xf32> to vector<1x64xf32>
    %118 = vector.shape_cast %115 : vector<8x64xf32> to vector<8x1x64xf32>
    %119 = vector.shape_cast %108 : vector<8x64xf32> to vector<1x8x64xf32>
    %120 = vector.broadcast %118 : vector<8x1x64xf32> to vector<8x8x64xf32>
    %121 = vector.broadcast %119 : vector<1x8x64xf32> to vector<8x8x64xf32>
    %122 = arith.addf %120, %121 : vector<8x8x64xf32>
    %cst_41 = arith.constant 0.000000e+00 : f32
    %123 = vector.broadcast %cst_41 : f32 to vector<8x8x64xf32>
    %124 = arith.cmpf oge, %122, %123 : vector<8x8x64xf32>
    %cst_42 = arith.constant 2.000000e-01 : f32
    %125 = vector.broadcast %cst_42 : f32 to vector<8x8x64xf32>
    %126 = arith.mulf %125, %122 : vector<8x8x64xf32>
    %127 = arith.select %124, %122, %126 : vector<8x8x64xi1>, vector<8x8x64xf32>
    %128 = vector.shape_cast %117 : vector<1x64xf32> to vector<1x1x64xf32>
    %129 = vector.broadcast %128 : vector<1x1x64xf32> to vector<8x8x64xf32>
    %130 = arith.mulf %127, %129 : vector<8x8x64xf32>
    %cst_43 = arith.constant dense<0.000000e+00> : vector<8x8xf32>
    %131 = vector.multi_reduction <add>, %130, %cst_43 [2] : vector<8x8x64xf32> to vector<8x8xf32>
    %cst_44 = arith.constant 0.000000e+00 : f32
    %132 = vector.broadcast %cst_44 : f32 to vector<8x8xf32>
    %133 = arith.cmpf ogt, %0, %132 : vector<8x8xf32>
    %cst_45 = arith.constant -1.000000e+30 : f32
    %134 = vector.broadcast %cst_45 : f32 to vector<8x8xf32>
    %135 = arith.select %133, %131, %134 : vector<8x8xi1>, vector<8x8xf32>
    %cst_46 = arith.constant dense<0xFF800000> : vector<8xf32>
    %136 = vector.multi_reduction <maximumf>, %135, %cst_46 [1] : vector<8x8xf32> to vector<8xf32>
    %137 = vector.shape_cast %136 : vector<8xf32> to vector<8x1xf32>
    %138 = vector.broadcast %137 : vector<8x1xf32> to vector<8x8xf32>
    %139 = arith.subf %135, %138 : vector<8x8xf32>
    %140 = math.exp %139 : vector<8x8xf32>
    %141 = arith.mulf %140, %0 : vector<8x8xf32>
    %cst_47 = arith.constant dense<0.000000e+00> : vector<8xf32>
    %142 = vector.multi_reduction <add>, %141, %cst_47 [1] : vector<8x8xf32> to vector<8xf32>
    %143 = vector.shape_cast %142 : vector<8xf32> to vector<8x1xf32>
    %cst_48 = arith.constant 1.000000e-30 : f32
    %144 = vector.broadcast %cst_48 : f32 to vector<8x1xf32>
    %145 = arith.maximumf %143, %144 : vector<8x1xf32>
    %146 = vector.broadcast %145 : vector<8x1xf32> to vector<8x8xf32>
    %147 = arith.divf %141, %146 : vector<8x8xf32>
    %cst_49 = arith.constant dense<0.000000e+00> : vector<8x64xf32>
    %148 = tpu.matmul %147, %108, %cst_49 {dimension_numbers = #tpu.dot_dimension_numbers<[1], [0], [0], [1], [0, 0, 1, 1], [], []>} : vector<8x8xf32>, vector<8x64xf32>, vector<8x64xf32> -> vector<8x64xf32>
    %149 = arith.maximumf %101, %148 : vector<8x64xf32>
    %150 = vector.extract_strided_slice %2 {offsets = [3, 0, 0], sizes = [1, 32, 64], strides = [1, 1, 1]} : vector<4x32x64xf32> to vector<1x32x64xf32>
    %151 = vector.shape_cast %150 : vector<1x32x64xf32> to vector<32x64xf32>
    %cst_50 = arith.constant dense<0.000000e+00> : vector<8x64xf32>
    %152 = tpu.matmul %1, %151, %cst_50 {dimension_numbers = #tpu.dot_dimension_numbers<[1], [0], [0], [1], [0, 0, 1, 1], [], []>} : vector<8x32xf32>, vector<32x64xf32>, vector<8x64xf32> -> vector<8x64xf32>
    %153 = vector.extract_strided_slice %3 {offsets = [3, 0, 0], sizes = [1, 1, 64], strides = [1, 1, 1]} : vector<4x1x64xf32> to vector<1x1x64xf32>
    %154 = vector.shape_cast %153 : vector<1x1x64xf32> to vector<1x64xf32>
    %155 = vector.broadcast %154 : vector<1x64xf32> to vector<8x64xf32>
    %156 = arith.addf %152, %155 : vector<8x64xf32>
    %157 = vector.extract_strided_slice %4 {offsets = [3, 0, 0], sizes = [1, 32, 64], strides = [1, 1, 1]} : vector<4x32x64xf32> to vector<1x32x64xf32>
    %158 = vector.shape_cast %157 : vector<1x32x64xf32> to vector<32x64xf32>
    %cst_51 = arith.constant dense<0.000000e+00> : vector<8x64xf32>
    %159 = tpu.matmul %1, %158, %cst_51 {dimension_numbers = #tpu.dot_dimension_numbers<[1], [0], [0], [1], [0, 0, 1, 1], [], []>} : vector<8x32xf32>, vector<32x64xf32>, vector<8x64xf32> -> vector<8x64xf32>
    %160 = vector.extract_strided_slice %5 {offsets = [3, 0, 0], sizes = [1, 1, 64], strides = [1, 1, 1]} : vector<4x1x64xf32> to vector<1x1x64xf32>
    %161 = vector.shape_cast %160 : vector<1x1x64xf32> to vector<1x64xf32>
    %162 = vector.broadcast %161 : vector<1x64xf32> to vector<8x64xf32>
    %163 = arith.addf %159, %162 : vector<8x64xf32>
    %164 = vector.extract_strided_slice %6 {offsets = [3, 0, 0], sizes = [1, 1, 64], strides = [1, 1, 1]} : vector<4x1x64xf32> to vector<1x1x64xf32>
    %165 = vector.shape_cast %164 : vector<1x1x64xf32> to vector<1x64xf32>
    %166 = vector.shape_cast %163 : vector<8x64xf32> to vector<8x1x64xf32>
    %167 = vector.shape_cast %156 : vector<8x64xf32> to vector<1x8x64xf32>
    %168 = vector.broadcast %166 : vector<8x1x64xf32> to vector<8x8x64xf32>
    %169 = vector.broadcast %167 : vector<1x8x64xf32> to vector<8x8x64xf32>
    %170 = arith.addf %168, %169 : vector<8x8x64xf32>
    %cst_52 = arith.constant 0.000000e+00 : f32
    %171 = vector.broadcast %cst_52 : f32 to vector<8x8x64xf32>
    %172 = arith.cmpf oge, %170, %171 : vector<8x8x64xf32>
    %cst_53 = arith.constant 2.000000e-01 : f32
    %173 = vector.broadcast %cst_53 : f32 to vector<8x8x64xf32>
    %174 = arith.mulf %173, %170 : vector<8x8x64xf32>
    %175 = arith.select %172, %170, %174 : vector<8x8x64xi1>, vector<8x8x64xf32>
    %176 = vector.shape_cast %165 : vector<1x64xf32> to vector<1x1x64xf32>
    %177 = vector.broadcast %176 : vector<1x1x64xf32> to vector<8x8x64xf32>
    %178 = arith.mulf %175, %177 : vector<8x8x64xf32>
    %cst_54 = arith.constant dense<0.000000e+00> : vector<8x8xf32>
    %179 = vector.multi_reduction <add>, %178, %cst_54 [2] : vector<8x8x64xf32> to vector<8x8xf32>
    %cst_55 = arith.constant 0.000000e+00 : f32
    %180 = vector.broadcast %cst_55 : f32 to vector<8x8xf32>
    %181 = arith.cmpf ogt, %0, %180 : vector<8x8xf32>
    %cst_56 = arith.constant -1.000000e+30 : f32
    %182 = vector.broadcast %cst_56 : f32 to vector<8x8xf32>
    %183 = arith.select %181, %179, %182 : vector<8x8xi1>, vector<8x8xf32>
    %cst_57 = arith.constant dense<0xFF800000> : vector<8xf32>
    %184 = vector.multi_reduction <maximumf>, %183, %cst_57 [1] : vector<8x8xf32> to vector<8xf32>
    %185 = vector.shape_cast %184 : vector<8xf32> to vector<8x1xf32>
    %186 = vector.broadcast %185 : vector<8x1xf32> to vector<8x8xf32>
    %187 = arith.subf %183, %186 : vector<8x8xf32>
    %188 = math.exp %187 : vector<8x8xf32>
    %189 = arith.mulf %188, %0 : vector<8x8xf32>
    %cst_58 = arith.constant dense<0.000000e+00> : vector<8xf32>
    %190 = vector.multi_reduction <add>, %189, %cst_58 [1] : vector<8x8xf32> to vector<8xf32>
    %191 = vector.shape_cast %190 : vector<8xf32> to vector<8x1xf32>
    %cst_59 = arith.constant 1.000000e-30 : f32
    %192 = vector.broadcast %cst_59 : f32 to vector<8x1xf32>
    %193 = arith.maximumf %191, %192 : vector<8x1xf32>
    %194 = vector.broadcast %193 : vector<8x1xf32> to vector<8x8xf32>
    %195 = arith.divf %189, %194 : vector<8x8xf32>
    %cst_60 = arith.constant dense<0.000000e+00> : vector<8x64xf32>
    %196 = tpu.matmul %195, %156, %cst_60 {dimension_numbers = #tpu.dot_dimension_numbers<[1], [0], [0], [1], [0, 0, 1, 1], [], []>} : vector<8x8xf32>, vector<8x64xf32>, vector<8x64xf32> -> vector<8x64xf32>
    %197 = arith.maximumf %149, %196 : vector<8x64xf32>
    %c0_61 = arith.constant 0 : index
    %c0_62 = arith.constant 0 : index
    %c0_63 = arith.constant 0 : index
    %198 = vector.load %arg8[%c0_61, %c0_62, %c0_63] : memref<4x64x128xf32, #tpu.memory_space<vmem>>, vector<4x64x128xf32>
    %c0_64 = arith.constant 0 : index
    %c0_65 = arith.constant 0 : index
    %c0_66 = arith.constant 0 : index
    %199 = vector.load %arg9[%c0_64, %c0_65, %c0_66] : memref<4x1x128xf32, #tpu.memory_space<vmem>>, vector<4x1x128xf32>
    %c0_67 = arith.constant 0 : index
    %c0_68 = arith.constant 0 : index
    %c0_69 = arith.constant 0 : index
    %200 = vector.load %arg10[%c0_67, %c0_68, %c0_69] : memref<4x64x128xf32, #tpu.memory_space<vmem>>, vector<4x64x128xf32>
    %c0_70 = arith.constant 0 : index
    %c0_71 = arith.constant 0 : index
    %c0_72 = arith.constant 0 : index
    %201 = vector.load %arg11[%c0_70, %c0_71, %c0_72] : memref<4x1x128xf32, #tpu.memory_space<vmem>>, vector<4x1x128xf32>
    %c0_73 = arith.constant 0 : index
    %c0_74 = arith.constant 0 : index
    %c0_75 = arith.constant 0 : index
    %202 = vector.load %arg12[%c0_73, %c0_74, %c0_75] : memref<4x1x128xf32, #tpu.memory_space<vmem>>, vector<4x1x128xf32>
    %203 = vector.extract_strided_slice %198 {offsets = [0, 0, 0], sizes = [1, 64, 128], strides = [1, 1, 1]} : vector<4x64x128xf32> to vector<1x64x128xf32>
    %204 = vector.shape_cast %203 : vector<1x64x128xf32> to vector<64x128xf32>
    %cst_76 = arith.constant dense<0.000000e+00> : vector<8x128xf32>
    %205 = tpu.matmul %197, %204, %cst_76 {dimension_numbers = #tpu.dot_dimension_numbers<[1], [0], [0], [1], [0, 0, 1, 1], [], []>} : vector<8x64xf32>, vector<64x128xf32>, vector<8x128xf32> -> vector<8x128xf32>
    %206 = vector.extract_strided_slice %199 {offsets = [0, 0, 0], sizes = [1, 1, 128], strides = [1, 1, 1]} : vector<4x1x128xf32> to vector<1x1x128xf32>
    %207 = vector.shape_cast %206 : vector<1x1x128xf32> to vector<1x128xf32>
    %208 = vector.broadcast %207 : vector<1x128xf32> to vector<8x128xf32>
    %209 = arith.addf %205, %208 : vector<8x128xf32>
    %210 = vector.extract_strided_slice %200 {offsets = [0, 0, 0], sizes = [1, 64, 128], strides = [1, 1, 1]} : vector<4x64x128xf32> to vector<1x64x128xf32>
    %211 = vector.shape_cast %210 : vector<1x64x128xf32> to vector<64x128xf32>
    %cst_77 = arith.constant dense<0.000000e+00> : vector<8x128xf32>
    %212 = tpu.matmul %197, %211, %cst_77 {dimension_numbers = #tpu.dot_dimension_numbers<[1], [0], [0], [1], [0, 0, 1, 1], [], []>} : vector<8x64xf32>, vector<64x128xf32>, vector<8x128xf32> -> vector<8x128xf32>
    %213 = vector.extract_strided_slice %201 {offsets = [0, 0, 0], sizes = [1, 1, 128], strides = [1, 1, 1]} : vector<4x1x128xf32> to vector<1x1x128xf32>
    %214 = vector.shape_cast %213 : vector<1x1x128xf32> to vector<1x128xf32>
    %215 = vector.broadcast %214 : vector<1x128xf32> to vector<8x128xf32>
    %216 = arith.addf %212, %215 : vector<8x128xf32>
    %217 = vector.extract_strided_slice %202 {offsets = [0, 0, 0], sizes = [1, 1, 128], strides = [1, 1, 1]} : vector<4x1x128xf32> to vector<1x1x128xf32>
    %218 = vector.shape_cast %217 : vector<1x1x128xf32> to vector<1x128xf32>
    %219 = vector.shape_cast %216 : vector<8x128xf32> to vector<8x1x128xf32>
    %220 = vector.shape_cast %209 : vector<8x128xf32> to vector<1x8x128xf32>
    %221 = vector.broadcast %219 : vector<8x1x128xf32> to vector<8x8x128xf32>
    %222 = vector.broadcast %220 : vector<1x8x128xf32> to vector<8x8x128xf32>
    %223 = arith.addf %221, %222 : vector<8x8x128xf32>
    %cst_78 = arith.constant 0.000000e+00 : f32
    %224 = vector.broadcast %cst_78 : f32 to vector<8x8x128xf32>
    %225 = arith.cmpf oge, %223, %224 : vector<8x8x128xf32>
    %cst_79 = arith.constant 2.000000e-01 : f32
    %226 = vector.broadcast %cst_79 : f32 to vector<8x8x128xf32>
    %227 = arith.mulf %226, %223 : vector<8x8x128xf32>
    %228 = arith.select %225, %223, %227 : vector<8x8x128xi1>, vector<8x8x128xf32>
    %229 = vector.shape_cast %218 : vector<1x128xf32> to vector<1x1x128xf32>
    %230 = vector.broadcast %229 : vector<1x1x128xf32> to vector<8x8x128xf32>
    %231 = arith.mulf %228, %230 : vector<8x8x128xf32>
    %cst_80 = arith.constant dense<0.000000e+00> : vector<8x8xf32>
    %232 = vector.multi_reduction <add>, %231, %cst_80 [2] : vector<8x8x128xf32> to vector<8x8xf32>
    %cst_81 = arith.constant 0.000000e+00 : f32
    %233 = vector.broadcast %cst_81 : f32 to vector<8x8xf32>
    %234 = arith.cmpf ogt, %0, %233 : vector<8x8xf32>
    %cst_82 = arith.constant -1.000000e+30 : f32
    %235 = vector.broadcast %cst_82 : f32 to vector<8x8xf32>
    %236 = arith.select %234, %232, %235 : vector<8x8xi1>, vector<8x8xf32>
    %cst_83 = arith.constant dense<0xFF800000> : vector<8xf32>
    %237 = vector.multi_reduction <maximumf>, %236, %cst_83 [1] : vector<8x8xf32> to vector<8xf32>
    %238 = vector.shape_cast %237 : vector<8xf32> to vector<8x1xf32>
    %239 = vector.broadcast %238 : vector<8x1xf32> to vector<8x8xf32>
    %240 = arith.subf %236, %239 : vector<8x8xf32>
    %241 = math.exp %240 : vector<8x8xf32>
    %242 = arith.mulf %241, %0 : vector<8x8xf32>
    %cst_84 = arith.constant dense<0.000000e+00> : vector<8xf32>
    %243 = vector.multi_reduction <add>, %242, %cst_84 [1] : vector<8x8xf32> to vector<8xf32>
    %244 = vector.shape_cast %243 : vector<8xf32> to vector<8x1xf32>
    %cst_85 = arith.constant 1.000000e-30 : f32
    %245 = vector.broadcast %cst_85 : f32 to vector<8x1xf32>
    %246 = arith.maximumf %244, %245 : vector<8x1xf32>
    %247 = vector.broadcast %246 : vector<8x1xf32> to vector<8x8xf32>
    %248 = arith.divf %242, %247 : vector<8x8xf32>
    %cst_86 = arith.constant dense<0.000000e+00> : vector<8x128xf32>
    %249 = tpu.matmul %248, %209, %cst_86 {dimension_numbers = #tpu.dot_dimension_numbers<[1], [0], [0], [1], [0, 0, 1, 1], [], []>} : vector<8x8xf32>, vector<8x128xf32>, vector<8x128xf32> -> vector<8x128xf32>
    %250 = vector.extract_strided_slice %198 {offsets = [1, 0, 0], sizes = [1, 64, 128], strides = [1, 1, 1]} : vector<4x64x128xf32> to vector<1x64x128xf32>
    %251 = vector.shape_cast %250 : vector<1x64x128xf32> to vector<64x128xf32>
    %cst_87 = arith.constant dense<0.000000e+00> : vector<8x128xf32>
    %252 = tpu.matmul %197, %251, %cst_87 {dimension_numbers = #tpu.dot_dimension_numbers<[1], [0], [0], [1], [0, 0, 1, 1], [], []>} : vector<8x64xf32>, vector<64x128xf32>, vector<8x128xf32> -> vector<8x128xf32>
    %253 = vector.extract_strided_slice %199 {offsets = [1, 0, 0], sizes = [1, 1, 128], strides = [1, 1, 1]} : vector<4x1x128xf32> to vector<1x1x128xf32>
    %254 = vector.shape_cast %253 : vector<1x1x128xf32> to vector<1x128xf32>
    %255 = vector.broadcast %254 : vector<1x128xf32> to vector<8x128xf32>
    %256 = arith.addf %252, %255 : vector<8x128xf32>
    %257 = vector.extract_strided_slice %200 {offsets = [1, 0, 0], sizes = [1, 64, 128], strides = [1, 1, 1]} : vector<4x64x128xf32> to vector<1x64x128xf32>
    %258 = vector.shape_cast %257 : vector<1x64x128xf32> to vector<64x128xf32>
    %cst_88 = arith.constant dense<0.000000e+00> : vector<8x128xf32>
    %259 = tpu.matmul %197, %258, %cst_88 {dimension_numbers = #tpu.dot_dimension_numbers<[1], [0], [0], [1], [0, 0, 1, 1], [], []>} : vector<8x64xf32>, vector<64x128xf32>, vector<8x128xf32> -> vector<8x128xf32>
    %260 = vector.extract_strided_slice %201 {offsets = [1, 0, 0], sizes = [1, 1, 128], strides = [1, 1, 1]} : vector<4x1x128xf32> to vector<1x1x128xf32>
    %261 = vector.shape_cast %260 : vector<1x1x128xf32> to vector<1x128xf32>
    %262 = vector.broadcast %261 : vector<1x128xf32> to vector<8x128xf32>
    %263 = arith.addf %259, %262 : vector<8x128xf32>
    %264 = vector.extract_strided_slice %202 {offsets = [1, 0, 0], sizes = [1, 1, 128], strides = [1, 1, 1]} : vector<4x1x128xf32> to vector<1x1x128xf32>
    %265 = vector.shape_cast %264 : vector<1x1x128xf32> to vector<1x128xf32>
    %266 = vector.shape_cast %263 : vector<8x128xf32> to vector<8x1x128xf32>
    %267 = vector.shape_cast %256 : vector<8x128xf32> to vector<1x8x128xf32>
    %268 = vector.broadcast %266 : vector<8x1x128xf32> to vector<8x8x128xf32>
    %269 = vector.broadcast %267 : vector<1x8x128xf32> to vector<8x8x128xf32>
    %270 = arith.addf %268, %269 : vector<8x8x128xf32>
    %cst_89 = arith.constant 0.000000e+00 : f32
    %271 = vector.broadcast %cst_89 : f32 to vector<8x8x128xf32>
    %272 = arith.cmpf oge, %270, %271 : vector<8x8x128xf32>
    %cst_90 = arith.constant 2.000000e-01 : f32
    %273 = vector.broadcast %cst_90 : f32 to vector<8x8x128xf32>
    %274 = arith.mulf %273, %270 : vector<8x8x128xf32>
    %275 = arith.select %272, %270, %274 : vector<8x8x128xi1>, vector<8x8x128xf32>
    %276 = vector.shape_cast %265 : vector<1x128xf32> to vector<1x1x128xf32>
    %277 = vector.broadcast %276 : vector<1x1x128xf32> to vector<8x8x128xf32>
    %278 = arith.mulf %275, %277 : vector<8x8x128xf32>
    %cst_91 = arith.constant dense<0.000000e+00> : vector<8x8xf32>
    %279 = vector.multi_reduction <add>, %278, %cst_91 [2] : vector<8x8x128xf32> to vector<8x8xf32>
    %cst_92 = arith.constant 0.000000e+00 : f32
    %280 = vector.broadcast %cst_92 : f32 to vector<8x8xf32>
    %281 = arith.cmpf ogt, %0, %280 : vector<8x8xf32>
    %cst_93 = arith.constant -1.000000e+30 : f32
    %282 = vector.broadcast %cst_93 : f32 to vector<8x8xf32>
    %283 = arith.select %281, %279, %282 : vector<8x8xi1>, vector<8x8xf32>
    %cst_94 = arith.constant dense<0xFF800000> : vector<8xf32>
    %284 = vector.multi_reduction <maximumf>, %283, %cst_94 [1] : vector<8x8xf32> to vector<8xf32>
    %285 = vector.shape_cast %284 : vector<8xf32> to vector<8x1xf32>
    %286 = vector.broadcast %285 : vector<8x1xf32> to vector<8x8xf32>
    %287 = arith.subf %283, %286 : vector<8x8xf32>
    %288 = math.exp %287 : vector<8x8xf32>
    %289 = arith.mulf %288, %0 : vector<8x8xf32>
    %cst_95 = arith.constant dense<0.000000e+00> : vector<8xf32>
    %290 = vector.multi_reduction <add>, %289, %cst_95 [1] : vector<8x8xf32> to vector<8xf32>
    %291 = vector.shape_cast %290 : vector<8xf32> to vector<8x1xf32>
    %cst_96 = arith.constant 1.000000e-30 : f32
    %292 = vector.broadcast %cst_96 : f32 to vector<8x1xf32>
    %293 = arith.maximumf %291, %292 : vector<8x1xf32>
    %294 = vector.broadcast %293 : vector<8x1xf32> to vector<8x8xf32>
    %295 = arith.divf %289, %294 : vector<8x8xf32>
    %cst_97 = arith.constant dense<0.000000e+00> : vector<8x128xf32>
    %296 = tpu.matmul %295, %256, %cst_97 {dimension_numbers = #tpu.dot_dimension_numbers<[1], [0], [0], [1], [0, 0, 1, 1], [], []>} : vector<8x8xf32>, vector<8x128xf32>, vector<8x128xf32> -> vector<8x128xf32>
    %297 = arith.maximumf %249, %296 : vector<8x128xf32>
    %298 = vector.extract_strided_slice %198 {offsets = [2, 0, 0], sizes = [1, 64, 128], strides = [1, 1, 1]} : vector<4x64x128xf32> to vector<1x64x128xf32>
    %299 = vector.shape_cast %298 : vector<1x64x128xf32> to vector<64x128xf32>
    %cst_98 = arith.constant dense<0.000000e+00> : vector<8x128xf32>
    %300 = tpu.matmul %197, %299, %cst_98 {dimension_numbers = #tpu.dot_dimension_numbers<[1], [0], [0], [1], [0, 0, 1, 1], [], []>} : vector<8x64xf32>, vector<64x128xf32>, vector<8x128xf32> -> vector<8x128xf32>
    %301 = vector.extract_strided_slice %199 {offsets = [2, 0, 0], sizes = [1, 1, 128], strides = [1, 1, 1]} : vector<4x1x128xf32> to vector<1x1x128xf32>
    %302 = vector.shape_cast %301 : vector<1x1x128xf32> to vector<1x128xf32>
    %303 = vector.broadcast %302 : vector<1x128xf32> to vector<8x128xf32>
    %304 = arith.addf %300, %303 : vector<8x128xf32>
    %305 = vector.extract_strided_slice %200 {offsets = [2, 0, 0], sizes = [1, 64, 128], strides = [1, 1, 1]} : vector<4x64x128xf32> to vector<1x64x128xf32>
    %306 = vector.shape_cast %305 : vector<1x64x128xf32> to vector<64x128xf32>
    %cst_99 = arith.constant dense<0.000000e+00> : vector<8x128xf32>
    %307 = tpu.matmul %197, %306, %cst_99 {dimension_numbers = #tpu.dot_dimension_numbers<[1], [0], [0], [1], [0, 0, 1, 1], [], []>} : vector<8x64xf32>, vector<64x128xf32>, vector<8x128xf32> -> vector<8x128xf32>
    %308 = vector.extract_strided_slice %201 {offsets = [2, 0, 0], sizes = [1, 1, 128], strides = [1, 1, 1]} : vector<4x1x128xf32> to vector<1x1x128xf32>
    %309 = vector.shape_cast %308 : vector<1x1x128xf32> to vector<1x128xf32>
    %310 = vector.broadcast %309 : vector<1x128xf32> to vector<8x128xf32>
    %311 = arith.addf %307, %310 : vector<8x128xf32>
    %312 = vector.extract_strided_slice %202 {offsets = [2, 0, 0], sizes = [1, 1, 128], strides = [1, 1, 1]} : vector<4x1x128xf32> to vector<1x1x128xf32>
    %313 = vector.shape_cast %312 : vector<1x1x128xf32> to vector<1x128xf32>
    %314 = vector.shape_cast %311 : vector<8x128xf32> to vector<8x1x128xf32>
    %315 = vector.shape_cast %304 : vector<8x128xf32> to vector<1x8x128xf32>
    %316 = vector.broadcast %314 : vector<8x1x128xf32> to vector<8x8x128xf32>
    %317 = vector.broadcast %315 : vector<1x8x128xf32> to vector<8x8x128xf32>
    %318 = arith.addf %316, %317 : vector<8x8x128xf32>
    %cst_100 = arith.constant 0.000000e+00 : f32
    %319 = vector.broadcast %cst_100 : f32 to vector<8x8x128xf32>
    %320 = arith.cmpf oge, %318, %319 : vector<8x8x128xf32>
    %cst_101 = arith.constant 2.000000e-01 : f32
    %321 = vector.broadcast %cst_101 : f32 to vector<8x8x128xf32>
    %322 = arith.mulf %321, %318 : vector<8x8x128xf32>
    %323 = arith.select %320, %318, %322 : vector<8x8x128xi1>, vector<8x8x128xf32>
    %324 = vector.shape_cast %313 : vector<1x128xf32> to vector<1x1x128xf32>
    %325 = vector.broadcast %324 : vector<1x1x128xf32> to vector<8x8x128xf32>
    %326 = arith.mulf %323, %325 : vector<8x8x128xf32>
    %cst_102 = arith.constant dense<0.000000e+00> : vector<8x8xf32>
    %327 = vector.multi_reduction <add>, %326, %cst_102 [2] : vector<8x8x128xf32> to vector<8x8xf32>
    %cst_103 = arith.constant 0.000000e+00 : f32
    %328 = vector.broadcast %cst_103 : f32 to vector<8x8xf32>
    %329 = arith.cmpf ogt, %0, %328 : vector<8x8xf32>
    %cst_104 = arith.constant -1.000000e+30 : f32
    %330 = vector.broadcast %cst_104 : f32 to vector<8x8xf32>
    %331 = arith.select %329, %327, %330 : vector<8x8xi1>, vector<8x8xf32>
    %cst_105 = arith.constant dense<0xFF800000> : vector<8xf32>
    %332 = vector.multi_reduction <maximumf>, %331, %cst_105 [1] : vector<8x8xf32> to vector<8xf32>
    %333 = vector.shape_cast %332 : vector<8xf32> to vector<8x1xf32>
    %334 = vector.broadcast %333 : vector<8x1xf32> to vector<8x8xf32>
    %335 = arith.subf %331, %334 : vector<8x8xf32>
    %336 = math.exp %335 : vector<8x8xf32>
    %337 = arith.mulf %336, %0 : vector<8x8xf32>
    %cst_106 = arith.constant dense<0.000000e+00> : vector<8xf32>
    %338 = vector.multi_reduction <add>, %337, %cst_106 [1] : vector<8x8xf32> to vector<8xf32>
    %339 = vector.shape_cast %338 : vector<8xf32> to vector<8x1xf32>
    %cst_107 = arith.constant 1.000000e-30 : f32
    %340 = vector.broadcast %cst_107 : f32 to vector<8x1xf32>
    %341 = arith.maximumf %339, %340 : vector<8x1xf32>
    %342 = vector.broadcast %341 : vector<8x1xf32> to vector<8x8xf32>
    %343 = arith.divf %337, %342 : vector<8x8xf32>
    %cst_108 = arith.constant dense<0.000000e+00> : vector<8x128xf32>
    %344 = tpu.matmul %343, %304, %cst_108 {dimension_numbers = #tpu.dot_dimension_numbers<[1], [0], [0], [1], [0, 0, 1, 1], [], []>} : vector<8x8xf32>, vector<8x128xf32>, vector<8x128xf32> -> vector<8x128xf32>
    %345 = arith.maximumf %297, %344 : vector<8x128xf32>
    %346 = vector.extract_strided_slice %198 {offsets = [3, 0, 0], sizes = [1, 64, 128], strides = [1, 1, 1]} : vector<4x64x128xf32> to vector<1x64x128xf32>
    %347 = vector.shape_cast %346 : vector<1x64x128xf32> to vector<64x128xf32>
    %cst_109 = arith.constant dense<0.000000e+00> : vector<8x128xf32>
    %348 = tpu.matmul %197, %347, %cst_109 {dimension_numbers = #tpu.dot_dimension_numbers<[1], [0], [0], [1], [0, 0, 1, 1], [], []>} : vector<8x64xf32>, vector<64x128xf32>, vector<8x128xf32> -> vector<8x128xf32>
    %349 = vector.extract_strided_slice %199 {offsets = [3, 0, 0], sizes = [1, 1, 128], strides = [1, 1, 1]} : vector<4x1x128xf32> to vector<1x1x128xf32>
    %350 = vector.shape_cast %349 : vector<1x1x128xf32> to vector<1x128xf32>
    %351 = vector.broadcast %350 : vector<1x128xf32> to vector<8x128xf32>
    %352 = arith.addf %348, %351 : vector<8x128xf32>
    %353 = vector.extract_strided_slice %200 {offsets = [3, 0, 0], sizes = [1, 64, 128], strides = [1, 1, 1]} : vector<4x64x128xf32> to vector<1x64x128xf32>
    %354 = vector.shape_cast %353 : vector<1x64x128xf32> to vector<64x128xf32>
    %cst_110 = arith.constant dense<0.000000e+00> : vector<8x128xf32>
    %355 = tpu.matmul %197, %354, %cst_110 {dimension_numbers = #tpu.dot_dimension_numbers<[1], [0], [0], [1], [0, 0, 1, 1], [], []>} : vector<8x64xf32>, vector<64x128xf32>, vector<8x128xf32> -> vector<8x128xf32>
    %356 = vector.extract_strided_slice %201 {offsets = [3, 0, 0], sizes = [1, 1, 128], strides = [1, 1, 1]} : vector<4x1x128xf32> to vector<1x1x128xf32>
    %357 = vector.shape_cast %356 : vector<1x1x128xf32> to vector<1x128xf32>
    %358 = vector.broadcast %357 : vector<1x128xf32> to vector<8x128xf32>
    %359 = arith.addf %355, %358 : vector<8x128xf32>
    %360 = vector.extract_strided_slice %202 {offsets = [3, 0, 0], sizes = [1, 1, 128], strides = [1, 1, 1]} : vector<4x1x128xf32> to vector<1x1x128xf32>
    %361 = vector.shape_cast %360 : vector<1x1x128xf32> to vector<1x128xf32>
    %362 = vector.shape_cast %359 : vector<8x128xf32> to vector<8x1x128xf32>
    %363 = vector.shape_cast %352 : vector<8x128xf32> to vector<1x8x128xf32>
    %364 = vector.broadcast %362 : vector<8x1x128xf32> to vector<8x8x128xf32>
    %365 = vector.broadcast %363 : vector<1x8x128xf32> to vector<8x8x128xf32>
    %366 = arith.addf %364, %365 : vector<8x8x128xf32>
    %cst_111 = arith.constant 0.000000e+00 : f32
    %367 = vector.broadcast %cst_111 : f32 to vector<8x8x128xf32>
    %368 = arith.cmpf oge, %366, %367 : vector<8x8x128xf32>
    %cst_112 = arith.constant 2.000000e-01 : f32
    %369 = vector.broadcast %cst_112 : f32 to vector<8x8x128xf32>
    %370 = arith.mulf %369, %366 : vector<8x8x128xf32>
    %371 = arith.select %368, %366, %370 : vector<8x8x128xi1>, vector<8x8x128xf32>
    %372 = vector.shape_cast %361 : vector<1x128xf32> to vector<1x1x128xf32>
    %373 = vector.broadcast %372 : vector<1x1x128xf32> to vector<8x8x128xf32>
    %374 = arith.mulf %371, %373 : vector<8x8x128xf32>
    %cst_113 = arith.constant dense<0.000000e+00> : vector<8x8xf32>
    %375 = vector.multi_reduction <add>, %374, %cst_113 [2] : vector<8x8x128xf32> to vector<8x8xf32>
    %cst_114 = arith.constant 0.000000e+00 : f32
    %376 = vector.broadcast %cst_114 : f32 to vector<8x8xf32>
    %377 = arith.cmpf ogt, %0, %376 : vector<8x8xf32>
    %cst_115 = arith.constant -1.000000e+30 : f32
    %378 = vector.broadcast %cst_115 : f32 to vector<8x8xf32>
    %379 = arith.select %377, %375, %378 : vector<8x8xi1>, vector<8x8xf32>
    %cst_116 = arith.constant dense<0xFF800000> : vector<8xf32>
    %380 = vector.multi_reduction <maximumf>, %379, %cst_116 [1] : vector<8x8xf32> to vector<8xf32>
    %381 = vector.shape_cast %380 : vector<8xf32> to vector<8x1xf32>
    %382 = vector.broadcast %381 : vector<8x1xf32> to vector<8x8xf32>
    %383 = arith.subf %379, %382 : vector<8x8xf32>
    %384 = math.exp %383 : vector<8x8xf32>
    %385 = arith.mulf %384, %0 : vector<8x8xf32>
    %cst_117 = arith.constant dense<0.000000e+00> : vector<8xf32>
    %386 = vector.multi_reduction <add>, %385, %cst_117 [1] : vector<8x8xf32> to vector<8xf32>
    %387 = vector.shape_cast %386 : vector<8xf32> to vector<8x1xf32>
    %cst_118 = arith.constant 1.000000e-30 : f32
    %388 = vector.broadcast %cst_118 : f32 to vector<8x1xf32>
    %389 = arith.maximumf %387, %388 : vector<8x1xf32>
    %390 = vector.broadcast %389 : vector<8x1xf32> to vector<8x8xf32>
    %391 = arith.divf %385, %390 : vector<8x8xf32>
    %cst_119 = arith.constant dense<0.000000e+00> : vector<8x128xf32>
    %392 = tpu.matmul %391, %352, %cst_119 {dimension_numbers = #tpu.dot_dimension_numbers<[1], [0], [0], [1], [0, 0, 1, 1], [], []>} : vector<8x8xf32>, vector<8x128xf32>, vector<8x128xf32> -> vector<8x128xf32>
    %393 = arith.maximumf %345, %392 : vector<8x128xf32>
    %c0_120 = arith.constant 0 : index
    %c0_121 = arith.constant 0 : index
    %394 = vector.load %arg13[%c0_120, %c0_121] : memref<128x1xf32, #tpu.memory_space<vmem>>, vector<128x1xf32>
    %cst_122 = arith.constant dense<0.000000e+00> : vector<8x1xf32>
    %395 = tpu.matmul %393, %394, %cst_122 {dimension_numbers = #tpu.dot_dimension_numbers<[1], [0], [0], [1], [0, 0, 1, 1], [], []>} : vector<8x128xf32>, vector<128x1xf32>, vector<8x1xf32> -> vector<8x1xf32>
    %c0_123 = arith.constant 0 : index
    %c0_124 = arith.constant 0 : index
    %396 = vector.load %arg14[%c0_123, %c0_124] : memref<1x1xf32, #tpu.memory_space<vmem>>, vector<1x1xf32>
    %397 = vector.broadcast %396 : vector<1x1xf32> to vector<8x1xf32>
    %398 = arith.addf %395, %397 : vector<8x1xf32>
    %cst_125 = arith.constant dense<0xFF800000> : vector<1xf32>
    %399 = vector.multi_reduction <maximumf>, %398, %cst_125 [0] : vector<8x1xf32> to vector<1xf32>
    %400 = vector.shape_cast %399 : vector<1xf32> to vector<1x1xf32>
    %401 = vector.broadcast %400 : vector<1x1xf32> to vector<8x1xf32>
    %402 = arith.subf %398, %401 : vector<8x1xf32>
    %403 = math.exp %402 : vector<8x1xf32>
    %c0_126 = arith.constant 0 : index
    %c0_127 = arith.constant 0 : index
    %404 = vector.load %arg2[%c0_126, %c0_127] : memref<2x8xf32, #tpu.memory_space<vmem>>, vector<2x8xf32>
    %cst_128 = arith.constant dense<0.000000e+00> : vector<2x1xf32>
    %405 = tpu.matmul %404, %403, %cst_128 {dimension_numbers = #tpu.dot_dimension_numbers<[1], [0], [0], [1], [0, 0, 1, 1], [], []>} : vector<2x8xf32>, vector<8x1xf32>, vector<2x1xf32> -> vector<2x1xf32>
    %406 = vector.broadcast %403 : vector<8x1xf32> to vector<8x128xf32>
    %407 = arith.mulf %406, %393 : vector<8x128xf32>
    %cst_129 = arith.constant dense<0.000000e+00> : vector<2x128xf32>
    %408 = tpu.matmul %404, %407, %cst_129 {dimension_numbers = #tpu.dot_dimension_numbers<[1], [0], [0], [1], [0, 0, 1, 1], [], []>} : vector<2x8xf32>, vector<8x128xf32>, vector<2x128xf32> -> vector<2x128xf32>
    %cst_130 = arith.constant 1.000000e-30 : f32
    %409 = vector.broadcast %cst_130 : f32 to vector<2x1xf32>
    %410 = arith.maximumf %405, %409 : vector<2x1xf32>
    %411 = vector.broadcast %410 : vector<2x1xf32> to vector<2x128xf32>
    %412 = arith.divf %408, %411 : vector<2x128xf32>
    %c0_131 = arith.constant 0 : index
    %c0_132 = arith.constant 0 : index
    %413 = vector.load %arg15[%c0_131, %c0_132] : memref<2x128xf32, #tpu.memory_space<vmem>>, vector<2x128xf32>
    tpu.vector_store %arg15[%c0_131, %c0_132], %412 {strides = array<i32>} : memref<2x128xf32, #tpu.memory_space<vmem>>, vector<2x128xf32>,
    return
  }
}

module attributes {stable_mosaic.version = 11 : i64} {
  func.func @_encoder_kernel(%arg0: i32, %arg1: memref<8x8x1xf32, #tpu.memory_space<vmem>>, %arg2: memref<8x10xf32, #tpu.memory_space<vmem>>, %arg3: memref<8x8x6xf32, #tpu.memory_space<vmem>>, %arg4: memref<3x1x20xf32, #tpu.memory_space<vmem>>, %arg5: memref<1x20xf32, #tpu.memory_space<vmem>>, %arg6: memref<1x20xf32, #tpu.memory_space<vmem>>, %arg7: memref<3x20x50xf32, #tpu.memory_space<vmem>>, %arg8: memref<1x50xf32, #tpu.memory_space<vmem>>, %arg9: memref<1x50xf32, #tpu.memory_space<vmem>>, %arg10: memref<3x6x64xf32, #tpu.memory_space<vmem>>, %arg11: memref<1x64xf32, #tpu.memory_space<vmem>>, %arg12: memref<1x64xf32, #tpu.memory_space<vmem>>, %arg13: memref<3x64x128xf32, #tpu.memory_space<vmem>>, %arg14: memref<1x128xf32, #tpu.memory_space<vmem>>, %arg15: memref<1x128xf32, #tpu.memory_space<vmem>>, %arg16: memref<10x64xf32, #tpu.memory_space<vmem>>, %arg17: memref<1x64xf32, #tpu.memory_space<vmem>>, %arg18: memref<2x50x32xf32, #tpu.memory_space<vmem>>, %arg19: memref<2x64x32xf32, #tpu.memory_space<vmem>>, %arg20: memref<2x128x32xf32, #tpu.memory_space<vmem>>, %arg21: memref<2x1x32xf32, #tpu.memory_space<vmem>>, %arg22: memref<8x32xf32, #tpu.memory_space<vmem>>) attributes {dimension_semantics = [#tpu.dimension_semantics<parallel>], iteration_bounds = array<i64: 1>, scalar_prefetch = 0 : i64, scratch_operands = 0 : i64, tpu.core_type = #tpu.core_type<tc>, window_params = [{transform_indices = @transform_0, window_bounds = array<i64: 8, 8, 1>}, {transform_indices = @transform_1, window_bounds = array<i64: 8, 10>}, {transform_indices = @transform_2, window_bounds = array<i64: 8, 8, 6>}, {pipeline_mode = #tpu.pipeline_mode<synchronous>, transform_indices = @transform_3, window_bounds = array<i64: 3, 1, 20>}, {pipeline_mode = #tpu.pipeline_mode<synchronous>, transform_indices = @transform_4, window_bounds = array<i64: 1, 20>}, {pipeline_mode = #tpu.pipeline_mode<synchronous>, transform_indices = @transform_5, window_bounds = array<i64: 1, 20>}, {pipeline_mode = #tpu.pipeline_mode<synchronous>, transform_indices = @transform_6, window_bounds = array<i64: 3, 20, 50>}, {pipeline_mode = #tpu.pipeline_mode<synchronous>, transform_indices = @transform_7, window_bounds = array<i64: 1, 50>}, {pipeline_mode = #tpu.pipeline_mode<synchronous>, transform_indices = @transform_8, window_bounds = array<i64: 1, 50>}, {pipeline_mode = #tpu.pipeline_mode<synchronous>, transform_indices = @transform_9, window_bounds = array<i64: 3, 6, 64>}, {pipeline_mode = #tpu.pipeline_mode<synchronous>, transform_indices = @transform_10, window_bounds = array<i64: 1, 64>}, {pipeline_mode = #tpu.pipeline_mode<synchronous>, transform_indices = @transform_11, window_bounds = array<i64: 1, 64>}, {pipeline_mode = #tpu.pipeline_mode<synchronous>, transform_indices = @transform_12, window_bounds = array<i64: 3, 64, 128>}, {pipeline_mode = #tpu.pipeline_mode<synchronous>, transform_indices = @transform_13, window_bounds = array<i64: 1, 128>}, {pipeline_mode = #tpu.pipeline_mode<synchronous>, transform_indices = @transform_14, window_bounds = array<i64: 1, 128>}, {pipeline_mode = #tpu.pipeline_mode<synchronous>, transform_indices = @transform_15, window_bounds = array<i64: 10, 64>}, {pipeline_mode = #tpu.pipeline_mode<synchronous>, transform_indices = @transform_16, window_bounds = array<i64: 1, 64>}, {pipeline_mode = #tpu.pipeline_mode<synchronous>, transform_indices = @transform_17, window_bounds = array<i64: 2, 50, 32>}, {pipeline_mode = #tpu.pipeline_mode<synchronous>, transform_indices = @transform_18, window_bounds = array<i64: 2, 64, 32>}, {pipeline_mode = #tpu.pipeline_mode<synchronous>, transform_indices = @transform_19, window_bounds = array<i64: 2, 128, 32>}, {pipeline_mode = #tpu.pipeline_mode<synchronous>, transform_indices = @transform_20, window_bounds = array<i64: 2, 1, 32>}, {transform_indices = @transform_21, window_bounds = array<i64: 8, 32>}]} {
    %c0 = arith.constant 0 : index
    %c0_0 = arith.constant 0 : index
    %c0_1 = arith.constant 0 : index
    %0 = vector.load %arg4[%c0, %c0_0, %c0_1] : memref<3x1x20xf32, #tpu.memory_space<vmem>>, vector<3x1x20xf32>
    %c0_2 = arith.constant 0 : index
    %c0_3 = arith.constant 0 : index
    %1 = vector.load %arg5[%c0_2, %c0_3] : memref<1x20xf32, #tpu.memory_space<vmem>>, vector<1x20xf32>
    %c0_4 = arith.constant 0 : index
    %c0_5 = arith.constant 0 : index
    %2 = vector.load %arg6[%c0_4, %c0_5] : memref<1x20xf32, #tpu.memory_space<vmem>>, vector<1x20xf32>
    %c0_6 = arith.constant 0 : index
    %c0_7 = arith.constant 0 : index
    %c0_8 = arith.constant 0 : index
    %3 = vector.load %arg7[%c0_6, %c0_7, %c0_8] : memref<3x20x50xf32, #tpu.memory_space<vmem>>, vector<3x20x50xf32>
    %c0_9 = arith.constant 0 : index
    %c0_10 = arith.constant 0 : index
    %4 = vector.load %arg8[%c0_9, %c0_10] : memref<1x50xf32, #tpu.memory_space<vmem>>, vector<1x50xf32>
    %c0_11 = arith.constant 0 : index
    %c0_12 = arith.constant 0 : index
    %5 = vector.load %arg9[%c0_11, %c0_12] : memref<1x50xf32, #tpu.memory_space<vmem>>, vector<1x50xf32>
    %cst = arith.constant 0.000000e+00 : f32
    %6 = vector.broadcast %cst : f32 to vector<8x50xf32>
    %cst_13 = arith.constant 0.000000e+00 : f32
    %7 = vector.broadcast %cst_13 : f32 to vector<8x20xf32>
    %c0_14 = arith.constant 0 : index
    %c1 = arith.constant 1 : index
    %c0_15 = arith.constant 0 : index
    %8 = vector.load %arg1[%c0_14, %c1, %c0_15] : memref<8x8x1xf32, #tpu.memory_space<vmem>>, vector<8x1x1xf32>
    %9 = vector.shape_cast %8 : vector<8x1x1xf32> to vector<8x1xf32>
    %10 = vector.extract_strided_slice %0 {offsets = [0, 0, 0], sizes = [1, 1, 20], strides = [1, 1, 1]} : vector<3x1x20xf32> to vector<1x1x20xf32>
    %11 = vector.shape_cast %10 : vector<1x1x20xf32> to vector<1x20xf32>
    %12 = vector.broadcast %9 : vector<8x1xf32> to vector<8x20xf32>
    %13 = vector.broadcast %11 : vector<1x20xf32> to vector<8x20xf32>
    %14 = arith.mulf %12, %13 : vector<8x20xf32>
    %15 = arith.addf %7, %14 : vector<8x20xf32>
    %c0_16 = arith.constant 0 : index
    %c2 = arith.constant 2 : index
    %c0_17 = arith.constant 0 : index
    %16 = vector.load %arg1[%c0_16, %c2, %c0_17] : memref<8x8x1xf32, #tpu.memory_space<vmem>>, vector<8x1x1xf32>
    %17 = vector.shape_cast %16 : vector<8x1x1xf32> to vector<8x1xf32>
    %18 = vector.extract_strided_slice %0 {offsets = [1, 0, 0], sizes = [1, 1, 20], strides = [1, 1, 1]} : vector<3x1x20xf32> to vector<1x1x20xf32>
    %19 = vector.shape_cast %18 : vector<1x1x20xf32> to vector<1x20xf32>
    %20 = vector.broadcast %17 : vector<8x1xf32> to vector<8x20xf32>
    %21 = vector.broadcast %19 : vector<1x20xf32> to vector<8x20xf32>
    %22 = arith.mulf %20, %21 : vector<8x20xf32>
    %23 = arith.addf %15, %22 : vector<8x20xf32>
    %c0_18 = arith.constant 0 : index
    %c3 = arith.constant 3 : index
    %c0_19 = arith.constant 0 : index
    %24 = vector.load %arg1[%c0_18, %c3, %c0_19] : memref<8x8x1xf32, #tpu.memory_space<vmem>>, vector<8x1x1xf32>
    %25 = vector.shape_cast %24 : vector<8x1x1xf32> to vector<8x1xf32>
    %26 = vector.extract_strided_slice %0 {offsets = [2, 0, 0], sizes = [1, 1, 20], strides = [1, 1, 1]} : vector<3x1x20xf32> to vector<1x1x20xf32>
    %27 = vector.shape_cast %26 : vector<1x1x20xf32> to vector<1x20xf32>
    %28 = vector.broadcast %25 : vector<8x1xf32> to vector<8x20xf32>
    %29 = vector.broadcast %27 : vector<1x20xf32> to vector<8x20xf32>
    %30 = arith.mulf %28, %29 : vector<8x20xf32>
    %31 = arith.addf %23, %30 : vector<8x20xf32>
    %32 = vector.broadcast %1 : vector<1x20xf32> to vector<8x20xf32>
    %33 = arith.mulf %31, %32 : vector<8x20xf32>
    %34 = vector.broadcast %2 : vector<1x20xf32> to vector<8x20xf32>
    %35 = arith.addf %33, %34 : vector<8x20xf32>
    %cst_20 = arith.constant 0.000000e+00 : f32
    %36 = vector.broadcast %cst_20 : f32 to vector<8x20xf32>
    %37 = arith.maximumf %35, %36 : vector<8x20xf32>
    %38 = vector.extract_strided_slice %3 {offsets = [0, 0, 0], sizes = [1, 20, 50], strides = [1, 1, 1]} : vector<3x20x50xf32> to vector<1x20x50xf32>
    %39 = vector.shape_cast %38 : vector<1x20x50xf32> to vector<20x50xf32>
    %cst_21 = arith.constant dense<0.000000e+00> : vector<8x50xf32>
    %40 = tpu.matmul %37, %39, %cst_21 {dimension_numbers = #tpu.dot_dimension_numbers<[1], [0], [0], [1], [0, 0, 1, 1], [], []>} : vector<8x20xf32>, vector<20x50xf32>, vector<8x50xf32> -> vector<8x50xf32>
    %41 = arith.addf %6, %40 : vector<8x50xf32>
    %cst_22 = arith.constant 0.000000e+00 : f32
    %42 = vector.broadcast %cst_22 : f32 to vector<8x20xf32>
    %c0_23 = arith.constant 0 : index
    %c3_24 = arith.constant 3 : index
    %c0_25 = arith.constant 0 : index
    %43 = vector.load %arg1[%c0_23, %c3_24, %c0_25] : memref<8x8x1xf32, #tpu.memory_space<vmem>>, vector<8x1x1xf32>
    %44 = vector.shape_cast %43 : vector<8x1x1xf32> to vector<8x1xf32>
    %45 = vector.extract_strided_slice %0 {offsets = [0, 0, 0], sizes = [1, 1, 20], strides = [1, 1, 1]} : vector<3x1x20xf32> to vector<1x1x20xf32>
    %46 = vector.shape_cast %45 : vector<1x1x20xf32> to vector<1x20xf32>
    %47 = vector.broadcast %44 : vector<8x1xf32> to vector<8x20xf32>
    %48 = vector.broadcast %46 : vector<1x20xf32> to vector<8x20xf32>
    %49 = arith.mulf %47, %48 : vector<8x20xf32>
    %50 = arith.addf %42, %49 : vector<8x20xf32>
    %c0_26 = arith.constant 0 : index
    %c4 = arith.constant 4 : index
    %c0_27 = arith.constant 0 : index
    %51 = vector.load %arg1[%c0_26, %c4, %c0_27] : memref<8x8x1xf32, #tpu.memory_space<vmem>>, vector<8x1x1xf32>
    %52 = vector.shape_cast %51 : vector<8x1x1xf32> to vector<8x1xf32>
    %53 = vector.extract_strided_slice %0 {offsets = [1, 0, 0], sizes = [1, 1, 20], strides = [1, 1, 1]} : vector<3x1x20xf32> to vector<1x1x20xf32>
    %54 = vector.shape_cast %53 : vector<1x1x20xf32> to vector<1x20xf32>
    %55 = vector.broadcast %52 : vector<8x1xf32> to vector<8x20xf32>
    %56 = vector.broadcast %54 : vector<1x20xf32> to vector<8x20xf32>
    %57 = arith.mulf %55, %56 : vector<8x20xf32>
    %58 = arith.addf %50, %57 : vector<8x20xf32>
    %c0_28 = arith.constant 0 : index
    %c5 = arith.constant 5 : index
    %c0_29 = arith.constant 0 : index
    %59 = vector.load %arg1[%c0_28, %c5, %c0_29] : memref<8x8x1xf32, #tpu.memory_space<vmem>>, vector<8x1x1xf32>
    %60 = vector.shape_cast %59 : vector<8x1x1xf32> to vector<8x1xf32>
    %61 = vector.extract_strided_slice %0 {offsets = [2, 0, 0], sizes = [1, 1, 20], strides = [1, 1, 1]} : vector<3x1x20xf32> to vector<1x1x20xf32>
    %62 = vector.shape_cast %61 : vector<1x1x20xf32> to vector<1x20xf32>
    %63 = vector.broadcast %60 : vector<8x1xf32> to vector<8x20xf32>
    %64 = vector.broadcast %62 : vector<1x20xf32> to vector<8x20xf32>
    %65 = arith.mulf %63, %64 : vector<8x20xf32>
    %66 = arith.addf %58, %65 : vector<8x20xf32>
    %67 = vector.broadcast %1 : vector<1x20xf32> to vector<8x20xf32>
    %68 = arith.mulf %66, %67 : vector<8x20xf32>
    %69 = vector.broadcast %2 : vector<1x20xf32> to vector<8x20xf32>
    %70 = arith.addf %68, %69 : vector<8x20xf32>
    %cst_30 = arith.constant 0.000000e+00 : f32
    %71 = vector.broadcast %cst_30 : f32 to vector<8x20xf32>
    %72 = arith.maximumf %70, %71 : vector<8x20xf32>
    %73 = vector.extract_strided_slice %3 {offsets = [1, 0, 0], sizes = [1, 20, 50], strides = [1, 1, 1]} : vector<3x20x50xf32> to vector<1x20x50xf32>
    %74 = vector.shape_cast %73 : vector<1x20x50xf32> to vector<20x50xf32>
    %cst_31 = arith.constant dense<0.000000e+00> : vector<8x50xf32>
    %75 = tpu.matmul %72, %74, %cst_31 {dimension_numbers = #tpu.dot_dimension_numbers<[1], [0], [0], [1], [0, 0, 1, 1], [], []>} : vector<8x20xf32>, vector<20x50xf32>, vector<8x50xf32> -> vector<8x50xf32>
    %76 = arith.addf %41, %75 : vector<8x50xf32>
    %cst_32 = arith.constant 0.000000e+00 : f32
    %77 = vector.broadcast %cst_32 : f32 to vector<8x20xf32>
    %c0_33 = arith.constant 0 : index
    %c5_34 = arith.constant 5 : index
    %c0_35 = arith.constant 0 : index
    %78 = vector.load %arg1[%c0_33, %c5_34, %c0_35] : memref<8x8x1xf32, #tpu.memory_space<vmem>>, vector<8x1x1xf32>
    %79 = vector.shape_cast %78 : vector<8x1x1xf32> to vector<8x1xf32>
    %80 = vector.extract_strided_slice %0 {offsets = [0, 0, 0], sizes = [1, 1, 20], strides = [1, 1, 1]} : vector<3x1x20xf32> to vector<1x1x20xf32>
    %81 = vector.shape_cast %80 : vector<1x1x20xf32> to vector<1x20xf32>
    %82 = vector.broadcast %79 : vector<8x1xf32> to vector<8x20xf32>
    %83 = vector.broadcast %81 : vector<1x20xf32> to vector<8x20xf32>
    %84 = arith.mulf %82, %83 : vector<8x20xf32>
    %85 = arith.addf %77, %84 : vector<8x20xf32>
    %c0_36 = arith.constant 0 : index
    %c6 = arith.constant 6 : index
    %c0_37 = arith.constant 0 : index
    %86 = vector.load %arg1[%c0_36, %c6, %c0_37] : memref<8x8x1xf32, #tpu.memory_space<vmem>>, vector<8x1x1xf32>
    %87 = vector.shape_cast %86 : vector<8x1x1xf32> to vector<8x1xf32>
    %88 = vector.extract_strided_slice %0 {offsets = [1, 0, 0], sizes = [1, 1, 20], strides = [1, 1, 1]} : vector<3x1x20xf32> to vector<1x1x20xf32>
    %89 = vector.shape_cast %88 : vector<1x1x20xf32> to vector<1x20xf32>
    %90 = vector.broadcast %87 : vector<8x1xf32> to vector<8x20xf32>
    %91 = vector.broadcast %89 : vector<1x20xf32> to vector<8x20xf32>
    %92 = arith.mulf %90, %91 : vector<8x20xf32>
    %93 = arith.addf %85, %92 : vector<8x20xf32>
    %c0_38 = arith.constant 0 : index
    %c7 = arith.constant 7 : index
    %c0_39 = arith.constant 0 : index
    %94 = vector.load %arg1[%c0_38, %c7, %c0_39] : memref<8x8x1xf32, #tpu.memory_space<vmem>>, vector<8x1x1xf32>
    %95 = vector.shape_cast %94 : vector<8x1x1xf32> to vector<8x1xf32>
    %96 = vector.extract_strided_slice %0 {offsets = [2, 0, 0], sizes = [1, 1, 20], strides = [1, 1, 1]} : vector<3x1x20xf32> to vector<1x1x20xf32>
    %97 = vector.shape_cast %96 : vector<1x1x20xf32> to vector<1x20xf32>
    %98 = vector.broadcast %95 : vector<8x1xf32> to vector<8x20xf32>
    %99 = vector.broadcast %97 : vector<1x20xf32> to vector<8x20xf32>
    %100 = arith.mulf %98, %99 : vector<8x20xf32>
    %101 = arith.addf %93, %100 : vector<8x20xf32>
    %102 = vector.broadcast %1 : vector<1x20xf32> to vector<8x20xf32>
    %103 = arith.mulf %101, %102 : vector<8x20xf32>
    %104 = vector.broadcast %2 : vector<1x20xf32> to vector<8x20xf32>
    %105 = arith.addf %103, %104 : vector<8x20xf32>
    %cst_40 = arith.constant 0.000000e+00 : f32
    %106 = vector.broadcast %cst_40 : f32 to vector<8x20xf32>
    %107 = arith.maximumf %105, %106 : vector<8x20xf32>
    %108 = vector.extract_strided_slice %3 {offsets = [2, 0, 0], sizes = [1, 20, 50], strides = [1, 1, 1]} : vector<3x20x50xf32> to vector<1x20x50xf32>
    %109 = vector.shape_cast %108 : vector<1x20x50xf32> to vector<20x50xf32>
    %cst_41 = arith.constant dense<0.000000e+00> : vector<8x50xf32>
    %110 = tpu.matmul %107, %109, %cst_41 {dimension_numbers = #tpu.dot_dimension_numbers<[1], [0], [0], [1], [0, 0, 1, 1], [], []>} : vector<8x20xf32>, vector<20x50xf32>, vector<8x50xf32> -> vector<8x50xf32>
    %111 = arith.addf %76, %110 : vector<8x50xf32>
    %112 = vector.broadcast %4 : vector<1x50xf32> to vector<8x50xf32>
    %113 = arith.mulf %111, %112 : vector<8x50xf32>
    %114 = vector.broadcast %5 : vector<1x50xf32> to vector<8x50xf32>
    %115 = arith.addf %113, %114 : vector<8x50xf32>
    %cst_42 = arith.constant 0.000000e+00 : f32
    %116 = vector.broadcast %cst_42 : f32 to vector<8x50xf32>
    %117 = arith.maximumf %115, %116 : vector<8x50xf32>
    %c0_43 = arith.constant 0 : index
    %c0_44 = arith.constant 0 : index
    %c0_45 = arith.constant 0 : index
    %118 = vector.load %arg10[%c0_43, %c0_44, %c0_45] : memref<3x6x64xf32, #tpu.memory_space<vmem>>, vector<3x6x64xf32>
    %c0_46 = arith.constant 0 : index
    %c0_47 = arith.constant 0 : index
    %119 = vector.load %arg11[%c0_46, %c0_47] : memref<1x64xf32, #tpu.memory_space<vmem>>, vector<1x64xf32>
    %c0_48 = arith.constant 0 : index
    %c0_49 = arith.constant 0 : index
    %120 = vector.load %arg12[%c0_48, %c0_49] : memref<1x64xf32, #tpu.memory_space<vmem>>, vector<1x64xf32>
    %c0_50 = arith.constant 0 : index
    %c0_51 = arith.constant 0 : index
    %c0_52 = arith.constant 0 : index
    %121 = vector.load %arg13[%c0_50, %c0_51, %c0_52] : memref<3x64x128xf32, #tpu.memory_space<vmem>>, vector<3x64x128xf32>
    %c0_53 = arith.constant 0 : index
    %c0_54 = arith.constant 0 : index
    %122 = vector.load %arg14[%c0_53, %c0_54] : memref<1x128xf32, #tpu.memory_space<vmem>>, vector<1x128xf32>
    %c0_55 = arith.constant 0 : index
    %c0_56 = arith.constant 0 : index
    %123 = vector.load %arg15[%c0_55, %c0_56] : memref<1x128xf32, #tpu.memory_space<vmem>>, vector<1x128xf32>
    %cst_57 = arith.constant 0.000000e+00 : f32
    %124 = vector.broadcast %cst_57 : f32 to vector<8x128xf32>
    %cst_58 = arith.constant 0.000000e+00 : f32
    %125 = vector.broadcast %cst_58 : f32 to vector<8x64xf32>
    %c0_59 = arith.constant 0 : index
    %c1_60 = arith.constant 1 : index
    %c0_61 = arith.constant 0 : index
    %126 = vector.load %arg3[%c0_59, %c1_60, %c0_61] : memref<8x8x6xf32, #tpu.memory_space<vmem>>, vector<8x1x6xf32>
    %127 = vector.shape_cast %126 : vector<8x1x6xf32> to vector<8x6xf32>
    %128 = vector.extract_strided_slice %118 {offsets = [0, 0, 0], sizes = [1, 6, 64], strides = [1, 1, 1]} : vector<3x6x64xf32> to vector<1x6x64xf32>
    %129 = vector.shape_cast %128 : vector<1x6x64xf32> to vector<6x64xf32>
    %cst_62 = arith.constant dense<0.000000e+00> : vector<8x64xf32>
    %130 = tpu.matmul %127, %129, %cst_62 {dimension_numbers = #tpu.dot_dimension_numbers<[1], [0], [0], [1], [0, 0, 1, 1], [], []>} : vector<8x6xf32>, vector<6x64xf32>, vector<8x64xf32> -> vector<8x64xf32>
    %131 = arith.addf %125, %130 : vector<8x64xf32>
    %c0_63 = arith.constant 0 : index
    %c2_64 = arith.constant 2 : index
    %c0_65 = arith.constant 0 : index
    %132 = vector.load %arg3[%c0_63, %c2_64, %c0_65] : memref<8x8x6xf32, #tpu.memory_space<vmem>>, vector<8x1x6xf32>
    %133 = vector.shape_cast %132 : vector<8x1x6xf32> to vector<8x6xf32>
    %134 = vector.extract_strided_slice %118 {offsets = [1, 0, 0], sizes = [1, 6, 64], strides = [1, 1, 1]} : vector<3x6x64xf32> to vector<1x6x64xf32>
    %135 = vector.shape_cast %134 : vector<1x6x64xf32> to vector<6x64xf32>
    %cst_66 = arith.constant dense<0.000000e+00> : vector<8x64xf32>
    %136 = tpu.matmul %133, %135, %cst_66 {dimension_numbers = #tpu.dot_dimension_numbers<[1], [0], [0], [1], [0, 0, 1, 1], [], []>} : vector<8x6xf32>, vector<6x64xf32>, vector<8x64xf32> -> vector<8x64xf32>
    %137 = arith.addf %131, %136 : vector<8x64xf32>
    %c0_67 = arith.constant 0 : index
    %c3_68 = arith.constant 3 : index
    %c0_69 = arith.constant 0 : index
    %138 = vector.load %arg3[%c0_67, %c3_68, %c0_69] : memref<8x8x6xf32, #tpu.memory_space<vmem>>, vector<8x1x6xf32>
    %139 = vector.shape_cast %138 : vector<8x1x6xf32> to vector<8x6xf32>
    %140 = vector.extract_strided_slice %118 {offsets = [2, 0, 0], sizes = [1, 6, 64], strides = [1, 1, 1]} : vector<3x6x64xf32> to vector<1x6x64xf32>
    %141 = vector.shape_cast %140 : vector<1x6x64xf32> to vector<6x64xf32>
    %cst_70 = arith.constant dense<0.000000e+00> : vector<8x64xf32>
    %142 = tpu.matmul %139, %141, %cst_70 {dimension_numbers = #tpu.dot_dimension_numbers<[1], [0], [0], [1], [0, 0, 1, 1], [], []>} : vector<8x6xf32>, vector<6x64xf32>, vector<8x64xf32> -> vector<8x64xf32>
    %143 = arith.addf %137, %142 : vector<8x64xf32>
    %144 = vector.broadcast %119 : vector<1x64xf32> to vector<8x64xf32>
    %145 = arith.mulf %143, %144 : vector<8x64xf32>
    %146 = vector.broadcast %120 : vector<1x64xf32> to vector<8x64xf32>
    %147 = arith.addf %145, %146 : vector<8x64xf32>
    %cst_71 = arith.constant 0.000000e+00 : f32
    %148 = vector.broadcast %cst_71 : f32 to vector<8x64xf32>
    %149 = arith.maximumf %147, %148 : vector<8x64xf32>
    %150 = vector.extract_strided_slice %121 {offsets = [0, 0, 0], sizes = [1, 64, 128], strides = [1, 1, 1]} : vector<3x64x128xf32> to vector<1x64x128xf32>
    %151 = vector.shape_cast %150 : vector<1x64x128xf32> to vector<64x128xf32>
    %cst_72 = arith.constant dense<0.000000e+00> : vector<8x128xf32>
    %152 = tpu.matmul %149, %151, %cst_72 {dimension_numbers = #tpu.dot_dimension_numbers<[1], [0], [0], [1], [0, 0, 1, 1], [], []>} : vector<8x64xf32>, vector<64x128xf32>, vector<8x128xf32> -> vector<8x128xf32>
    %153 = arith.addf %124, %152 : vector<8x128xf32>
    %cst_73 = arith.constant 0.000000e+00 : f32
    %154 = vector.broadcast %cst_73 : f32 to vector<8x64xf32>
    %c0_74 = arith.constant 0 : index
    %c3_75 = arith.constant 3 : index
    %c0_76 = arith.constant 0 : index
    %155 = vector.load %arg3[%c0_74, %c3_75, %c0_76] : memref<8x8x6xf32, #tpu.memory_space<vmem>>, vector<8x1x6xf32>
    %156 = vector.shape_cast %155 : vector<8x1x6xf32> to vector<8x6xf32>
    %157 = vector.extract_strided_slice %118 {offsets = [0, 0, 0], sizes = [1, 6, 64], strides = [1, 1, 1]} : vector<3x6x64xf32> to vector<1x6x64xf32>
    %158 = vector.shape_cast %157 : vector<1x6x64xf32> to vector<6x64xf32>
    %cst_77 = arith.constant dense<0.000000e+00> : vector<8x64xf32>
    %159 = tpu.matmul %156, %158, %cst_77 {dimension_numbers = #tpu.dot_dimension_numbers<[1], [0], [0], [1], [0, 0, 1, 1], [], []>} : vector<8x6xf32>, vector<6x64xf32>, vector<8x64xf32> -> vector<8x64xf32>
    %160 = arith.addf %154, %159 : vector<8x64xf32>
    %c0_78 = arith.constant 0 : index
    %c4_79 = arith.constant 4 : index
    %c0_80 = arith.constant 0 : index
    %161 = vector.load %arg3[%c0_78, %c4_79, %c0_80] : memref<8x8x6xf32, #tpu.memory_space<vmem>>, vector<8x1x6xf32>
    %162 = vector.shape_cast %161 : vector<8x1x6xf32> to vector<8x6xf32>
    %163 = vector.extract_strided_slice %118 {offsets = [1, 0, 0], sizes = [1, 6, 64], strides = [1, 1, 1]} : vector<3x6x64xf32> to vector<1x6x64xf32>
    %164 = vector.shape_cast %163 : vector<1x6x64xf32> to vector<6x64xf32>
    %cst_81 = arith.constant dense<0.000000e+00> : vector<8x64xf32>
    %165 = tpu.matmul %162, %164, %cst_81 {dimension_numbers = #tpu.dot_dimension_numbers<[1], [0], [0], [1], [0, 0, 1, 1], [], []>} : vector<8x6xf32>, vector<6x64xf32>, vector<8x64xf32> -> vector<8x64xf32>
    %166 = arith.addf %160, %165 : vector<8x64xf32>
    %c0_82 = arith.constant 0 : index
    %c5_83 = arith.constant 5 : index
    %c0_84 = arith.constant 0 : index
    %167 = vector.load %arg3[%c0_82, %c5_83, %c0_84] : memref<8x8x6xf32, #tpu.memory_space<vmem>>, vector<8x1x6xf32>
    %168 = vector.shape_cast %167 : vector<8x1x6xf32> to vector<8x6xf32>
    %169 = vector.extract_strided_slice %118 {offsets = [2, 0, 0], sizes = [1, 6, 64], strides = [1, 1, 1]} : vector<3x6x64xf32> to vector<1x6x64xf32>
    %170 = vector.shape_cast %169 : vector<1x6x64xf32> to vector<6x64xf32>
    %cst_85 = arith.constant dense<0.000000e+00> : vector<8x64xf32>
    %171 = tpu.matmul %168, %170, %cst_85 {dimension_numbers = #tpu.dot_dimension_numbers<[1], [0], [0], [1], [0, 0, 1, 1], [], []>} : vector<8x6xf32>, vector<6x64xf32>, vector<8x64xf32> -> vector<8x64xf32>
    %172 = arith.addf %166, %171 : vector<8x64xf32>
    %173 = vector.broadcast %119 : vector<1x64xf32> to vector<8x64xf32>
    %174 = arith.mulf %172, %173 : vector<8x64xf32>
    %175 = vector.broadcast %120 : vector<1x64xf32> to vector<8x64xf32>
    %176 = arith.addf %174, %175 : vector<8x64xf32>
    %cst_86 = arith.constant 0.000000e+00 : f32
    %177 = vector.broadcast %cst_86 : f32 to vector<8x64xf32>
    %178 = arith.maximumf %176, %177 : vector<8x64xf32>
    %179 = vector.extract_strided_slice %121 {offsets = [1, 0, 0], sizes = [1, 64, 128], strides = [1, 1, 1]} : vector<3x64x128xf32> to vector<1x64x128xf32>
    %180 = vector.shape_cast %179 : vector<1x64x128xf32> to vector<64x128xf32>
    %cst_87 = arith.constant dense<0.000000e+00> : vector<8x128xf32>
    %181 = tpu.matmul %178, %180, %cst_87 {dimension_numbers = #tpu.dot_dimension_numbers<[1], [0], [0], [1], [0, 0, 1, 1], [], []>} : vector<8x64xf32>, vector<64x128xf32>, vector<8x128xf32> -> vector<8x128xf32>
    %182 = arith.addf %153, %181 : vector<8x128xf32>
    %cst_88 = arith.constant 0.000000e+00 : f32
    %183 = vector.broadcast %cst_88 : f32 to vector<8x64xf32>
    %c0_89 = arith.constant 0 : index
    %c5_90 = arith.constant 5 : index
    %c0_91 = arith.constant 0 : index
    %184 = vector.load %arg3[%c0_89, %c5_90, %c0_91] : memref<8x8x6xf32, #tpu.memory_space<vmem>>, vector<8x1x6xf32>
    %185 = vector.shape_cast %184 : vector<8x1x6xf32> to vector<8x6xf32>
    %186 = vector.extract_strided_slice %118 {offsets = [0, 0, 0], sizes = [1, 6, 64], strides = [1, 1, 1]} : vector<3x6x64xf32> to vector<1x6x64xf32>
    %187 = vector.shape_cast %186 : vector<1x6x64xf32> to vector<6x64xf32>
    %cst_92 = arith.constant dense<0.000000e+00> : vector<8x64xf32>
    %188 = tpu.matmul %185, %187, %cst_92 {dimension_numbers = #tpu.dot_dimension_numbers<[1], [0], [0], [1], [0, 0, 1, 1], [], []>} : vector<8x6xf32>, vector<6x64xf32>, vector<8x64xf32> -> vector<8x64xf32>
    %189 = arith.addf %183, %188 : vector<8x64xf32>
    %c0_93 = arith.constant 0 : index
    %c6_94 = arith.constant 6 : index
    %c0_95 = arith.constant 0 : index
    %190 = vector.load %arg3[%c0_93, %c6_94, %c0_95] : memref<8x8x6xf32, #tpu.memory_space<vmem>>, vector<8x1x6xf32>
    %191 = vector.shape_cast %190 : vector<8x1x6xf32> to vector<8x6xf32>
    %192 = vector.extract_strided_slice %118 {offsets = [1, 0, 0], sizes = [1, 6, 64], strides = [1, 1, 1]} : vector<3x6x64xf32> to vector<1x6x64xf32>
    %193 = vector.shape_cast %192 : vector<1x6x64xf32> to vector<6x64xf32>
    %cst_96 = arith.constant dense<0.000000e+00> : vector<8x64xf32>
    %194 = tpu.matmul %191, %193, %cst_96 {dimension_numbers = #tpu.dot_dimension_numbers<[1], [0], [0], [1], [0, 0, 1, 1], [], []>} : vector<8x6xf32>, vector<6x64xf32>, vector<8x64xf32> -> vector<8x64xf32>
    %195 = arith.addf %189, %194 : vector<8x64xf32>
    %c0_97 = arith.constant 0 : index
    %c7_98 = arith.constant 7 : index
    %c0_99 = arith.constant 0 : index
    %196 = vector.load %arg3[%c0_97, %c7_98, %c0_99] : memref<8x8x6xf32, #tpu.memory_space<vmem>>, vector<8x1x6xf32>
    %197 = vector.shape_cast %196 : vector<8x1x6xf32> to vector<8x6xf32>
    %198 = vector.extract_strided_slice %118 {offsets = [2, 0, 0], sizes = [1, 6, 64], strides = [1, 1, 1]} : vector<3x6x64xf32> to vector<1x6x64xf32>
    %199 = vector.shape_cast %198 : vector<1x6x64xf32> to vector<6x64xf32>
    %cst_100 = arith.constant dense<0.000000e+00> : vector<8x64xf32>
    %200 = tpu.matmul %197, %199, %cst_100 {dimension_numbers = #tpu.dot_dimension_numbers<[1], [0], [0], [1], [0, 0, 1, 1], [], []>} : vector<8x6xf32>, vector<6x64xf32>, vector<8x64xf32> -> vector<8x64xf32>
    %201 = arith.addf %195, %200 : vector<8x64xf32>
    %202 = vector.broadcast %119 : vector<1x64xf32> to vector<8x64xf32>
    %203 = arith.mulf %201, %202 : vector<8x64xf32>
    %204 = vector.broadcast %120 : vector<1x64xf32> to vector<8x64xf32>
    %205 = arith.addf %203, %204 : vector<8x64xf32>
    %cst_101 = arith.constant 0.000000e+00 : f32
    %206 = vector.broadcast %cst_101 : f32 to vector<8x64xf32>
    %207 = arith.maximumf %205, %206 : vector<8x64xf32>
    %208 = vector.extract_strided_slice %121 {offsets = [2, 0, 0], sizes = [1, 64, 128], strides = [1, 1, 1]} : vector<3x64x128xf32> to vector<1x64x128xf32>
    %209 = vector.shape_cast %208 : vector<1x64x128xf32> to vector<64x128xf32>
    %cst_102 = arith.constant dense<0.000000e+00> : vector<8x128xf32>
    %210 = tpu.matmul %207, %209, %cst_102 {dimension_numbers = #tpu.dot_dimension_numbers<[1], [0], [0], [1], [0, 0, 1, 1], [], []>} : vector<8x64xf32>, vector<64x128xf32>, vector<8x128xf32> -> vector<8x128xf32>
    %211 = arith.addf %182, %210 : vector<8x128xf32>
    %212 = vector.broadcast %122 : vector<1x128xf32> to vector<8x128xf32>
    %213 = arith.mulf %211, %212 : vector<8x128xf32>
    %214 = vector.broadcast %123 : vector<1x128xf32> to vector<8x128xf32>
    %215 = arith.addf %213, %214 : vector<8x128xf32>
    %cst_103 = arith.constant 0.000000e+00 : f32
    %216 = vector.broadcast %cst_103 : f32 to vector<8x128xf32>
    %217 = arith.maximumf %215, %216 : vector<8x128xf32>
    %c0_104 = arith.constant 0 : index
    %c0_105 = arith.constant 0 : index
    %218 = vector.load %arg2[%c0_104, %c0_105] : memref<8x10xf32, #tpu.memory_space<vmem>>, vector<8x10xf32>
    %c0_106 = arith.constant 0 : index
    %c0_107 = arith.constant 0 : index
    %219 = vector.load %arg16[%c0_106, %c0_107] : memref<10x64xf32, #tpu.memory_space<vmem>>, vector<10x64xf32>
    %cst_108 = arith.constant dense<0.000000e+00> : vector<8x64xf32>
    %220 = tpu.matmul %218, %219, %cst_108 {dimension_numbers = #tpu.dot_dimension_numbers<[1], [0], [0], [1], [0, 0, 1, 1], [], []>} : vector<8x10xf32>, vector<10x64xf32>, vector<8x64xf32> -> vector<8x64xf32>
    %c0_109 = arith.constant 0 : index
    %c0_110 = arith.constant 0 : index
    %221 = vector.load %arg17[%c0_109, %c0_110] : memref<1x64xf32, #tpu.memory_space<vmem>>, vector<1x64xf32>
    %222 = vector.broadcast %221 : vector<1x64xf32> to vector<8x64xf32>
    %223 = arith.addf %220, %222 : vector<8x64xf32>
    %c0_111 = arith.constant 0 : index
    %c0_112 = arith.constant 0 : index
    %c0_113 = arith.constant 0 : index
    %224 = vector.load %arg18[%c0_111, %c0_112, %c0_113] : memref<2x50x32xf32, #tpu.memory_space<vmem>>, vector<2x50x32xf32>
    %c0_114 = arith.constant 0 : index
    %c0_115 = arith.constant 0 : index
    %c0_116 = arith.constant 0 : index
    %225 = vector.load %arg19[%c0_114, %c0_115, %c0_116] : memref<2x64x32xf32, #tpu.memory_space<vmem>>, vector<2x64x32xf32>
    %c0_117 = arith.constant 0 : index
    %c0_118 = arith.constant 0 : index
    %c0_119 = arith.constant 0 : index
    %226 = vector.load %arg20[%c0_117, %c0_118, %c0_119] : memref<2x128x32xf32, #tpu.memory_space<vmem>>, vector<2x128x32xf32>
    %c0_120 = arith.constant 0 : index
    %c0_121 = arith.constant 0 : index
    %c0_122 = arith.constant 0 : index
    %227 = vector.load %arg21[%c0_120, %c0_121, %c0_122] : memref<2x1x32xf32, #tpu.memory_space<vmem>>, vector<2x1x32xf32>
    %228 = vector.extract_strided_slice %224 {offsets = [0, 0, 0], sizes = [1, 50, 32], strides = [1, 1, 1]} : vector<2x50x32xf32> to vector<1x50x32xf32>
    %229 = vector.shape_cast %228 : vector<1x50x32xf32> to vector<50x32xf32>
    %cst_123 = arith.constant dense<0.000000e+00> : vector<8x32xf32>
    %230 = tpu.matmul %117, %229, %cst_123 {dimension_numbers = #tpu.dot_dimension_numbers<[1], [0], [0], [1], [0, 0, 1, 1], [], []>} : vector<8x50xf32>, vector<50x32xf32>, vector<8x32xf32> -> vector<8x32xf32>
    %231 = vector.extract_strided_slice %225 {offsets = [0, 0, 0], sizes = [1, 64, 32], strides = [1, 1, 1]} : vector<2x64x32xf32> to vector<1x64x32xf32>
    %232 = vector.shape_cast %231 : vector<1x64x32xf32> to vector<64x32xf32>
    %cst_124 = arith.constant dense<0.000000e+00> : vector<8x32xf32>
    %233 = tpu.matmul %223, %232, %cst_124 {dimension_numbers = #tpu.dot_dimension_numbers<[1], [0], [0], [1], [0, 0, 1, 1], [], []>} : vector<8x64xf32>, vector<64x32xf32>, vector<8x32xf32> -> vector<8x32xf32>
    %234 = arith.addf %230, %233 : vector<8x32xf32>
    %235 = vector.extract_strided_slice %226 {offsets = [0, 0, 0], sizes = [1, 128, 32], strides = [1, 1, 1]} : vector<2x128x32xf32> to vector<1x128x32xf32>
    %236 = vector.shape_cast %235 : vector<1x128x32xf32> to vector<128x32xf32>
    %cst_125 = arith.constant dense<0.000000e+00> : vector<8x32xf32>
    %237 = tpu.matmul %217, %236, %cst_125 {dimension_numbers = #tpu.dot_dimension_numbers<[1], [0], [0], [1], [0, 0, 1, 1], [], []>} : vector<8x128xf32>, vector<128x32xf32>, vector<8x32xf32> -> vector<8x32xf32>
    %238 = arith.addf %234, %237 : vector<8x32xf32>
    %239 = vector.extract_strided_slice %227 {offsets = [0, 0, 0], sizes = [1, 1, 32], strides = [1, 1, 1]} : vector<2x1x32xf32> to vector<1x1x32xf32>
    %240 = vector.shape_cast %239 : vector<1x1x32xf32> to vector<1x32xf32>
    %241 = vector.broadcast %240 : vector<1x32xf32> to vector<8x32xf32>
    %242 = arith.addf %238, %241 : vector<8x32xf32>
    %243 = vector.extract_strided_slice %224 {offsets = [1, 0, 0], sizes = [1, 50, 32], strides = [1, 1, 1]} : vector<2x50x32xf32> to vector<1x50x32xf32>
    %244 = vector.shape_cast %243 : vector<1x50x32xf32> to vector<50x32xf32>
    %cst_126 = arith.constant dense<0.000000e+00> : vector<8x32xf32>
    %245 = tpu.matmul %117, %244, %cst_126 {dimension_numbers = #tpu.dot_dimension_numbers<[1], [0], [0], [1], [0, 0, 1, 1], [], []>} : vector<8x50xf32>, vector<50x32xf32>, vector<8x32xf32> -> vector<8x32xf32>
    %246 = vector.extract_strided_slice %225 {offsets = [1, 0, 0], sizes = [1, 64, 32], strides = [1, 1, 1]} : vector<2x64x32xf32> to vector<1x64x32xf32>
    %247 = vector.shape_cast %246 : vector<1x64x32xf32> to vector<64x32xf32>
    %cst_127 = arith.constant dense<0.000000e+00> : vector<8x32xf32>
    %248 = tpu.matmul %223, %247, %cst_127 {dimension_numbers = #tpu.dot_dimension_numbers<[1], [0], [0], [1], [0, 0, 1, 1], [], []>} : vector<8x64xf32>, vector<64x32xf32>, vector<8x32xf32> -> vector<8x32xf32>
    %249 = arith.addf %245, %248 : vector<8x32xf32>
    %250 = vector.extract_strided_slice %226 {offsets = [1, 0, 0], sizes = [1, 128, 32], strides = [1, 1, 1]} : vector<2x128x32xf32> to vector<1x128x32xf32>
    %251 = vector.shape_cast %250 : vector<1x128x32xf32> to vector<128x32xf32>
    %cst_128 = arith.constant dense<0.000000e+00> : vector<8x32xf32>
    %252 = tpu.matmul %217, %251, %cst_128 {dimension_numbers = #tpu.dot_dimension_numbers<[1], [0], [0], [1], [0, 0, 1, 1], [], []>} : vector<8x128xf32>, vector<128x32xf32>, vector<8x32xf32> -> vector<8x32xf32>
    %253 = arith.addf %249, %252 : vector<8x32xf32>
    %254 = vector.extract_strided_slice %227 {offsets = [1, 0, 0], sizes = [1, 1, 32], strides = [1, 1, 1]} : vector<2x1x32xf32> to vector<1x1x32xf32>
    %255 = vector.shape_cast %254 : vector<1x1x32xf32> to vector<1x32xf32>
    %256 = vector.broadcast %255 : vector<1x32xf32> to vector<8x32xf32>
    %257 = arith.addf %253, %256 : vector<8x32xf32>
    %258 = arith.negf %257 : vector<8x32xf32>
    %259 = math.exp %258 : vector<8x32xf32>
    %cst_129 = arith.constant 1.000000e+00 : f32
    %260 = vector.broadcast %cst_129 : f32 to vector<8x32xf32>
    %261 = arith.addf %260, %259 : vector<8x32xf32>
    %262 = arith.divf %260, %261 : vector<8x32xf32>
    %263 = arith.mulf %242, %262 : vector<8x32xf32>
    %c0_130 = arith.constant 0 : index
    %c0_131 = arith.constant 0 : index
    %264 = vector.load %arg22[%c0_130, %c0_131] : memref<8x32xf32, #tpu.memory_space<vmem>>, vector<8x32xf32>
    tpu.vector_store %arg22[%c0_130, %c0_131], %263 {strides = array<i32>} : memref<8x32xf32, #tpu.memory_space<vmem>>, vector<8x32xf32>,
    return
  }
  func.func @transform_0(%arg0: i32) -> (i32, i32, i32) {
    %c0_i32 = arith.constant 0 : i32
    %c0_i32_0 = arith.constant 0 : i32
    %c0_i32_1 = arith.constant 0 : i32
    return %arg0, %c0_i32, %c0_i32_0 : i32, i32, i32
  }
  func.func @transform_1(%arg0: i32) -> (i32, i32) {
    %c0_i32 = arith.constant 0 : i32
    %c0_i32_0 = arith.constant 0 : i32
    return %arg0, %c0_i32 : i32, i32
  }
  func.func @transform_2(%arg0: i32) -> (i32, i32, i32) {
    %c0_i32 = arith.constant 0 : i32
    %c0_i32_0 = arith.constant 0 : i32
    %c0_i32_1 = arith.constant 0 : i32
    return %arg0, %c0_i32, %c0_i32_0 : i32, i32, i32
  }
  func.func @transform_3(%arg0: i32) -> (i32, i32, i32) {
    %c0_i32 = arith.constant 0 : i32
    %c0_i32_0 = arith.constant 0 : i32
    %c0_i32_1 = arith.constant 0 : i32
    %c0_i32_2 = arith.constant 0 : i32
    return %c0_i32, %c0_i32_0, %c0_i32_1 : i32, i32, i32
  }
  func.func @transform_4(%arg0: i32) -> (i32, i32) {
    %c0_i32 = arith.constant 0 : i32
    %c0_i32_0 = arith.constant 0 : i32
    %c0_i32_1 = arith.constant 0 : i32
    return %c0_i32, %c0_i32_0 : i32, i32
  }
  func.func @transform_5(%arg0: i32) -> (i32, i32) {
    %c0_i32 = arith.constant 0 : i32
    %c0_i32_0 = arith.constant 0 : i32
    %c0_i32_1 = arith.constant 0 : i32
    return %c0_i32, %c0_i32_0 : i32, i32
  }
  func.func @transform_6(%arg0: i32) -> (i32, i32, i32) {
    %c0_i32 = arith.constant 0 : i32
    %c0_i32_0 = arith.constant 0 : i32
    %c0_i32_1 = arith.constant 0 : i32
    %c0_i32_2 = arith.constant 0 : i32
    return %c0_i32, %c0_i32_0, %c0_i32_1 : i32, i32, i32
  }
  func.func @transform_7(%arg0: i32) -> (i32, i32) {
    %c0_i32 = arith.constant 0 : i32
    %c0_i32_0 = arith.constant 0 : i32
    %c0_i32_1 = arith.constant 0 : i32
    return %c0_i32, %c0_i32_0 : i32, i32
  }
  func.func @transform_8(%arg0: i32) -> (i32, i32) {
    %c0_i32 = arith.constant 0 : i32
    %c0_i32_0 = arith.constant 0 : i32
    %c0_i32_1 = arith.constant 0 : i32
    return %c0_i32, %c0_i32_0 : i32, i32
  }
  func.func @transform_9(%arg0: i32) -> (i32, i32, i32) {
    %c0_i32 = arith.constant 0 : i32
    %c0_i32_0 = arith.constant 0 : i32
    %c0_i32_1 = arith.constant 0 : i32
    %c0_i32_2 = arith.constant 0 : i32
    return %c0_i32, %c0_i32_0, %c0_i32_1 : i32, i32, i32
  }
  func.func @transform_10(%arg0: i32) -> (i32, i32) {
    %c0_i32 = arith.constant 0 : i32
    %c0_i32_0 = arith.constant 0 : i32
    %c0_i32_1 = arith.constant 0 : i32
    return %c0_i32, %c0_i32_0 : i32, i32
  }
  func.func @transform_11(%arg0: i32) -> (i32, i32) {
    %c0_i32 = arith.constant 0 : i32
    %c0_i32_0 = arith.constant 0 : i32
    %c0_i32_1 = arith.constant 0 : i32
    return %c0_i32, %c0_i32_0 : i32, i32
  }
  func.func @transform_12(%arg0: i32) -> (i32, i32, i32) {
    %c0_i32 = arith.constant 0 : i32
    %c0_i32_0 = arith.constant 0 : i32
    %c0_i32_1 = arith.constant 0 : i32
    %c0_i32_2 = arith.constant 0 : i32
    return %c0_i32, %c0_i32_0, %c0_i32_1 : i32, i32, i32
  }
  func.func @transform_13(%arg0: i32) -> (i32, i32) {
    %c0_i32 = arith.constant 0 : i32
    %c0_i32_0 = arith.constant 0 : i32
    %c0_i32_1 = arith.constant 0 : i32
    return %c0_i32, %c0_i32_0 : i32, i32
  }
  func.func @transform_14(%arg0: i32) -> (i32, i32) {
    %c0_i32 = arith.constant 0 : i32
    %c0_i32_0 = arith.constant 0 : i32
    %c0_i32_1 = arith.constant 0 : i32
    return %c0_i32, %c0_i32_0 : i32, i32
  }
  func.func @transform_15(%arg0: i32) -> (i32, i32) {
    %c0_i32 = arith.constant 0 : i32
    %c0_i32_0 = arith.constant 0 : i32
    %c0_i32_1 = arith.constant 0 : i32
    return %c0_i32, %c0_i32_0 : i32, i32
  }
  func.func @transform_16(%arg0: i32) -> (i32, i32) {
    %c0_i32 = arith.constant 0 : i32
    %c0_i32_0 = arith.constant 0 : i32
    %c0_i32_1 = arith.constant 0 : i32
    return %c0_i32, %c0_i32_0 : i32, i32
  }
  func.func @transform_17(%arg0: i32) -> (i32, i32, i32) {
    %c0_i32 = arith.constant 0 : i32
    %c0_i32_0 = arith.constant 0 : i32
    %c0_i32_1 = arith.constant 0 : i32
    %c0_i32_2 = arith.constant 0 : i32
    return %c0_i32, %c0_i32_0, %c0_i32_1 : i32, i32, i32
  }
  func.func @transform_18(%arg0: i32) -> (i32, i32, i32) {
    %c0_i32 = arith.constant 0 : i32
    %c0_i32_0 = arith.constant 0 : i32
    %c0_i32_1 = arith.constant 0 : i32
    %c0_i32_2 = arith.constant 0 : i32
    return %c0_i32, %c0_i32_0, %c0_i32_1 : i32, i32, i32
  }
  func.func @transform_19(%arg0: i32) -> (i32, i32, i32) {
    %c0_i32 = arith.constant 0 : i32
    %c0_i32_0 = arith.constant 0 : i32
    %c0_i32_1 = arith.constant 0 : i32
    %c0_i32_2 = arith.constant 0 : i32
    return %c0_i32, %c0_i32_0, %c0_i32_1 : i32, i32, i32
  }
  func.func @transform_20(%arg0: i32) -> (i32, i32, i32) {
    %c0_i32 = arith.constant 0 : i32
    %c0_i32_0 = arith.constant 0 : i32
    %c0_i32_1 = arith.constant 0 : i32
    %c0_i32_2 = arith.constant 0 : i32
    return %c0_i32, %c0_i32_0, %c0_i32_1 : i32, i32, i32
  }
  func.func @transform_21(%arg0: i32) -> (i32, i32) {
    %c0_i32 = arith.constant 0 : i32
    %c0_i32_0 = arith.constant 0 : i32
    return %arg0, %c0_i32 : i32, i32
  }
}

</mosaic_0001>

<bundles_post_ra>
// kernel: multi_source_encoder.2
= control target key start
LH: loop header
LB: loop body
LE: loop exit
PB: predicated region body
PF: predicated region fallthrough
CT: control target
= control target key end

     0   :  { %v3217_v0 = vmov 0   ;;  %vm530_vm0 = vcmask 1043456   ;;  %v3218_v40 = vmov 0.0   ;;  %vm3219_vm1 = vmmov 0   ;;  %s4543_s0 = inlined_call_operand.vmem [shape: f32[8,8,1], index: 0, kind: input, shape index: {}]   ;;  %s4544_s6 = inlined_call_operand.vmem [shape: f32[3,20,50], index: 6, kind: input, shape index: {}]   ;;  %s4545_s3 = inlined_call_operand.vmem [shape: f32[3,1,20], index: 3, kind: input, shape index: {}]   ;;  %s4546_s4 = inlined_call_operand.vmem [shape: f32[1,20], index: 4, kind: input, shape index: {}]   ;;  %s4547_s5 = inlined_call_operand.vmem [shape: f32[1,20], index: 5, kind: input, shape index: {}]   ;;  %s4548_s2 = inlined_call_operand.vmem [shape: f32[8,8,6], index: 2, kind: input, shape index: {}]   ;;  %s4549_s9 = inlined_call_operand.vmem [shape: f32[3,6,64], index: 9, kind: input, shape index: {}]   ;;  %s4550_s12 = inlined_call_operand.vmem [shape: f32[3,64,128], index: 12, kind: input, shape index: {}]   ;;  %s4551_s15 = inlined_call_operand.vmem [shape: f32[10,64], index: 15, kind: input, shape index: {}]   ;;  %s4552_s1 = inlined_call_operand.vmem [shape: f32[8,10], index: 1, kind: input, shape index: {}]   ;;  %s4553_s10 = inlined_call_operand.vmem [shape: f32[1,64], index: 10, kind: input, shape index: {}]   ;;  %s4554_s11 = inlined_call_operand.vmem [shape: f32[1,64], index: 11, kind: input, shape index: {}]   ;;  %s4555_s18 = inlined_call_operand.vmem [shape: f32[2,64,32], index: 18, kind: input, shape index: {}]   ;;  %s4556_s16 = inlined_call_operand.vmem [shape: f32[1,64], index: 16, kind: input, shape index: {}]   ;;  %s4557_s19 = inlined_call_operand.vmem [shape: f32[2,128,32], index: 19, kind: input, shape index: {}]   ;;  %s4558_s17 = inlined_call_operand.vmem [shape: f32[2,50,32], index: 17, kind: input, shape index: {}]   ;;  %s4559_s7 = inlined_call_operand.vmem [shape: f32[1,50], index: 7, kind: input, shape index: {}]   ;;  %s4560_s8 = inlined_call_operand.vmem [shape: f32[1,50], index: 8, kind: input, shape index: {}]   ;;  %s4561_s13 = inlined_call_operand.vmem [shape: f32[1,128], index: 13, kind: input, shape index: {}]   ;;  %s4562_s14 = inlined_call_operand.vmem [shape: f32[1,128], index: 14, kind: input, shape index: {}]   ;;  %s4563_s20 = inlined_call_operand.vmem [shape: f32[2,1,32], index: 20, kind: input, shape index: {}]   ;;  %s4564_s21 = inlined_call_operand.vmem [shape: f32[8,32], index: 21, kind: output, shape index: {}]  }
   0x1   :  { %4569 = sst [smem:[#allocation2_spill]] %s4543_s0  ;;  %3212 = vset.pattern.permute.xlu1 %v3217_v0  ;;  %3211 = vset.pattern.permute.xlu0 %v3217_v0  ;;  %vm507_vm2 = vcmask 1041409   ;;  %vm510_vm3 = vcmask 1042434   ;;  %vm513_vm4 = vcmask 1043459   ;;  %vm516_vm5 = vcmask 1044484  }
   0x2   :  { %4570 = sst [smem:[#allocation3_spill]] %s4544_s6  ;;  %2930 = vmatprep.subr.mxu0 %v3218_v40  ;;  %2939 = vmatprep.subr.mxu1 %v3218_v40  ;;  %vm519_vm6 = vcmask 1045509   ;;  %vm522_vm7 = vcmask 1046534   ;;  %vm525_vm8 = vcmask 1047559   ;;  %vm527_vm9 = vcmask 162816  }
   0x3   :  { %4571 = sst [smem:[#allocation4_spill]] %s4545_s3  ;;  %2936 = vmatprep.mubr.msk.f32.mxu0 %vm3219_vm1, %v3218_v40  ;;  %2945 = vmatprep.mubr.msk.f32.mxu1 %vm3219_vm1, %v3218_v40  ;;  %vm1054_vm10 = vcmask 1045504   ;;  %vm1051_vm11 = vcmask 48128   ;;  %vm2152_vm12 = vcmask 1041408   ;;  %vm2148_vm13 = vcmask 80896  }
   0x4   :  { %4572 = sst [smem:[#allocation5_spill]] %s4546_s4  ;;  %vm1624_vm14 = vcmask 523264   ;;  %vm2363_vm15 = vcmask 408576  }
   0x5   :  { %4573 = sst [smem:[#allocation6_spill]] %s4547_s5 }
   0x6   :  { %4574 = sst [smem:[#allocation7_spill]] %s4548_s2 }
   0x7   :  { %s4575_s26 = sld [smem:[#allocation2_spill]] }
   0x8   :  { %s4576_s28 = sld [smem:[#allocation3_spill]] }
   0x9   :  { %s4577_s4 = sld [smem:[#allocation4_spill]] }
   0xa   :  { %s4578_s23 = sld [smem:[#allocation5_spill]] }
   0xb   :  { %s4579_s3 = sld [smem:[#allocation6_spill]] }
   0xc   :  { %s4580_s27 = sld [smem:[#allocation7_spill]] }
   0xd   :  { %v226_v1 = vld [vmem:[%s4575_s26 + $0x13] sm:$0x1]  ;;  %v225_v2 = vld [vmem:[%s4575_s26 + $0xb] sm:$0x1]  ;;  %v348_v3 = vld [vmem:[%s4575_s26 + $0x14] sm:$0x1] }
   0xe   :  { %244 = vperm.xlu1 %3212, %v226_v1   ;;  %239 = vperm.xlu0 %3211, %v225_v2   ;;  %v347_v4 = vld [vmem:[%s4575_s26 + $0xc] sm:$0x1]  ;;  %v227_v5 = vld [vmem:[%s4575_s26 + $0x1b] sm:$0x1]  ;;  %v224_v6 = vld [vmem:[%s4575_s26 + $0x3] sm:$0x1] }
   0xf   :  { %v349_v7 = vld [vmem:[%s4575_s26 + $0x1c] sm:$0x1]  ;;  %v346_v8 = vld [vmem:[%s4575_s26 + $0x4] sm:$0x1]  ;;  %v228_v9 = vld [vmem:[%s4575_s26 + $0x23] sm:$0x1] }
  0x10   :  { %v411_v10 = vld [vmem:[%s4575_s26 + $0xd] sm:$0x1]  ;;  %v412_v11 = vld [vmem:[%s4575_s26 + $0x15] sm:$0x1]  ;;  %v350_v12 = vld [vmem:[%s4575_s26 + $0x24] sm:$0x1] }
  0x11   :  { %v351_v13 = vld [vmem:[%s4575_s26 + $0x2c] sm:$0x1]  ;;  %v229_v14 = vld [vmem:[%s4575_s26 + $0x2b] sm:$0x1]  ;;  %v413_v15 = vld [vmem:[%s4575_s26 + $0x1d] sm:$0x1] }
  0x12   :  { %366 = vperm.xlu1 %3212, %v348_v3   ;;  %361 = vperm.xlu0 %3211, %v347_v4   ;;  %v410_v16 = vld [vmem:[%s4575_s26 + $0x5] sm:$0x1]  ;;  %v352_v17 = vld [vmem:[%s4575_s26 + $0x34] sm:$0x1]  ;;  %v230_v18 = vld [vmem:[%s4575_s26 + $0x33] sm:$0x1] }
  0x13   :  { %v718_v19 = vld [vmem:[%s4575_s26 + $0xe] sm:$0x1]  ;;  %v414_v20 = vld [vmem:[%s4575_s26 + $0x25] sm:$0x1]  ;;  %v353_v21 = vld [vmem:[%s4575_s26 + $0x3c] sm:$0x1] }
  0x14   :  { %v231_v22 = vld [vmem:[%s4575_s26 + $0x3b] sm:$0x1]  ;;  %v719_v23 = vld [vmem:[%s4575_s26 + $0x16] sm:$0x1]  ;;  %v415_v24 = vld [vmem:[%s4575_s26 + $0x2d] sm:$0x1] }
  0x15   :  { %v155_v25 = vld [vmem:[%s4575_s26 + $0xa] sm:$0x1]  ;;  %v85_v26 = vld [vmem:[%s4575_s26 + $0x9] sm:$0x1]  ;;  %v717_v27 = vld [vmem:[%s4575_s26 + $0x6] sm:$0x1] }
  0x16   :  { %249 = vperm.xlu1 %3212, %v227_v5   ;;  %234 = vperm.xlu0 %3211, %v224_v6   ;;  %v416_v28 = vld [vmem:[%s4575_s26 + $0x35] sm:$0x1]  ;;  %v782_v29 = vld [vmem:[%s4575_s26 + $0xf] sm:$0x1]  ;;  %v720_v30 = vld [vmem:[%s4575_s26 + $0x1e] sm:$0x1] }
  0x17   :  { %v156_v31 = vld [vmem:[%s4575_s26 + $0x12] sm:$0x1]  ;;  %v86_v32 = vld [vmem:[%s4575_s26 + $0x11] sm:$0x1]  ;;  %v721_v33 = vld [vmem:[%s4575_s26 + $0x26] sm:$0x1] }
  0x18   :  { %v417_v34 = vld [vmem:[%s4575_s26 + $0x3d] sm:$0x1]  ;;  %v783_v35 = vld [vmem:[%s4575_s26 + $0x17] sm:$0x1]  ;;  %v84_v36 = vld [vmem:[%s4575_s26 + $0x1] sm:$0x1] }
  0x19   :  { %v78_v37 = vld [vmem:[%s4576_s28 + $0x28] sm:$0xf]  ;;  %v87_v38 = vld [vmem:[%s4575_s26 + $0x19] sm:$0x1]  ;;  %v154_v39 = vld [vmem:[%s4575_s26 + $0x2] sm:$0x1] }
  0x1a   :  { %371 = vperm.xlu1 %3212, %v349_v7   ;;  %356 = vperm.xlu0 %3211, %v346_v8   ;;  %v77_v41 = vld [vmem:[%s4576_s28 + $0x20] sm:$0xff]  ;;  %v76_v42 = vld [vmem:[%s4576_s28 + $0x18] sm:$0xff]  ;;  %v722_v44 = vld [vmem:[%s4575_s26 + $0x2e] sm:$0x1] }
  0x1b   :  { %2931 = vmatpush3.msk.msra.mxu0 %vm530_vm0, %v78_v37  ;;  %v157_v43 = vld [vmem:[%s4575_s26 + $0x1a] sm:$0x1]  ;;  %v781_v45 = vld [vmem:[%s4575_s26 + $0x7] sm:$0x1]  ;;  %v784_v46 = vld [vmem:[%s4575_s26 + $0x1f] sm:$0x1] }
  0x1c   :  { %2932 = vmatprep.subr.mxu0 %v3218_v40  ;;  %v88_v47 = vld [vmem:[%s4575_s26 + $0x21] sm:$0x1]  ;;  %v158_v48 = vld [vmem:[%s4575_s26 + $0x22] sm:$0x1]  ;;  %v723_v49 = vld [vmem:[%s4575_s26 + $0x36] sm:$0x1] }
  0x1d   :  { %2933 = vmatpush3.msra.mxu0 %v77_v41  ;;  %v785_v50 = vld [vmem:[%s4575_s26 + $0x27] sm:$0x1]  ;;  %v89_v51 = vld [vmem:[%s4575_s26 + $0x29] sm:$0x1]  ;;  %v159_v52 = vld [vmem:[%s4575_s26 + $0x2a] sm:$0x1] }
  0x1e   :  { %254 = vperm.xlu1 %3212, %v228_v9   ;;  %425 = vperm.xlu0 %3211, %v411_v10   ;;  %v724_v53 = vld [vmem:[%s4575_s26 + $0x3e] sm:$0x1]  ;;  %v786_v54 = vld [vmem:[%s4575_s26 + $0x2f] sm:$0x1]  ;;  %v90_v55 = vld [vmem:[%s4575_s26 + $0x31] sm:$0x1] }
  0x1f   :  { %2934 = vmatprep.subr.mxu0 %v3218_v40  ;;  %v160_v56 = vld [vmem:[%s4575_s26 + $0x32] sm:$0x1]  ;;  %v787_v57 = vld [vmem:[%s4575_s26 + $0x37] sm:$0x1]  ;;  %v91_v58 = vld [vmem:[%s4575_s26 + $0x39] sm:$0x1] }
  0x20   :  { %2935 = vmatpush3.msra.mxu0 %v76_v42  ;;  %v161_v59 = vld [vmem:[%s4575_s26 + $0x3a] sm:$0x1]  ;;  %v788_v60 = vld [vmem:[%s4575_s26 + $0x3f] sm:$0x1]  ;;  %v75_v61 = vld [vmem:[%s4576_s28 + $0x10] sm:$0xf] }
  0x21   :  { %2948 = vmatprep.subr.mxu0 %v3218_v40  ;;  %v74_v62 = vld [vmem:[%s4576_s28 + $0x8] sm:$0xff]  ;;  %2940 = vmatpush3.msk.msra.mxu1 %vm530_vm0, %v75_v61  ;;  %v73_v63 = vld [vmem:[%s4576_s28] sm:$0xff] }
  0x22   :  { %430 = vperm.xlu1 %3212, %v412_v11   ;;  %376 = vperm.xlu0 %3211, %v350_v12  }
  0x23   :  { %2941 = vmatprep.subr.mxu1 %v3218_v40 }
  0x24   :  { %2942 = vmatpush3.msra.mxu1 %v74_v62 }
  0x25   :  { %2943 = vmatprep.subr.mxu1 %v3218_v40 }
  0x26   :  { %381 = vperm.xlu1 %3212, %v351_v13   ;;  %259 = vperm.xlu0 %3211, %v229_v14  }
  0x27   :  { %2944 = vmatpush3.msra.mxu1 %v73_v63 }
  0x28   :  { %2962 = vmatprep.subr.mxu1 %v3218_v40 }
  0x2a   :  { %435 = vperm.xlu1 %3212, %v413_v15   ;;  %420 = vperm.xlu0 %3211, %v410_v16  }
  0x2e   :  { %386 = vperm.xlu1 %3212, %v352_v17   ;;  %264 = vperm.xlu0 %3211, %v230_v18   ;;  %v3553_v18 = vld [vmem:[%s4577_s4] ss:$0 sm:$0xff] }
  0x32   :  { %732 = vperm.xlu1 %3212, %v718_v19   ;;  %440 = vperm.xlu0 %3211, %v414_v20   ;;  %v3558_v19 = vld [vmem:[%s4577_s4 + $0x1] ss:$0 sm:$0xff] }
  0x36   :  { %391 = vperm.xlu1 %3212, %v353_v21   ;;  %269 = vperm.xlu0 %3211, %v231_v22  }
  0x3a   :  { %737 = vperm.xlu1 %3212, %v719_v23   ;;  %445 = vperm.xlu0 %3211, %v415_v24  }
  0x3e   :  { %169 = vperm.xlu1 %3212, %v155_v25   ;;  %99 = vperm.xlu0 %3211, %v85_v26  }
  0x42   :  { %727 = vperm.xlu1 %3212, %v717_v27   ;;  %450 = vperm.xlu0 %3211, %v416_v28   ;;  %v3574_v28 = vld [vmem:[%s4577_s4 + $0x2] ss:$0 sm:$0xff] }
  0x46   :  { %796 = vperm.xlu1 %3212, %v782_v29   ;;  %742 = vperm.xlu0 %3211, %v720_v30  }
  0x4a   :  { %174 = vperm.xlu1 %3212, %v156_v31   ;;  %104 = vperm.xlu0 %3211, %v86_v32  }
  0x4e   :  { %747 = vperm.xlu1 %3212, %v721_v33   ;;  %455 = vperm.xlu0 %3211, %v417_v34  }
  0x52   :  { %801 = vperm.xlu0 %3211, %v783_v35   ;;  %94 = vperm.xlu1 %3212, %v84_v36  }
  0x56   :  { %109 = vperm.xlu0 %3211, %v87_v38   ;;  %164 = vperm.xlu1 %3212, %v154_v39  }
  0x5a   :  { %179 = vperm.xlu0 %3211, %v157_v43   ;;  %752 = vperm.xlu1 %3212, %v722_v44  }
  0x5e   :  { %791 = vperm.xlu0 %3211, %v781_v45   ;;  %806 = vperm.xlu1 %3212, %v784_v46  }
  0x62   :  { %114 = vperm.xlu0 %3211, %v88_v47   ;;  %184 = vperm.xlu1 %3212, %v158_v48   ;;  %v3599_v48 = vld [vmem:[%s4578_s23] ss:$0 sm:$0xff] }
  0x66   :  { %757 = vperm.xlu0 %3211, %v723_v49   ;;  %811 = vperm.xlu1 %3212, %v785_v50  }
  0x6a   :  { %119 = vperm.xlu0 %3211, %v89_v51   ;;  %189 = vperm.xlu1 %3212, %v159_v52  }
  0x6e   :  { %762 = vperm.xlu0 %3211, %v724_v53   ;;  %816 = vperm.xlu1 %3212, %v786_v54  }
  0x72   :  { %124 = vperm.xlu0 %3211, %v90_v55   ;;  %194 = vperm.xlu1 %3212, %v160_v56  }
  0x76   :  { %821 = vperm.xlu0 %3211, %v787_v57   ;;  %129 = vperm.xlu1 %3212, %v91_v58  }
  0x7a   :  { %199 = vperm.xlu0 %3211, %v161_v59   ;;  %826 = vperm.xlu1 %3212, %v788_v60  }
  0x89   :  { %v3530_v0 = vpop.permute.xlu1 %244  ;;  %v3532_v1 = vpop.permute.xlu0 %239 }
  0x8a   :  { %v331_v29 = vmul.f32 %v3553_v18, %v3532_v1  ;;  %v332_v36 = vmul.f32 %v3553_v18, %v3530_v0 }
  0x8d   :  { %v367_v2 = vpop.permute.xlu1 %366  ;;  %v362_v3 = vpop.permute.xlu0 %361 }
  0x8e   :  { %v395_v27 = vmul.f32 %v3558_v19, %v362_v3  ;;  %v396_v33 = vmul.f32 %v3558_v19, %v367_v2  ;;  %v3624_v2 = vld [vmem:[%s4579_s3] ss:$0 sm:$0xff] }
  0x90   :  { %v403_v35 = vadd.f32 %v395_v27, %v331_v29  ;;  %v404_v45 = vadd.f32 %v396_v33, %v332_v36 }
  0x91   :  { %v3534_v4 = vpop.permute.xlu1 %249  ;;  %v3536_v5 = vpop.permute.xlu0 %234 }
  0x92   :  { %v330_v37 = vmul.f32 %v3553_v18, %v3536_v5  ;;  %v333_v46 = vmul.f32 %v3553_v18, %v3534_v4 }
  0x95   :  { %v372_v6 = vpop.permute.xlu1 %371  ;;  %v357_v7 = vpop.permute.xlu0 %356 }
  0x96   :  { %v394_v34 = vmul.f32 %v3558_v19, %v357_v7  ;;  %v397_v39 = vmul.f32 %v3558_v19, %v372_v6 }
  0x98   :  { %v402_v47 = vadd.f32 %v394_v34, %v330_v37  ;;  %v405_v58 = vadd.f32 %v397_v39, %v333_v46 }
  0x99   :  { %v3538_v8 = vpop.permute.xlu1 %254  ;;  %v426_v9 = vpop.permute.xlu0 %425 }
  0x9a   :  { %v702_v22 = vmul.f32 %v3553_v18, %v426_v9  ;;  %v459_v30 = vmul.f32 %v3574_v28, %v426_v9  ;;  %v334_v50 = vmul.f32 %v3553_v18, %v3538_v8 }
  0x9c   :  { %v467_v41 = vadd.f32 %v459_v30, %v403_v35 }
  0x9d   :  { %v3540_v10 = vpop.permute.xlu1 %430  ;;  %v377_v11 = vpop.permute.xlu0 %376 }
  0x9e   :  { %v460_v42 = vmul.f32 %v3574_v28, %v3540_v10  ;;  %v398_v49 = vmul.f32 %v3558_v19, %v377_v11  ;;  %v475_v59 = vmul.f32 %v3599_v48, %v467_v41 }
  0xa0   :  { %v468_v60 = vadd.f32 %v460_v42, %v404_v45  ;;  %v406_v3 = vadd.f32 %v398_v49, %v334_v50 }
  0xa1   :  { %v382_v12 = vpop.permute.xlu1 %381  ;;  %v3542_v13 = vpop.permute.xlu0 %259 }
  0xa2   :  { %v399_v51 = vmul.f32 %v3558_v19, %v382_v12  ;;  %v335_v52 = vmul.f32 %v3553_v18, %v3542_v13 }
  0xa4   :  { %v407_v7 = vadd.f32 %v399_v51, %v335_v52 }
  0xa5   :  { %v3544_v14 = vpop.permute.xlu1 %435  ;;  %v3546_v15 = vpop.permute.xlu0 %420 }
  0xa6   :  { %v458_v38 = vmul.f32 %v3574_v28, %v3546_v15  ;;  %v461_v53 = vmul.f32 %v3574_v28, %v3544_v14 }
  0xa8   :  { %v466_v54 = vadd.f32 %v458_v38, %v402_v47  ;;  %v469_v9 = vadd.f32 %v461_v53, %v405_v58 }
  0xa9   :  { %v387_v16 = vpop.permute.xlu1 %386  ;;  %v3548_v17 = vpop.permute.xlu0 %264 }
  0xaa   :  { %v400_v55 = vmul.f32 %v3558_v19, %v387_v16  ;;  %v336_v56 = vmul.f32 %v3553_v18, %v3548_v17  ;;  %v474_v11 = vmul.f32 %v3599_v48, %v466_v54  ;;  %v477_v33 = vmul.f32 %v3599_v48, %v469_v9  ;;  %v3664_v9 = vld [vmem:[%s4580_s27 + $0xa] sm:$0x1] }
  0xac   :  { %v408_v12 = vadd.f32 %v400_v55, %v336_v56  ;;  %v482_v36 = vadd.f32 %v3624_v2, %v474_v11  ;;  %v485_v49 = vadd.f32 %v3624_v2, %v477_v33 }
  0xad   :  { %v733_v20 = vpop.permute.xlu1 %732  ;;  %v3560_v21 = vpop.permute.xlu0 %440 }
  0xae   :  { %v766_v23 = vmul.f32 %v3558_v19, %v733_v20  ;;  %v462_v57 = vmul.f32 %v3574_v28, %v3560_v21  ;;  %v483_v20 = vadd.f32 %v3624_v2, %v475_v59  ;;  %v490_v52 = vmax.f32 %v482_v36, 0.0 }
  0xb0   :  { %v3564_v24 = vadd.f32 %v766_v23, %v702_v22  ;;  %v470_v16 = vadd.f32 %v462_v57, %v406_v3  ;;  %v476_v22 = vmul.f32 %v3599_v48, %v468_v60  ;;  %v491_v38 = vmax.f32 %v483_v20, 0.0 }
  0xb1   :  { %v3566_v25 = vpop.permute.xlu1 %391  ;;  %v3568_v26 = vpop.permute.xlu0 %269 }
  0xb2   :  { %v478_v37 = vmul.f32 %v3599_v48, %v470_v16  ;;  %v484_v39 = vadd.f32 %v3624_v2, %v476_v22  ;;  %v401_v46 = vmul.f32 %v3558_v19, %v3566_v25  ;;  %v337_v47 = vmul.f32 %v3553_v18, %v3568_v26 }
  0xb3   :  { %v279_v25 = vmul.f32 %v3574_v28, %v3532_v1  ;;  %v506_v54 = vrot.slane %v491_v38, 7  ;;  %v280_v1 = vmul.f32 %v3574_v28, %v3530_v0  ;;  %v703_v38 = vmul.f32 %v3553_v18, %v3540_v10 }
  0xb4   :  { %v486_v53 = vadd.f32 %v3624_v2, %v478_v37  ;;  %v492_v59 = vmax.f32 %v484_v39, 0.0  ;;  %v409_v60 = vadd.f32 %v401_v46, %v337_v47  ;;  %v1037_v37 = vrot.slane %v3664_v9, 7 }
  0xb5   :  { %v3579_v31 = vpop.permute.xlu1 %737  ;;  %v3581_v32 = vpop.permute.xlu0 %445  ;;  %v508_v11 = vsel %vm507_vm2, %v506_v54, %v490_v52 }
  0xb6   :  { %v463_v61 = vmul.f32 %v3574_v28, %v3581_v32  ;;  %v767_v20 = vmul.f32 %v3558_v19, %v3579_v31 }
  0xb8   :  { %v471_v23 = vadd.f32 %v463_v61, %v407_v7  ;;  %v775_v47 = vadd.f32 %v767_v20, %v703_v38  ;;  %v1023_v38 = vld [vmem:[%s4580_s27 + $0x12] sm:$0x1] }
  0xb9   :  { %v170_v43 = vpop.permute.xlu1 %169  ;;  %v100_v44 = vpop.permute.xlu0 %99 }
  0xba   :  { %v209_v34 = vmul.f32 %v3558_v19, %v170_v43  ;;  %v139_v35 = vmul.f32 %v3553_v18, %v100_v44  ;;  %v479_v41 = vmul.f32 %v3599_v48, %v471_v23 }
  0xbc   :  { %v217_v50 = vadd.f32 %v209_v34, %v139_v35  ;;  %v487_v55 = vadd.f32 %v3624_v2, %v479_v41  ;;  %v509_v34 = vrot.slane %v492_v59, 6 }
  0xbd   :  { %v3617_v62 = vpop.permute.xlu1 %727  ;;  %v3619_v63 = vpop.permute.xlu0 %450 }
  0xbe   :  { %v464_v6 = vmul.f32 %v3574_v28, %v3619_v63  ;;  %v287_v7 = vadd.f32 %v279_v25, %v217_v50  ;;  %v495_v22 = vmax.f32 %v487_v55, 0.0  ;;  %v511_v46 = vsel %vm510_vm3, %v509_v34, %v508_v11 }
  0xc0   :  { %v472_v30 = vadd.f32 %v464_v6, %v408_v12  ;;  %v493_v6 = vmax.f32 %v485_v49, 0.0  ;;  %v494_v12 = vmax.f32 %v486_v53, 0.0  ;;  %v301_v41 = vmul.f32 %v3599_v48, %v287_v7 }
  0xc1   :  { %v797_v27 = vpop.permute.xlu1 %796  ;;  %v3631_v29 = vpop.permute.xlu0 %742 }
  0xc2   :  { %v480_v43 = vmul.f32 %v3599_v48, %v472_v30  ;;  %v830_v23 = vmul.f32 %v3574_v28, %v797_v27  ;;  %v512_v39 = vrot.slane %v493_v6, 5  ;;  %v278_v27 = vmul.f32 %v3574_v28, %v3536_v5 }
  0xc3   :  { %v704_v5 = vmul.f32 %v3553_v18, %v3544_v14  ;;  %v315_v54 = vadd.f32 %v3624_v2, %v301_v41 }
  0xc4   :  { %v488_v61 = vadd.f32 %v3624_v2, %v480_v43  ;;  %v518_v43 = vrot.slane %v495_v22, 3  ;;  %v81_v22 = vld [vmem:[%s4576_s28 + $0x40] sm:$0xf] }
  0xc5   :  { %v175_v42 = vpop.permute.xlu1 %174  ;;  %v105_v45 = vpop.permute.xlu0 %104 }
  0xc6   :  { %v210_v44 = vmul.f32 %v3558_v19, %v175_v42  ;;  %v140_v51 = vmul.f32 %v3553_v18, %v105_v45  ;;  %v496_v35 = vmax.f32 %v488_v61, 0.0  ;;  %v515_v42 = vrot.slane %v494_v12, 4 }
  0xc8   :  { %v218_v56 = vadd.f32 %v210_v44, %v140_v51  ;;  %v838_v44 = vadd.f32 %v830_v23, %v3564_v24  ;;  %v521_v51 = vrot.slane %v496_v35, 2  ;;  %v765_v24 = vmul.f32 %v3558_v19, %v3617_v62 }
  0xc9   :  { %v3652_v57 = vpop.permute.xlu1 %747  ;;  %v3654_v58 = vpop.permute.xlu0 %455  ;;  %v323_v23 = vmax.f32 %v315_v54, 0.0 }
  0xca   :  { %v465_v3 = vmul.f32 %v3574_v28, %v3654_v58  ;;  %v288_v0 = vadd.f32 %v280_v1, %v218_v56  ;;  %v514_v56 = vsel %vm513_vm4, %v512_v39, %v511_v46  ;;  %v768_v1 = vmul.f32 %v3558_v19, %v3631_v29 }
  0xcb   :  { %v701_v29 = vmul.f32 %v3553_v18, %v3546_v15  ;;  %v1021_v15 = vld [vmem:[%s4580_s27 + $0x2] sm:$0x1] }
  0xcc   :  { %v473_v16 = vadd.f32 %v465_v3, %v409_v60  ;;  %v302_v49 = vmul.f32 %v3599_v48, %v288_v0  ;;  %v517_v60 = vsel %vm516_vm5, %v515_v42, %v514_v56  ;;  %v846_v3 = vmul.f32 %v3599_v48, %v838_v44  ;;  %v79_v44 = vld [vmem:[%s4576_s28 + $0x30] sm:$0xff] }
  0xcd   :  { %v802_v30 = vpop.permute.xlu0 %801  ;;  %v95_v33 = vpop.permute.xlu1 %94  ;;  %v520_v11 = vsel %vm519_vm6, %v518_v43, %v517_v60  ;;  %v773_v39 = vadd.f32 %v765_v24, %v701_v29  ;;  %v776_v41 = vadd.f32 %v768_v1, %v704_v5  ;;  %v769_v24 = vmul.f32 %v3558_v19, %v3652_v57 }
  0xce   :  { %v481_v36 = vmul.f32 %v3599_v48, %v473_v16  ;;  %v831_v31 = vmul.f32 %v3574_v28, %v802_v30  ;;  %v138_v53 = vmul.f32 %v3553_v18, %v95_v33  ;;  %v316_v6 = vadd.f32 %v3624_v2, %v302_v49  ;;  %v1024_v49 = vld [vmem:[%s4580_s27 + $0x1a] sm:$0x1] }
  0xcf   :  { %v523_v20 = vsel %vm522_vm7, %v521_v51, %v520_v11  ;;  %v281_v33 = vmul.f32 %v3574_v28, %v3534_v4  ;;  %v854_v4 = vadd.f32 %v3624_v2, %v846_v3  ;;  %v1038_v51 = vsel %vm507_vm2, %v1037_v37, %v1021_v15 }
  0xd0   :  { %v489_v45 = vadd.f32 %v3624_v2, %v481_v36  ;;  %v839_v55 = vadd.f32 %v831_v31, %v775_v47  ;;  %v80_v36 = vld [vmem:[%s4576_s28 + $0x38] sm:$0xff]  ;;  %v324_v31 = vmax.f32 %v316_v6, 0.0  ;;  %v1025_v6 = vld [vmem:[%s4580_s27 + $0x22] sm:$0x1]  ;;  %v282_v29 = vmul.f32 %v3574_v28, %v3538_v8 }
  0xd1   :  { %v110_v10 = vpop.permute.xlu0 %109  ;;  %v165_v50 = vpop.permute.xlu1 %164 }
  0xd2   :  { %v497_v52 = vmax.f32 %v489_v45, 0.0  ;;  %v208_v25 = vmul.f32 %v3558_v19, %v165_v50  ;;  %v141_v12 = vmul.f32 %v3553_v18, %v110_v10  ;;  %v847_v0 = vmul.f32 %v3599_v48, %v839_v55 }
  0xd3   :  { %v612_v10 = vrot.slane %v323_v23, 7  ;;  %v862_v55 = vmax.f32 %v854_v4, 0.0  ;;  %v614_v56 = vrot.slane %v324_v31, 6  ;;  %v705_v23 = vmul.f32 %v3553_v18, %v3560_v21 }
  0xd4   :  { %v216_v59 = vadd.f32 %v208_v25, %v138_v53  ;;  %v524_v61 = vrot.slane %v497_v52, 1  ;;  %v855_v50 = vadd.f32 %v3624_v2, %v847_v0  ;;  %v1039_v52 = vrot.slane %v1023_v38, 6 }
  0xd5   :  { %v180_v14 = vpop.permute.xlu0 %179  ;;  %v3695_v7 = vpop.permute.xlu1 %752  ;;  %v777_v4 = vadd.f32 %v769_v24, %v705_v23  ;;  %v283_v24 = vmul.f32 %v3574_v28, %v3542_v13 }
  0xd6   :  { %v286_v16 = vadd.f32 %v278_v27, %v216_v59  ;;  %v211_v62 = vmul.f32 %v3558_v19, %v180_v14  ;;  %v526_v30 = vsel %vm525_vm8, %v524_v61, %v523_v20  ;;  %v1041_v61 = vrot.slane %v1024_v49, 5 }
  0xd7   :  { %2937 = vmatmul.mubr.msk.f32.vlgmr.msra.gmra.mxu0 %vm527_vm9, %v526_v30  ;;  %v863_v14 = vmax.f32 %v855_v50, 0.0  ;;  %v1014_v50 = vld [vmem:[%s4580_s27 + $0x9] sm:$0x1] }
  0xd8   :  { %v300_v34 = vmul.f32 %v3599_v48, %v286_v16  ;;  %v219_v35 = vadd.f32 %v211_v62, %v141_v12  ;;  %2949 = vmatpush3.msk.msra.mxu0 %vm530_vm0, %v81_v22  ;;  %2954 = vmatprep.mubr.msk.f32.mxu0 %vm3219_vm1, %v3218_v40  ;;  %v1040_v22 = vsel %vm510_vm3, %v1039_v52, %v1038_v51  ;;  %vm2746_vm0 = vcmask 261120  }
  0xd9   :  { %v792_v27 = vpop.permute.xlu0 %791  ;;  %v807_v42 = vpop.permute.xlu1 %806  ;;  %2950 = vmatprep.subr.mxu0 %v3218_v40  ;;  %v770_v51 = vmul.f32 %v3558_v19, %v3695_v7  ;;  %v706_v7 = vmul.f32 %v3553_v18, %v3581_v32  ;;  %v1013_v32 = vld [vmem:[%s4580_s27 + $0x1] sm:$0x1] }
  0xda   :  { %v314_v45 = vadd.f32 %v3624_v2, %v300_v34  ;;  %v289_v46 = vadd.f32 %v281_v33, %v219_v35  ;;  %v829_v47 = vmul.f32 %v3574_v28, %v792_v27  ;;  %v832_v43 = vmul.f32 %v3574_v28, %v807_v42  ;;  %2951 = vmatpush3.msra.mxu0 %v80_v36 }
  0xdb   :  { %2952 = vmatprep.subr.mxu0 %v3218_v40  ;;  %v1043_v34 = vrot.slane %v1025_v6, 4  ;;  %v877_v35 = vrot.slane %v862_v55, 7  ;;  %v3795_v6 = vld [vmem:[%s4580_s27 + $0x3a] sm:$0x1] }
  0xdc   :  { %v322_v53 = vmax.f32 %v314_v45, 0.0  ;;  %v303_v25 = vmul.f32 %v3599_v48, %v289_v46  ;;  %v837_v5 = vadd.f32 %v829_v47, %v773_v39  ;;  %v840_v54 = vadd.f32 %v832_v43, %v776_v41  ;;  %2953 = vmatpush3.msra.mxu0 %v79_v44  ;;  %v1026_v39 = vld [vmem:[%s4580_s27 + $0x2a] sm:$0x1] }
  0xdd   :  { %v115_v59 = vpop.permute.xlu0 %114  ;;  %v185_v60 = vpop.permute.xlu1 %184  ;;  %2957 = vmatprep.subr.mxu0 %v3218_v40  ;;  %v879_v41 = vrot.slane %v863_v14, 6  ;;  %v1042_v45 = vsel %vm513_vm4, %v1041_v61, %v1040_v22  ;;  %v1136_v61 = vrot.slane %v1014_v50, 7  ;;  %v778_v14 = vadd.f32 %v770_v51, %v706_v7  ;;  %v1017_v51 = vld [vmem:[%s4580_s27 + $0x21] sm:$0x1] }
  0xde   :  { %v613_v9 = vsel %vm507_vm2, %v612_v10, %v322_v53  ;;  %v317_v37 = vadd.f32 %v3624_v2, %v303_v25  ;;  %v845_v3 = vmul.f32 %v3599_v48, %v837_v5  ;;  %v848_v1 = vmul.f32 %v3599_v48, %v840_v54  ;;  %v1027_v5 = vld [vmem:[%s4580_s27 + $0x32] sm:$0x1] }
  0xdf   :  { %v142_v57 = vmul.f32 %v3553_v18, %v115_v59  ;;  %v212_v11 = vmul.f32 %v3558_v19, %v185_v60  ;;  %v615_v12 = vsel %vm510_vm3, %v614_v56, %v613_v9  ;;  %v1045_v10 = vrot.slane %v1026_v39, 3  ;;  %v1015_v60 = vld [vmem:[%s4580_s27 + $0x11] sm:$0x1] }
  0xe0   :  { %v325_v16 = vmax.f32 %v317_v37, 0.0  ;;  %v853_v62 = vadd.f32 %v3624_v2, %v845_v3  ;;  %v856_v20 = vadd.f32 %v3624_v2, %v848_v1  ;;  %v1044_v56 = vsel %vm516_vm5, %v1043_v34, %v1042_v45  ;;  %v1347_v45 = vld [vmem:[%s4580_s27 + $0xc] sm:$0x1] }
  0xe1   :  { %v220_v0 = vadd.f32 %v212_v11, %v142_v57  ;;  %v758_v30 = vpop.permute.xlu0 %757  ;;  %v812_v33 = vpop.permute.xlu1 %811  ;;  %v1047_v13 = vrot.slane %v1027_v5, 2  ;;  %v1138_v22 = vrot.slane %v1015_v60, 6  ;;  %v1137_v34 = vsel %vm507_vm2, %v1136_v61, %v1013_v32  ;;  %v1228_v5 = vld [vmem:[%s4580_s27 + $0x1b] sm:$0x1] }
  0xe2   :  { %v616_v36 = vrot.slane %v325_v16, 5  ;;  %v861_v15 = vmax.f32 %v853_v62, 0.0  ;;  %v864_v38 = vmax.f32 %v856_v20, 0.0  ;;  %v833_v8 = vmul.f32 %v3574_v28, %v812_v33  ;;  %v1226_v16 = vld [vmem:[%s4580_s27 + $0xb] sm:$0x1] }
  0xe3   :  { %v290_v31 = vadd.f32 %v282_v29, %v220_v0  ;;  %v1049_v0 = vrot.slane %v3795_v6, 1  ;;  %v1016_v33 = vld [vmem:[%s4580_s27 + $0x19] sm:$0x1]  ;;  %v708_v60 = vmul.f32 %v3553_v18, %v3654_v58  ;;  %v1245_v32 = vrot.slane %v1228_v5, 5 }
  0xe4   :  { %v878_v27 = vsel %vm507_vm2, %v877_v35, %v861_v15  ;;  %v881_v21 = vrot.slane %v864_v38, 5  ;;  %v617_v42 = vsel %vm513_vm4, %v616_v36, %v615_v12  ;;  %v841_v43 = vadd.f32 %v833_v8, %v777_v4 }
  0xe5   :  { %v880_v46 = vsel %vm510_vm3, %v879_v41, %v878_v27  ;;  %v304_v47 = vmul.f32 %v3599_v48, %v290_v31  ;;  %v120_v44 = vpop.permute.xlu0 %119  ;;  %v190_v49 = vpop.permute.xlu1 %189  ;;  %v1046_v12 = vsel %vm519_vm6, %v1045_v10, %v1044_v56  ;;  %v1241_v4 = vrot.slane %v1226_v16, 7 }
  0xe6   :  { %v882_v52 = vsel %vm513_vm4, %v881_v21, %v880_v46  ;;  %v143_v53 = vmul.f32 %v3553_v18, %v120_v44  ;;  %v213_v25 = vmul.f32 %v3558_v19, %v190_v49  ;;  %v849_v55 = vmul.f32 %v3599_v48, %v841_v43  ;;  %v1225_v21 = vld [vmem:[%s4580_s27 + $0x3] sm:$0x1] }
  0xe7   :  { %v318_v54 = vadd.f32 %v3624_v2, %v304_v47  ;;  %v3813_v39 = vsel %vm522_vm7, %v1047_v13, %v1046_v12  ;;  %v771_v41 = vmul.f32 %v3558_v19, %v758_v30  ;;  %v1139_v47 = vsel %vm510_vm3, %v1138_v22, %v1137_v34  ;;  %v1018_v34 = vld [vmem:[%s4580_s27 + $0x29] sm:$0x1] }
  0xe8   :  { %v221_v59 = vadd.f32 %v213_v25, %v143_v53  ;;  %v857_v37 = vadd.f32 %v3624_v2, %v849_v55  ;;  %v1140_v43 = vrot.slane %v1016_v33, 5  ;;  %v284_v44 = vmul.f32 %v3574_v28, %v3548_v17 }
  0xe9   :  { %v326_v9 = vmax.f32 %v318_v54, 0.0  ;;  %v763_v3 = vpop.permute.xlu0 %762  ;;  %v817_v1 = vpop.permute.xlu1 %816  ;;  %v707_v49 = vmul.f32 %v3553_v18, %v3619_v63  ;;  %v1242_v54 = vsel %vm507_vm2, %v1241_v4, %v1225_v21  ;;  %v1362_v55 = vrot.slane %v1347_v45, 7  ;;  %v1520_v21 = vld [vmem:[%s4580_s27 + $0x15] sm:$0x1] }
  0xea   :  { %v291_v57 = vadd.f32 %v283_v24, %v221_v59  ;;  %v834_v11 = vmul.f32 %v3574_v28, %v817_v1  ;;  %v865_v20 = vmax.f32 %v857_v37, 0.0  ;;  %v1346_v59 = vld [vmem:[%s4580_s27 + $0x4] sm:$0x1]  ;;  %v1142_v37 = vrot.slane %v1017_v51, 4 }
  0xeb   :  { %v618_v62 = vrot.slane %v326_v9, 4  ;;  %v779_v56 = vadd.f32 %v771_v41, %v707_v49  ;;  %v1141_v9 = vsel %vm513_vm4, %v1140_v43, %v1139_v47  ;;  %v1536_v5 = vrot.slane %v1520_v21, 6  ;;  %v3972_v21 = vld [vmem:[%s4549_s9 + $0x10] sm:$0x3f] }
  0xec   :  { %v305_v29 = vmul.f32 %v3599_v48, %v291_v57  ;;  %v842_v23 = vadd.f32 %v834_v11, %v778_v14  ;;  %v883_v35 = vrot.slane %v865_v20, 4  ;;  %v1348_v14 = vld [vmem:[%s4580_s27 + $0x14] sm:$0x1]  ;;  %v1519_v57 = vld [vmem:[%s4580_s27 + $0xd] sm:$0x1]  ;;  %v1363_v20 = vsel %vm507_vm2, %v1362_v55, %v1346_v59 }
  0xed   :  { %v125_v36 = vpop.permute.xlu0 %124  ;;  %v195_v15 = vpop.permute.xlu1 %194  ;;  %v619_v38 = vsel %vm516_vm5, %v618_v62, %v617_v42  ;;  %v1227_v42 = vld [vmem:[%s4580_s27 + $0x13] sm:$0x1] }
  0xee   :  { %v319_v31 = vadd.f32 %v3624_v2, %v305_v29  ;;  %v144_v8 = vmul.f32 %v3553_v18, %v125_v36  ;;  %v214_v27 = vmul.f32 %v3558_v19, %v195_v15  ;;  %v3829_v30 = vsel %vm516_vm5, %v883_v35, %v882_v52  ;;  %v1349_v35 = vld [vmem:[%s4580_s27 + $0x1c] sm:$0x1] }
  0xef   :  { %v850_v46 = vmul.f32 %v3599_v48, %v842_v23  ;;  %v772_v52 = vmul.f32 %v3558_v19, %v763_v3  ;;  %v1243_v17 = vrot.slane %v1227_v42, 6  ;;  %v285_v36 = vmul.f32 %v3574_v28, %v3568_v26  ;;  %v1019_v26 = vld [vmem:[%s4580_s27 + $0x31] sm:$0x1] }
  0xf0   :  { %v327_v10 = vmax.f32 %v319_v31, 0.0  ;;  %v222_v50 = vadd.f32 %v214_v27, %v144_v8  ;;  %v1518_v27 = vld [vmem:[%s4580_s27 + $0x5] sm:$0x1]  ;;  %v1144_v42 = vrot.slane %v1018_v34, 3  ;;  %v1523_v34 = vld [vmem:[%s4580_s27 + $0x2d] sm:$0x1] }
  0xf1   :  { %v822_v53 = vpop.permute.xlu0 %821  ;;  %v130_v25 = vpop.permute.xlu1 %129  ;;  %v858_v61 = vadd.f32 %v3624_v2, %v850_v46  ;;  %v780_v58 = vadd.f32 %v772_v52, %v708_v60  ;;  %v1244_v62 = vsel %vm510_vm3, %v1243_v17, %v1242_v54  ;;  %v1366_v46 = vrot.slane %v1349_v35, 5  ;;  %v1351_v60 = vld [vmem:[%s4580_s27 + $0x2c] sm:$0x1] }
  0xf2   :  { %v620_v63 = vrot.slane %v327_v10, 3  ;;  %v292_v24 = vadd.f32 %v284_v44, %v222_v50  ;;  %v835_v7 = vmul.f32 %v3574_v28, %v822_v53  ;;  %v145_v11 = vmul.f32 %v3553_v18, %v130_v25  ;;  %v1229_v18 = vld [vmem:[%s4580_s27 + $0x23] sm:$0x1]  ;;  %v1230_v10 = vld [vmem:[%s4580_s27 + $0x2b] sm:$0x1] }
  0xf3   :  { %v866_v15 = vmax.f32 %v858_v61, 0.0  ;;  %v1247_v45 = vrot.slane %v1229_v18, 4  ;;  %v1350_v50 = vld [vmem:[%s4580_s27 + $0x24] sm:$0x1]  ;;  %v1246_v51 = vsel %vm513_vm4, %v1245_v32, %v1244_v62  ;;  %v1521_v53 = vld [vmem:[%s4580_s27 + $0x1d] sm:$0x1] }
  0xf4   :  { %v306_v3 = vmul.f32 %v3599_v48, %v292_v24  ;;  %v843_v1 = vadd.f32 %v835_v7, %v779_v56  ;;  %v621_v13 = vsel %vm519_vm6, %v620_v63, %v619_v38  ;;  %v1364_v38 = vrot.slane %v1348_v14, 6  ;;  %v1020_v63 = vld [vmem:[%s4580_s27 + $0x39] sm:$0x1]  ;;  %v3923_v32 = vld [vmem:[%s4549_s9 + $0x8] sm:$0x3f] }
  0xf5   :  { %v200_v12 = vpop.permute.xlu0 %199  ;;  %v827_v16 = vpop.permute.xlu1 %826  ;;  %v885_v54 = vrot.slane %v866_v15, 3  ;;  %v1146_v7 = vrot.slane %v1019_v26, 2  ;;  %v1249_v59 = vrot.slane %v1230_v10, 3  ;;  %v1368_v61 = vrot.slane %v1350_v50, 4  ;;  %v1352_v62 = vld [vmem:[%s4580_s27 + $0x34] sm:$0x1] }
  0xf6   :  { %v320_v22 = vadd.f32 %v3624_v2, %v306_v3  ;;  %v851_v29 = vmul.f32 %v3599_v48, %v843_v1  ;;  %v215_v23 = vmul.f32 %v3558_v19, %v200_v12  ;;  %v836_v33 = vmul.f32 %v3574_v28, %v827_v16  ;;  %v1522_v1 = vld [vmem:[%s4580_s27 + $0x25] sm:$0x1] }
  0xf7   :  { %v1534_v19 = vrot.slane %v1519_v57, 7  ;;  %v1143_v28 = vsel %vm516_vm5, %v1142_v37, %v1141_v9  ;;  %v1365_v52 = vsel %vm510_vm3, %v1364_v38, %v1363_v20  ;;  %v1248_v57 = vsel %vm516_vm5, %v1247_v45, %v1246_v51  ;;  %v3948_v38 = vld [vmem:[%s4549_s9] sm:$0x3f] }
  0xf8   :  { %v328_v4 = vmax.f32 %v320_v22, 0.0  ;;  %v859_v41 = vadd.f32 %v3624_v2, %v851_v29  ;;  %v223_v31 = vadd.f32 %v215_v23, %v145_v11  ;;  %v844_v8 = vadd.f32 %v836_v33, %v780_v58  ;;  %v1232_v29 = vld [vmem:[%s4580_s27 + $0x3b] sm:$0x1] }
  0xf9   :  { %v1535_v25 = vsel %vm507_vm2, %v1534_v19, %v1518_v27  ;;  %v1367_v3 = vsel %vm513_vm4, %v1366_v46, %v1365_v52  ;;  %v1145_v14 = vsel %vm519_vm6, %v1144_v42, %v1143_v28  ;;  %v886_v12 = vsel %vm519_vm6, %v885_v54, %v3829_v30  ;;  %v999_v54 = vld [vmem:[%s4550_s12 + $0x60] sm:$0xff] }
  0xfa   :  { %v622_v47 = vrot.slane %v328_v4, 2  ;;  %v867_v43 = vmax.f32 %v859_v41, 0.0  ;;  %v293_v44 = vadd.f32 %v285_v36, %v223_v31  ;;  %v852_v49 = vmul.f32 %v3599_v48, %v844_v8  ;;  %v1353_v41 = vld [vmem:[%s4580_s27 + $0x3c] sm:$0x1] }
  0xfb   :  { %v1537_v58 = vsel %vm510_vm3, %v1536_v5, %v1535_v25  ;;  %v1370_v20 = vrot.slane %v1351_v60, 3  ;;  %v1369_v33 = vsel %vm516_vm5, %v1368_v61, %v1367_v3  ;;  %v1540_v30 = vrot.slane %v1522_v1, 4  ;;  %v1001_v25 = vld [vmem:[%s4550_s12 + $0x70] sm:$0xff]  ;;  %v1000_v5 = vld [vmem:[%s4550_s12 + $0x68] sm:$0xff]  ;;  %v1771_v60 = vld [vmem:[%s4580_s27 + $0x6] sm:$0x1] }
  0xfc   :  { %v307_v17 = vmul.f32 %v3599_v48, %v293_v44  ;;  %v860_v55 = vadd.f32 %v3624_v2, %v852_v49  ;;  %v623_v56 = vsel %vm522_vm7, %v622_v47, %v621_v13  ;;  %v887_v24 = vrot.slane %v867_v43, 2  ;;  %v1231_v48 = vld [vmem:[%s4580_s27 + $0x33] sm:$0x1]  ;;  %v1525_v47 = vld [vmem:[%s4580_s27 + $0x3d] sm:$0x1] }
  0xfd   :  { %v1538_v13 = vrot.slane %v1521_v53, 5  ;;  %v1251_v23 = vrot.slane %v1231_v48, 2  ;;  %v1250_v36 = vsel %vm519_vm6, %v1249_v59, %v1248_v57  ;;  %v1050_v19 = vsel %vm525_vm8, %v1049_v0, %v3813_v39  ;;  %v1524_v0 = vld [vmem:[%s4580_s27 + $0x35] sm:$0x1]  ;;  %v1002_v53 = vld [vmem:[%s4550_s12 + $0x78] sm:$0xff] }
  0xfe   :  { %v321_v9 = vadd.f32 %v3624_v2, %v307_v17  ;;  %v868_v37 = vmax.f32 %v860_v55, 0.0  ;;  %v1148_v2 = vrot.slane %v1020_v63, 1  ;;  %v888_v22 = vsel %vm522_vm7, %v887_v24, %v886_v12  ;;  %v998_v17 = vld [vmem:[%s4550_s12 + $0x58] sm:$0xff]  ;;  %v997_v55 = vld [vmem:[%s4550_s12 + $0x50] sm:$0xff]  ;;  %v995_v63 = vld [vmem:[%s4550_s12 + $0x40] sm:$0xff] }
  0xff   :  { %v1539_v15 = vsel %vm513_vm4, %v1538_v13, %v1537_v58  ;;  %v1147_v4 = vsel %vm522_vm7, %v1146_v7, %v1145_v14  ;;  %v1372_v31 = vrot.slane %v1352_v62, 2  ;;  %v1253_v27 = vrot.slane %v1232_v29, 1  ;;  %v1772_v24 = vld [vmem:[%s4580_s27 + $0xe] sm:$0x1]  ;;  %v1773_v7 = vld [vmem:[%s4580_s27 + $0x16] sm:$0x1] }
 0x100   :  { %v889_v11 = vrot.slane %v868_v37, 1  ;;  %v329_v16 = vmax.f32 %v321_v9, 0.0  ;;  %v1371_v6 = vsel %vm519_vm6, %v1370_v20, %v1369_v33  ;;  %v1542_v39 = vrot.slane %v1523_v34, 3  ;;  %v1774_v61 = vld [vmem:[%s4580_s27 + $0x1e] sm:$0x1] }
 0x101   :  { %v1252_v26 = vsel %vm522_vm7, %v1251_v23, %v1250_v36  ;;  %v1541_v28 = vsel %vm516_vm5, %v1540_v30, %v1539_v15  ;;  %v1149_v42 = vsel %vm525_vm8, %v1148_v2, %v1147_v4  ;;  %v1374_v45 = vrot.slane %v1353_v41, 1  ;;  %v1775_v37 = vld [vmem:[%s4580_s27 + $0x26] sm:$0x1]  ;;  %v1776_v1 = vld [vmem:[%s4580_s27 + $0x2e] sm:$0x1] }
 0x102   :  { %v890_v18 = vsel %vm525_vm8, %v889_v11, %v888_v22  ;;  %v624_v35 = vrot.slane %v329_v16, 1  ;;  %v1373_v46 = vsel %vm522_vm7, %v1372_v31, %v1371_v6  ;;  %v1544_v43 = vrot.slane %v1524_v0, 2  ;;  %v1944_v14 = vld [vmem:[%s4580_s27 + $0xf] sm:$0x1]  ;;  %v1777_v2 = vld [vmem:[%s4580_s27 + $0x36] sm:$0x1] }
 0x103   :  { %2955 = vmatmul.mubr.msk.f32.vlgmr.msra.gmra.mxu0 %vm527_vm9, %v890_v18  ;;  %v1254_v44 = vsel %vm525_vm8, %v1253_v27, %v1252_v26  ;;  %v1543_v49 = vsel %vm519_vm6, %v1542_v39, %v1541_v28  ;;  %v1375_v10 = vsel %vm525_vm8, %v1374_v45, %v1373_v46  ;;  %v1546_v50 = vrot.slane %v1525_v47, 1  ;;  %v1945_v11 = vld [vmem:[%s4580_s27 + $0x17] sm:$0x1]  ;;  %v1778_v16 = vld [vmem:[%s4580_s27 + $0x3e] sm:$0x1]  ;;  %v2139_v46 = vld [vmem:[%s4551_s15] sm:$0xff] }
 0x104   :  { %2958 = vmatpush3.msk.msra.mxu0 %vm1054_vm10, %v3923_v32  ;;  %v625_v8 = vsel %vm525_vm8, %v624_v35, %v623_v56  ;;  %2959 = vmatprep.mubr.msk.f32.mxu0 %vm3219_vm1, %v3218_v40  ;;  %v1545_v51 = vsel %vm522_vm7, %v1544_v43, %v1543_v49  ;;  %v996_v56 = vld [vmem:[%s4550_s12 + $0x48] sm:$0xff]  ;;  %v1787_v59 = vrot.slane %v1772_v24, 7  ;;  %v1789_v9 = vrot.slane %v1773_v7, 6  ;;  %v1943_v22 = vld [vmem:[%s4580_s27 + $0x7] sm:$0x1] }
 0x105   :  { %2946 = vmatmul.mubr.msk.f32.vlgmr.msra.gmra.mxu1 %vm527_vm9, %v625_v8  ;;  %2967 = vmatprep.subr.mxu0 %v3218_v40  ;;  %v4014_v52 = vsel %vm525_vm8, %v1546_v50, %v1545_v51  ;;  %v1791_v3 = vrot.slane %v1774_v61, 5  ;;  %v1795_v58 = vrot.slane %v1776_v1, 3  ;;  %v1959_v12 = vrot.slane %v1944_v14, 7  ;;  %v1946_v33 = vld [vmem:[%s4580_s27 + $0x1f] sm:$0x1]  ;;  %v2138_v47 = vld [vmem:[%s4552_s1] sm:$0xff] }
 0x106   :  { %2963 = vmatpush3.msk.msra.mxu1 %vm1054_vm10, %v3948_v38  ;;  %2964 = vmatprep.mubr.msk.f32.mxu1 %vm3219_vm1, %v3218_v40  ;;  %v1788_v48 = vsel %vm507_vm2, %v1787_v59, %v1771_v60  ;;  %v1797_v20 = vrot.slane %v1777_v2, 2  ;;  %v1799_v23 = vrot.slane %v1778_v16, 1  ;;  %v1947_v34 = vld [vmem:[%s4580_s27 + $0x27] sm:$0x1]  ;;  %v1961_v18 = vrot.slane %v1945_v11, 6 }
 0x107   :  { %2960 = vmatmul.mubr.msk.f32.vlgmr.msra.gmra.mxu0 %vm1051_vm11, %v1050_v19  ;;  %2972 = vmatprep.subr.mxu1 %v3218_v40  ;;  %v1790_v13 = vsel %vm510_vm3, %v1789_v9, %v1788_v48  ;;  %v1960_v30 = vsel %vm507_vm2, %v1959_v12, %v1943_v22  ;;  %v1948_v36 = vld [vmem:[%s4580_s27 + $0x2f] sm:$0x1]  ;;  %v1963_v15 = vrot.slane %v1946_v33, 5  ;;  %v1965_v19 = vrot.slane %v1947_v34, 4  ;;  %v1949_v41 = vld [vmem:[%s4580_s27 + $0x37] sm:$0x1] }
 0x108   :  { %2968 = vmatpush3.msk.msra.mxu0 %vm1054_vm10, %v3972_v21  ;;  %2969 = vmatprep.mubr.msk.f32.mxu0 %vm3219_vm1, %v3218_v40  ;;  %v1792_v57 = vsel %vm513_vm4, %v1791_v3, %v1790_v13  ;;  %v1962_v31 = vsel %vm510_vm3, %v1961_v18, %v1960_v30  ;;  %v1967_v8 = vrot.slane %v1948_v36, 3  ;;  %v1950_v27 = vld [vmem:[%s4580_s27 + $0x3f] sm:$0x1]  ;;  %v1969_v0 = vrot.slane %v1949_v41, 2  ;;  %v4149_v48 = vld [vmem:[%s4553_s10] ss:$0 sm:$0xff] }
 0x109   :  { %2965 = vmatmul.mubr.msk.f32.vlgmr.msra.gmra.mxu1 %vm1051_vm11, %v1149_v42  ;;  %2977 = vmatprep.subr.mxu0 %v3218_v40  ;;  %v1964_v6 = vsel %vm513_vm4, %v1963_v15, %v1962_v31  ;;  %v1971_v26 = vrot.slane %v1950_v27, 1  ;;  %v4155_v13 = vld [vmem:[%s4554_s11] ss:$0 sm:$0xff]  ;;  %v992_v12 = vld [vmem:[%s4550_s12 + $0x28] sm:$0xff]  ;;  %v989_v22 = vld [vmem:[%s4550_s12 + $0x10] sm:$0xff] }
 0x10a   :  { %2973 = vmatpush3.msk.msra.mxu1 %vm1054_vm10, %v3923_v32  ;;  %2974 = vmatprep.mubr.msk.f32.mxu1 %vm3219_vm1, %v3218_v40  ;;  %v1966_v39 = vsel %vm516_vm5, %v1965_v19, %v1964_v6  ;;  %v991_v16 = vld [vmem:[%s4550_s12 + $0x20] sm:$0xff]  ;;  %v1010_v30 = vld [vmem:[%s4550_s12 + $0xb8] sm:$0xff]  ;;  %v1005_v41 = vld [vmem:[%s4550_s12 + $0x90] sm:$0xff] }
 0x10b   :  { %2970 = vmatmul.mubr.msk.f32.vlgmr.msra.gmra.mxu0 %vm1051_vm11, %v1254_v44  ;;  %2982 = vmatprep.subr.mxu1 %v3218_v40  ;;  %v1968_v28 = vsel %vm519_vm6, %v1967_v8, %v1966_v39  ;;  %v987_v33 = vld [vmem:[%s4550_s12] sm:$0xff]  ;;  %v1006_v19 = vld [vmem:[%s4550_s12 + $0x98] sm:$0xff]  ;;  %v1004_v31 = vld [vmem:[%s4550_s12 + $0x88] sm:$0xff] }
 0x10c   :  { %2978 = vmatpush3.msk.msra.mxu0 %vm1054_vm10, %v3948_v38  ;;  %2979 = vmatprep.mubr.msk.f32.mxu0 %vm3219_vm1, %v3218_v40  ;;  %v1970_v42 = vsel %vm522_vm7, %v1969_v0, %v1968_v28  ;;  %v1007_v36 = vld [vmem:[%s4550_s12 + $0xa0] sm:$0xff]  ;;  %v2247_v27 = vld [vmem:[%s4555_s18 + $0x38] sm:$0xff]  ;;  %v2246_v6 = vld [vmem:[%s4555_s18 + $0x30] sm:$0xff] }
 0x10d   :  { %2975 = vmatmul.mubr.msk.f32.vlgmr.msra.gmra.mxu1 %vm1051_vm11, %v1375_v10  ;;  %3025 = vmatprep.subr.mxu0 %v3218_v40  ;;  %v1972_v45 = vsel %vm525_vm8, %v1971_v26, %v1970_v42  ;;  %v1003_v8 = vld [vmem:[%s4550_s12 + $0x80] sm:$0xff]  ;;  %v2245_v0 = vld [vmem:[%s4555_s18 + $0x28] sm:$0xff]  ;;  %v2243_v26 = vld [vmem:[%s4555_s18 + $0x18] sm:$0xff] }
 0x10e   :  { %2983 = vmatpush3.msk.msra.mxu1 %vm1054_vm10, %v3972_v21  ;;  %2984 = vmatprep.mubr.msk.f32.mxu1 %vm3219_vm1, %v3218_v40  ;;  %v2244_v39 = vld [vmem:[%s4555_s18 + $0x20] sm:$0xff]  ;;  %v2242_v28 = vld [vmem:[%s4555_s18 + $0x10] sm:$0xff] }
 0x10f   :  { %2980 = vmatmul.mubr.msk.f32.vlgmr.msra.gmra.mxu0 %vm1051_vm11, %v1254_v44  ;;  %2987 = vmatprep.subr.mxu1 %v3218_v40 }
 0x110   :  { %3026 = vmatpush3.msk.msra.mxu0 %vm1054_vm10, %v3923_v32  ;;  %3027 = vmatprep.mubr.msk.f32.mxu0 %vm3219_vm1, %v3218_v40  ;;  %v1793_v32 = vrot.slane %v1775_v37, 4 }
 0x111   :  { %2985 = vmatmul.mubr.msk.f32.vlgmr.msra.gmra.mxu1 %vm1051_vm11, %v4014_v52  ;;  %3035 = vmatprep.subr.mxu0 %v3218_v40 }
 0x112   :  { %3003 = vmatprep.mubr.msk.f32.mxu1 %vm3219_vm1, %v3218_v40  ;;  %2988 = vmatpush3.msra.mxu1 %v1002_v53  ;;  %v1794_v62 = vsel %vm516_vm5, %v1793_v32, %v1792_v57  ;;  %v994_v57 = vld [vmem:[%s4550_s12 + $0x38] sm:$0xff] }
 0x113   :  { %2989 = vmatprep.subr.mxu1 %v3218_v40  ;;  %v1796_v29 = vsel %vm519_vm6, %v1795_v58, %v1794_v62  ;;  %v993_v58 = vld [vmem:[%s4550_s12 + $0x30] sm:$0xff] }
 0x114   :  { %2990 = vmatpush3.msra.mxu1 %v1001_v25  ;;  %v1798_v35 = vsel %vm522_vm7, %v1797_v20, %v1796_v29  ;;  %v990_v20 = vld [vmem:[%s4550_s12 + $0x18] sm:$0xff] }
 0x115   :  { %2991 = vmatprep.subr.mxu1 %v3218_v40  ;;  %v1800_v4 = vsel %vm525_vm8, %v1799_v23, %v1798_v35  ;;  %v988_v23 = vld [vmem:[%s4550_s12 + $0x8] sm:$0xff] }
 0x116   :  { %2992 = vmatpush3.msra.mxu1 %v1000_v5  ;;  %3028 = vmatmul.mubr.msk.f32.vlgmr.msra.gmra.mxu0 %vm1051_vm11, %v1800_v4  ;;  %v1008_v35 = vld [vmem:[%s4550_s12 + $0xa8] sm:$0xff] }
 0x117   :  { %2993 = vmatprep.subr.mxu1 %v3218_v40  ;;  %3036 = vmatpush3.msk.msra.mxu0 %vm1054_vm10, %v3972_v21  ;;  %v2140_v21 = vld [vmem:[%s4551_s15 + $0x8] sm:$0x3] }
 0x118   :  { %2994 = vmatpush3.msra.mxu1 %v999_v54  ;;  %3037 = vmatprep.mubr.msk.f32.mxu0 %vm3219_vm1, %v3218_v40 }
 0x119   :  { %2995 = vmatprep.subr.mxu1 %v3218_v40  ;;  %3059 = vmatprep.subr.mxu0 %v3218_v40 }
 0x11a   :  { %2996 = vmatpush3.msra.mxu1 %v998_v17  ;;  %3038 = vmatmul.mubr.msk.f32.vlgmr.msra.gmra.mxu0 %vm1051_vm11, %v1972_v45  ;;  %v2241_v45 = vld [vmem:[%s4555_s18 + $0x8] sm:$0xff] }
 0x11b   :  { %2997 = vmatprep.subr.mxu1 %v3218_v40  ;;  %3060 = vmatpush3.msk.msra.mxu0 %vm2152_vm12, %v2140_v21  ;;  %v2790_v21 = vld [vmem:[%s4556_s16] ss:$0 sm:$0xff] }
 0x11c   :  { %2998 = vmatpush3.msra.mxu1 %v997_v55  ;;  %3063 = vmatprep.mubr.msk.f32.mxu0 %vm3219_vm1, %v3218_v40 }
 0x11d   :  { %2999 = vmatprep.subr.mxu1 %v3218_v40  ;;  %3061 = vmatprep.subr.mxu0 %v3218_v40 }
 0x11e   :  { %3000 = vmatpush3.msra.mxu1 %v996_v56  ;;  %3062 = vmatpush3.msra.mxu0 %v2139_v46 }
 0x11f   :  { %3001 = vmatprep.subr.mxu1 %v3218_v40  ;;  %3064 = vmatmul.mubr.msk.f32.vlgmr.msra.gmra.mxu0 %vm2148_vm13, %v2138_v47  ;;  %v2240_v47 = vld [vmem:[%s4555_s18] sm:$0xff] }
 0x120   :  { %3002 = vmatpush3.msra.mxu1 %v995_v63  ;;  %3066 = vmatprep.subr.mxu0 %v3218_v40 }
 0x121   :  { %3006 = vmatprep.subr.mxu1 %v3218_v40  ;;  %3082 = vmatprep.mubr.msk.f32.mxu0 %vm3219_vm1, %v3218_v40 }
 0x122   :  { %3067 = vmatpush3.msra.mxu0 %v2247_v27  ;;  %v2259_v27 = vld [vmem:[%s4557_s19 + $0x18] sm:$0xff] }
 0x123   :  { %3068 = vmatprep.subr.mxu0 %v3218_v40 }
 0x124   :  { %3069 = vmatpush3.msra.mxu0 %v2246_v6  ;;  %v2258_v6 = vld [vmem:[%s4557_s19 + $0x10] sm:$0xff] }
 0x125   :  { %3070 = vmatprep.subr.mxu0 %v3218_v40 }
 0x126   :  { %3071 = vmatpush3.msra.mxu0 %v2245_v0  ;;  %v2257_v0 = vld [vmem:[%s4557_s19 + $0x8] sm:$0xff] }
 0x127   :  { %3072 = vmatprep.subr.mxu0 %v3218_v40 }
 0x128   :  { %3073 = vmatpush3.msra.mxu0 %v2244_v39  ;;  %v2256_v39 = vld [vmem:[%s4557_s19] sm:$0xff] }
 0x129   :  { %3074 = vmatprep.subr.mxu0 %v3218_v40 }
 0x12a   :  { %3075 = vmatpush3.msra.mxu0 %v2243_v26 }
 0x12b   :  { %3076 = vmatprep.subr.mxu0 %v3218_v40 }
 0x12c   :  { %3077 = vmatpush3.msra.mxu0 %v2242_v28 }
 0x12d   :  { %3078 = vmatprep.subr.mxu0 %v3218_v40 }
 0x12e   :  { %3079 = vmatpush3.msra.mxu0 %v2241_v45 }
 0x12f   :  { %3080 = vmatprep.subr.mxu0 %v3218_v40 }
 0x130   :  { %3081 = vmatpush3.msra.mxu0 %v2240_v47 }
 0x131   :  { %3102 = vmatprep.subr.mxu0 %v3218_v40 }
 0x197   :  { %v600_v43 = vpop.f32.mrf.mxu0 }
 0x199   :  { %v2938_v44 = vpop.f32.mrf.mxu0 }
 0x19a   :  { %v2271_v44 = vld [vmem:[%s4557_s19 + $0x78] sm:$0xff] }
 0x1c3   :  { %v962_v49 = vpop.f32.mrf.mxu0 }
 0x1c5   :  { %v697_v10 = vpop.f32.mrf.mxu1  ;;  %v2956_v50 = vpop.f32.mrf.mxu0 }
 0x1c6   :  { %v698_v51 = vadd.f32 %v697_v10, %v600_v43  ;;  %v2269_v10 = vld [vmem:[%s4557_s19 + $0x68] sm:$0xff]  ;;  %v2268_v50 = vld [vmem:[%s4557_s19 + $0x60] sm:$0xff] }
 0x1c7   :  { %v2947_v53 = vpop.f32.mrf.mxu1  ;;  %v1124_v25 = vpop.f32.mrf.mxu0 }
 0x1c8   :  { %v4144_v5 = vadd.f32 %v962_v49, %v698_v51  ;;  %v2270_v49 = vld [vmem:[%s4557_s19 + $0x70] sm:$0xff]  ;;  %v2267_v51 = vld [vmem:[%s4557_s19 + $0x58] sm:$0xff] }
 0x1c9   :  { %v2961_v54 = vpop.f32.mrf.mxu0  ;;  %v1221_v17 = vpop.f32.mrf.mxu1  ;;  %v2266_v53 = vld [vmem:[%s4557_s19 + $0x50] sm:$0xff] }
 0x1ca   :  { %v1222_v14 = vadd.f32 %v1221_v17, %v1124_v25  ;;  %v2265_v25 = vld [vmem:[%s4557_s19 + $0x48] sm:$0xff]  ;;  %v2264_v54 = vld [vmem:[%s4557_s19 + $0x40] sm:$0xff]  ;;  %v2263_v17 = vld [vmem:[%s4557_s19 + $0x38] sm:$0xff] }
 0x1cb   :  { %v2966_v55 = vpop.f32.mrf.mxu1  ;;  %v1326_v56 = vpop.f32.mrf.mxu0 }
 0x1cc   :  { %v1330_v11 = vadd.f32 %v1326_v56, %v1222_v14  ;;  %v2262_v55 = vld [vmem:[%s4557_s19 + $0x30] sm:$0xff]  ;;  %v2261_v56 = vld [vmem:[%s4557_s19 + $0x28] sm:$0xff] }
 0x1cd   :  { %v2971_v63 = vpop.f32.mrf.mxu0  ;;  %v1444_v24 = vpop.f32.mrf.mxu1 }
 0x1ce   :  { %v1337_v62 = vmul.f32 %v4149_v48, %v1330_v11  ;;  %v2260_v63 = vld [vmem:[%s4557_s19 + $0x20] sm:$0xff] }
 0x1cf   :  { %v2976_v7 = vpop.f32.mrf.mxu1  ;;  %v1514_v59 = vpop.f32.mrf.mxu0  ;;  %v2763_v11 = vld [vmem:[%s4559_s7] ss:$0 sm:$0xff] }
 0x1d0   :  { %v1515_v60 = vadd.f32 %v1514_v59, %v1444_v24  ;;  %v1344_v29 = vadd.f32 %v4155_v13, %v1337_v62  ;;  %v2228_v62 = vld [vmem:[%s4558_s17 + $0x10] sm:$0xff] }
 0x1d1   :  { %v2981_v61 = vpop.f32.mrf.mxu0  ;;  %v1616_v9 = vpop.f32.mrf.mxu1 }
 0x1d2   :  { %v1620_v37 = vadd.f32 %v1616_v9, %v1515_v60  ;;  %v1345_v34 = vmax.f32 %v1344_v29, 0.0 }
 0x1d3   :  { %v2986_v3 = vpop.f32.mrf.mxu1 }
 0x1d4   :  { %v1621_v1 = vmul.f32 %v4149_v48, %v1620_v37 }
 0x1d6   :  { %v1622_v32 = vadd.f32 %v4155_v13, %v1621_v1  ;;  %v4209_v18 = vpop.f32.mrf.mxu0 }
 0x1d8   :  { %v1623_v2 = vmax.f32 %v1622_v32, 0.0 }
 0x1da   :  { %3004 = vmatmul.mubr.msk.f32.vlgmr.msra.gmra.mxu1 %vm1624_vm14, %v1623_v2 }
 0x1db   :  { %3007 = vmatpush3.msra.mxu1 %v994_v57  ;;  %3022 = vmatprep.mubr.msk.f32.mxu1 %vm3219_vm1, %v3218_v40  ;;  %v2232_v57 = vld [vmem:[%s4558_s17 + $0x30] sm:$0x3] }
 0x1dc   :  { %3008 = vmatprep.subr.mxu1 %v3218_v40 }
 0x1dd   :  { %3009 = vmatpush3.msra.mxu1 %v993_v58  ;;  %v2231_v58 = vld [vmem:[%s4558_s17 + $0x28] sm:$0xff] }
 0x1de   :  { %3010 = vmatprep.subr.mxu1 %v3218_v40 }
 0x1df   :  { %3011 = vmatpush3.msra.mxu1 %v992_v12  ;;  %v2229_v12 = vld [vmem:[%s4558_s17 + $0x18] sm:$0xff] }
 0x1e0   :  { %3012 = vmatprep.subr.mxu1 %v3218_v40 }
 0x1e1   :  { %3013 = vmatpush3.msra.mxu1 %v991_v16  ;;  %v2764_v16 = vld [vmem:[%s4560_s8] ss:$0 sm:$0xff] }
 0x1e2   :  { %3014 = vmatprep.subr.mxu1 %v3218_v40 }
 0x1e3   :  { %3015 = vmatpush3.msra.mxu1 %v990_v20 }
 0x1e4   :  { %3016 = vmatprep.subr.mxu1 %v3218_v40 }
 0x1e5   :  { %3017 = vmatpush3.msra.mxu1 %v989_v22  ;;  %v2226_v22 = vld [vmem:[%s4558_s17] sm:$0xff] }
 0x1e6   :  { %3018 = vmatprep.subr.mxu1 %v3218_v40 }
 0x1e7   :  { %3019 = vmatpush3.msra.mxu1 %v988_v23  ;;  %v2255_v23 = vld [vmem:[%s4555_s18 + $0x78] sm:$0xff] }
 0x1e8   :  { %3020 = vmatprep.subr.mxu1 %v3218_v40 }
 0x1e9   :  { %3021 = vmatpush3.msra.mxu1 %v987_v33  ;;  %v2254_v33 = vld [vmem:[%s4555_s18 + $0x70] sm:$0xff] }
 0x1ea   :  { %3023 = vmatmul.mubr.msk.f32.vlgmr.msra.gmra.mxu1 %vm1624_vm14, %v1345_v34  ;;  %3030 = vmatprep.subr.mxu1 %v3218_v40  ;;  %v2253_v34 = vld [vmem:[%s4555_s18 + $0x68] sm:$0xff] }
 0x1eb   :  { %3031 = vmatpush3.msk.msra.mxu1 %vm1054_vm10, %v3948_v38  ;;  %3032 = vmatprep.mubr.msk.f32.mxu1 %vm3219_vm1, %v3218_v40  ;;  %v1009_v38 = vld [vmem:[%s4550_s12 + $0xb0] sm:$0xff] }
 0x1ec   :  { %3040 = vmatprep.subr.mxu1 %v3218_v40 }
 0x1ee   :  { %3033 = vmatmul.mubr.msk.f32.vlgmr.msra.gmra.mxu1 %vm1051_vm11, %v4014_v52  ;;  %v3029_v52 = vpop.f32.mrf.mxu0 }
 0x1ef   :  { %3056 = vmatprep.mubr.msk.f32.mxu1 %vm3219_vm1, %v3218_v40  ;;  %3041 = vmatpush3.msra.mxu1 %v1010_v30  ;;  %v2252_v30 = vld [vmem:[%s4555_s18 + $0x60] sm:$0xff]  ;;  %v2249_v52 = vld [vmem:[%s4555_s18 + $0x48] sm:$0xff] }
 0x1f0   :  { %3042 = vmatprep.subr.mxu1 %v3218_v40  ;;  %v4222_v15 = vpop.f32.mrf.mxu0 }
 0x1f1   :  { %3043 = vmatpush3.msra.mxu1 %v1009_v38  ;;  %v2250_v38 = vld [vmem:[%s4555_s18 + $0x50] sm:$0xff] }
 0x1f2   :  { %3044 = vmatprep.subr.mxu1 %v3218_v40  ;;  %v3039_v4 = vpop.f32.mrf.mxu0 }
 0x1f3   :  { %3045 = vmatpush3.msra.mxu1 %v1008_v35  ;;  %v2248_v35 = vld [vmem:[%s4555_s18 + $0x40] sm:$0xff]  ;;  %v2236_v4 = vld [vmem:[%s4558_s17 + $0x50] sm:$0xff] }
 0x1f4   :  { %3046 = vmatprep.subr.mxu1 %v3218_v40  ;;  %v2222_v42 = vpop.f32.mrf.mxu0 }
 0x1f5   :  { %3047 = vmatpush3.msra.mxu1 %v1007_v36  ;;  %v4271_v46 = vadd.f32 %v2790_v21, %v2222_v42  ;;  %v2239_v36 = vld [vmem:[%s4558_s17 + $0x68] sm:$0x3]  ;;  %v2788_v42 = vld [vmem:[%s4561_s13] ss:$0 sm:$0xff] }
 0x1f6   :  { %3048 = vmatprep.subr.mxu1 %v3218_v40  ;;  %v3065_v43 = vpop.f32.mrf.mxu0 }
 0x1f7   :  { %3049 = vmatpush3.msra.mxu1 %v1006_v19  ;;  %3083 = vmatmul.mubr.msk.f32.vlgmr.msra.gmra.mxu0 %vm1624_vm14, %v4271_v46  ;;  %v2237_v19 = vld [vmem:[%s4558_s17 + $0x58] sm:$0xff] }
 0x1f8   :  { %3050 = vmatprep.subr.mxu1 %v3218_v40  ;;  %3134 = vmatprep.mubr.msk.f32.mxu0 %vm3219_vm1, %v3218_v40 }
 0x1f9   :  { %3051 = vmatpush3.msra.mxu1 %v1005_v41  ;;  %3103 = vmatpush3.msra.mxu0 %v2271_v44  ;;  %v2235_v41 = vld [vmem:[%s4558_s17 + $0x48] sm:$0xff] }
 0x1fa   :  { %3052 = vmatprep.subr.mxu1 %v3218_v40  ;;  %3104 = vmatprep.subr.mxu0 %v3218_v40 }
 0x1fb   :  { %3053 = vmatpush3.msra.mxu1 %v1004_v31  ;;  %3105 = vmatpush3.msra.mxu0 %v2270_v49  ;;  %v2234_v31 = vld [vmem:[%s4558_s17 + $0x40] sm:$0xff] }
 0x1fc   :  { %3054 = vmatprep.subr.mxu1 %v3218_v40  ;;  %3106 = vmatprep.subr.mxu0 %v3218_v40 }
 0x1fd   :  { %3055 = vmatpush3.msra.mxu1 %v1003_v8  ;;  %3107 = vmatpush3.msra.mxu0 %v2269_v10  ;;  %v2233_v8 = vld [vmem:[%s4558_s17 + $0x38] sm:$0xff] }
 0x1fe   :  { %3085 = vmatprep.subr.mxu1 %v3218_v40  ;;  %3108 = vmatprep.subr.mxu0 %v3218_v40  ;;  %v2287_v10 = vld [vmem:[%s4557_s19 + $0xf8] sm:$0xff] }
 0x1ff   :  { %3109 = vmatpush3.msra.mxu0 %v2268_v50  ;;  %v2286_v50 = vld [vmem:[%s4557_s19 + $0xf0] sm:$0xff] }
 0x200   :  { %3110 = vmatprep.subr.mxu0 %v3218_v40 }
 0x201   :  { %3111 = vmatpush3.msra.mxu0 %v2267_v51  ;;  %v2285_v51 = vld [vmem:[%s4557_s19 + $0xe8] sm:$0xff] }
 0x202   :  { %3112 = vmatprep.subr.mxu0 %v3218_v40 }
 0x203   :  { %3113 = vmatpush3.msra.mxu0 %v2266_v53  ;;  %v2284_v53 = vld [vmem:[%s4557_s19 + $0xe0] sm:$0xff] }
 0x204   :  { %3114 = vmatprep.subr.mxu0 %v3218_v40 }
 0x205   :  { %3115 = vmatpush3.msra.mxu0 %v2265_v25 }
 0x206   :  { %3116 = vmatprep.subr.mxu0 %v3218_v40 }
 0x207   :  { %3117 = vmatpush3.msra.mxu0 %v2264_v54  ;;  %v2283_v54 = vld [vmem:[%s4557_s19 + $0xd8] sm:$0xff] }
 0x208   :  { %3118 = vmatprep.subr.mxu0 %v3218_v40 }
 0x209   :  { %3119 = vmatpush3.msra.mxu0 %v2263_v17 }
 0x20a   :  { %3120 = vmatprep.subr.mxu0 %v3218_v40 }
 0x20b   :  { %3121 = vmatpush3.msra.mxu0 %v2262_v55  ;;  %v2282_v55 = vld [vmem:[%s4557_s19 + $0xd0] sm:$0xff] }
 0x20c   :  { %3122 = vmatprep.subr.mxu0 %v3218_v40 }
 0x20d   :  { %3123 = vmatpush3.msra.mxu0 %v2261_v56  ;;  %v2281_v56 = vld [vmem:[%s4557_s19 + $0xc8] sm:$0xff] }
 0x20e   :  { %3124 = vmatprep.subr.mxu0 %v3218_v40 }
 0x20f   :  { %3125 = vmatpush3.msra.mxu0 %v2260_v63  ;;  %v2280_v63 = vld [vmem:[%s4557_s19 + $0xc0] sm:$0xff] }
 0x210   :  { %3126 = vmatprep.subr.mxu0 %v3218_v40 }
 0x211   :  { %3127 = vmatpush3.msra.mxu0 %v2259_v27 }
 0x212   :  { %3128 = vmatprep.subr.mxu0 %v3218_v40 }
 0x213   :  { %3129 = vmatpush3.msra.mxu0 %v2258_v6 }
 0x214   :  { %3130 = vmatprep.subr.mxu0 %v3218_v40 }
 0x215   :  { %3131 = vmatpush3.msra.mxu0 %v2257_v0 }
 0x216   :  { %3132 = vmatprep.subr.mxu0 %v3218_v40 }
 0x217   :  { %3133 = vmatpush3.msra.mxu0 %v2256_v39 }
 0x218   :  { %3173 = vmatprep.subr.mxu0 %v3218_v40 }
 0x29a   :  { %v1694_v24 = vpop.f32.mrf.mxu1 }
 0x29c   :  { %v3005_v7 = vpop.f32.mrf.mxu1 }
 0x29d   :  { %v2278_v7 = vld [vmem:[%s4557_s19 + $0xb0] sm:$0xff] }
 0x2aa   :  { %v1767_v59 = vpop.f32.mrf.mxu1 }
 0x2ab   :  { %v4330_v60 = vadd.f32 %v1767_v59, %v1694_v24  ;;  %v2279_v24 = vld [vmem:[%s4557_s19 + $0xb8] sm:$0xff]  ;;  %v2277_v59 = vld [vmem:[%s4557_s19 + $0xa8] sm:$0xff] }
 0x2ac   :  { %v3024_v61 = vpop.f32.mrf.mxu1 }
 0x2ae   :  { %v1939_v9 = vpop.f32.mrf.mxu1 }
 0x2af   :  { %v1940_v37 = vadd.f32 %v1939_v9, %v4209_v18  ;;  %v2251_v18 = vld [vmem:[%s4555_s18 + $0x58] sm:$0xff] }
 0x2b0   :  { %v3034_v3 = vpop.f32.mrf.mxu1  ;;  %v2275_v9 = vld [vmem:[%s4557_s19 + $0x98] sm:$0xff] }
 0x2b1   :  { %v2045_v1 = vadd.f32 %v4222_v15, %v1940_v37  ;;  %v2238_v15 = vld [vmem:[%s4558_s17 + $0x60] sm:$0xff]  ;;  %v2274_v3 = vld [vmem:[%s4557_s19 + $0x90] sm:$0xff] }
 0x2b3   :  { %v2046_v32 = vmul.f32 %v4149_v48, %v2045_v1  ;;  %v2230_v48 = vld [vmem:[%s4558_s17 + $0x20] sm:$0xff]  ;;  %v2273_v1 = vld [vmem:[%s4557_s19 + $0x88] sm:$0xff] }
 0x2b5   :  { %v2047_v14 = vadd.f32 %v4155_v13, %v2046_v32  ;;  %v973_v13 = vmul.f32 %v2763_v11, %v4144_v5  ;;  %v2227_v5 = vld [vmem:[%s4558_s17 + $0x8] sm:$0xff]  ;;  %v2272_v32 = vld [vmem:[%s4557_s19 + $0x80] sm:$0xff] }
 0x2b7   :  { %v2048_v2 = vmax.f32 %v2047_v14, 0.0  ;;  %v980_v20 = vadd.f32 %v2764_v16, %v973_v13  ;;  %v4459_v26 = vpop.f32.mrf.mxu0 }
 0x2b9   :  { %3057 = vmatmul.mubr.msk.f32.vlgmr.msra.gmra.mxu1 %vm1624_vm14, %v2048_v2  ;;  %v981_v29 = vmax.f32 %v980_v20, 0.0  ;;  %v3084_v28 = vpop.f32.mrf.mxu0 }
 0x2ba   :  { %3086 = vmatpush3.msk.msra.mxu1 %vm2152_vm12, %v2232_v57  ;;  %3099 = vmatprep.mubr.msk.f32.mxu1 %vm3219_vm1, %v3218_v40 }
 0x2bb   :  { %3087 = vmatprep.subr.mxu1 %v3218_v40 }
 0x2bc   :  { %3088 = vmatpush3.msra.mxu1 %v2231_v58 }
 0x2bd   :  { %3089 = vmatprep.subr.mxu1 %v3218_v40 }
 0x2be   :  { %3090 = vmatpush3.msra.mxu1 %v2230_v48 }
 0x2bf   :  { %3091 = vmatprep.subr.mxu1 %v3218_v40 }
 0x2c0   :  { %3092 = vmatpush3.msra.mxu1 %v2229_v12  ;;  %v2800_v12 = vld [vmem:[%s4563_s20 + $0x1] ss:$0 sm:$0xff] }
 0x2c1   :  { %3093 = vmatprep.subr.mxu1 %v3218_v40 }
 0x2c2   :  { %3094 = vmatpush3.msra.mxu1 %v2228_v62 }
 0x2c3   :  { %3095 = vmatprep.subr.mxu1 %v3218_v40 }
 0x2c4   :  { %3096 = vmatpush3.msra.mxu1 %v2227_v5 }
 0x2c5   :  { %3097 = vmatprep.subr.mxu1 %v3218_v40 }
 0x2c6   :  { %3098 = vmatpush3.msra.mxu1 %v2226_v22 }
 0x2c7   :  { %3100 = vmatmul.mubr.msk.f32.vlgmr.msra.gmra.mxu1 %vm2363_vm15, %v981_v29  ;;  %3137 = vmatprep.subr.mxu1 %v3218_v40 }
 0x2c8   :  { %3138 = vmatpush3.msra.mxu1 %v2255_v23  ;;  %3153 = vmatprep.mubr.msk.f32.mxu1 %vm3219_vm1, %v3218_v40  ;;  %v2796_v23 = vld [vmem:[%s4563_s20] ss:$0 sm:$0xff] }
 0x2c9   :  { %3139 = vmatprep.subr.mxu1 %v3218_v40 }
 0x2ca   :  { %3140 = vmatpush3.msra.mxu1 %v2254_v33 }
 0x2cb   :  { %3141 = vmatprep.subr.mxu1 %v3218_v40 }
 0x2cc   :  { %3142 = vmatpush3.msra.mxu1 %v2253_v34 }
 0x2cd   :  { %3143 = vmatprep.subr.mxu1 %v3218_v40 }
 0x2ce   :  { %3144 = vmatpush3.msra.mxu1 %v2252_v30 }
 0x2cf   :  { %3145 = vmatprep.subr.mxu1 %v3218_v40 }
 0x2d0   :  { %3146 = vmatpush3.msra.mxu1 %v2251_v18 }
 0x2d1   :  { %3147 = vmatprep.subr.mxu1 %v3218_v40 }
 0x2d2   :  { %3148 = vmatpush3.msra.mxu1 %v2250_v38 }
 0x2d3   :  { %3149 = vmatprep.subr.mxu1 %v3218_v40 }
 0x2d4   :  { %3150 = vmatpush3.msra.mxu1 %v2249_v52 }
 0x2d5   :  { %3151 = vmatprep.subr.mxu1 %v3218_v40 }
 0x2d6   :  { %3152 = vmatpush3.msra.mxu1 %v2248_v35 }
 0x2d7   :  { %3156 = vmatprep.subr.mxu1 %v3218_v40  ;;  %3154 = vmatmul.mubr.msk.f32.vlgmr.msra.gmra.mxu1 %vm1624_vm14, %v4271_v46  ;;  %v2789_v46 = vld [vmem:[%s4562_s14] ss:$0 sm:$0xff] }
 0x2d8   :  { %3157 = vmatpush3.msk.msra.mxu1 %vm2152_vm12, %v2239_v36  ;;  %3170 = vmatprep.mubr.msk.f32.mxu1 %vm3219_vm1, %v3218_v40 }
 0x2d9   :  { %3158 = vmatprep.subr.mxu1 %v3218_v40 }
 0x2da   :  { %3159 = vmatpush3.msra.mxu1 %v2238_v15 }
 0x2db   :  { %3160 = vmatprep.subr.mxu1 %v3218_v40 }
 0x2dc   :  { %3161 = vmatpush3.msra.mxu1 %v2237_v19 }
 0x2dd   :  { %3162 = vmatprep.subr.mxu1 %v3218_v40 }
 0x2de   :  { %3163 = vmatpush3.msra.mxu1 %v2236_v4 }
 0x2df   :  { %3164 = vmatprep.subr.mxu1 %v3218_v40 }
 0x2e0   :  { %3165 = vmatpush3.msra.mxu1 %v2235_v41 }
 0x2e1   :  { %3166 = vmatprep.subr.mxu1 %v3218_v40 }
 0x2e2   :  { %3167 = vmatpush3.msra.mxu1 %v2234_v31 }
 0x2e3   :  { %3168 = vmatprep.subr.mxu1 %v3218_v40 }
 0x2e4   :  { %3169 = vmatpush3.msra.mxu1 %v2233_v8 }
 0x2e5   :  { %3171 = vmatmul.mubr.msk.f32.vlgmr.msra.gmra.mxu1 %vm2363_vm15, %v981_v29 }
 0x379   :  { %v2118_v45 = vpop.f32.mrf.mxu1 }
 0x37a   :  { %v2122_v21 = vadd.f32 %v2118_v45, %v4330_v60  ;;  %v2276_v60 = vld [vmem:[%s4557_s19 + $0xa0] sm:$0xff] }
 0x37b   :  { %v3058_v47 = vpop.f32.mrf.mxu1 }
 0x37c   :  { %v2129_v43 = vmul.f32 %v2788_v42, %v2122_v21 }
 0x37e   :  { %v2136_v44 = vadd.f32 %v2789_v46, %v2129_v43 }
 0x380   :  { %v2137_v49 = vmax.f32 %v2136_v44, 0.0 }
 0x382   :  { %3135 = vmatmul.mubr.f32.vlgmr.msra.gmra.mxu0 %v2137_v49 }
 0x383   :  { %3174 = vmatpush3.msra.mxu0 %v2287_v10  ;;  %3205 = vmatprep.mubr.msk.f32.mxu0 %vm3219_vm1, %v3218_v40 }
 0x384   :  { %3175 = vmatprep.subr.mxu0 %v3218_v40 }
 0x385   :  { %3176 = vmatpush3.msra.mxu0 %v2286_v50 }
 0x386   :  { %3177 = vmatprep.subr.mxu0 %v3218_v40 }
 0x387   :  { %v2436_v25 = vpop.f32.mrf.mxu1  ;;  %3178 = vmatpush3.msra.mxu0 %v2285_v51 }
 0x388   :  { %3179 = vmatprep.subr.mxu0 %v3218_v40  ;;  %v2437_v58 = vadd.f32 %v2436_v25, %v4459_v26 }
 0x389   :  { %v3101_v17 = vpop.f32.mrf.mxu1  ;;  %3180 = vmatpush3.msra.mxu0 %v2284_v53 }
 0x38a   :  { %3181 = vmatprep.subr.mxu0 %v3218_v40 }
 0x38b   :  { %3182 = vmatpush3.msra.mxu0 %v2283_v54 }
 0x38c   :  { %3183 = vmatprep.subr.mxu0 %v3218_v40 }
 0x38d   :  { %3184 = vmatpush3.msra.mxu0 %v2282_v55 }
 0x38e   :  { %3185 = vmatprep.subr.mxu0 %v3218_v40 }
 0x38f   :  { %3186 = vmatpush3.msra.mxu0 %v2281_v56 }
 0x390   :  { %3187 = vmatprep.subr.mxu0 %v3218_v40 }
 0x391   :  { %3188 = vmatpush3.msra.mxu0 %v2280_v63 }
 0x392   :  { %3189 = vmatprep.subr.mxu0 %v3218_v40 }
 0x393   :  { %3190 = vmatpush3.msra.mxu0 %v2279_v24 }
 0x394   :  { %3191 = vmatprep.subr.mxu0 %v3218_v40 }
 0x395   :  { %3192 = vmatpush3.msra.mxu0 %v2278_v7 }
 0x396   :  { %3193 = vmatprep.subr.mxu0 %v3218_v40 }
 0x397   :  { %3194 = vmatpush3.msra.mxu0 %v2277_v59  ;;  %v2584_v61 = vpop.f32.mrf.mxu1 }
 0x398   :  { %3195 = vmatprep.subr.mxu0 %v3218_v40 }
 0x399   :  { %3196 = vmatpush3.msra.mxu0 %v2276_v60  ;;  %v3155_v37 = vpop.f32.mrf.mxu1 }
 0x39a   :  { %3197 = vmatprep.subr.mxu0 %v3218_v40 }
 0x39b   :  { %3198 = vmatpush3.msra.mxu0 %v2275_v9 }
 0x39c   :  { %3199 = vmatprep.subr.mxu0 %v3218_v40 }
 0x39d   :  { %3200 = vmatpush3.msra.mxu0 %v2274_v3 }
 0x39e   :  { %3201 = vmatprep.subr.mxu0 %v3218_v40 }
 0x39f   :  { %3202 = vmatpush3.msra.mxu0 %v2273_v1 }
 0x3a0   :  { %3203 = vmatprep.subr.mxu0 %v3218_v40 }
 0x3a1   :  { %3204 = vmatpush3.msra.mxu0 %v2272_v32 }
 0x3a2   :  { %3206 = vmatmul.mubr.f32.vlgmr.msra.gmra.mxu0 %v2137_v49 }
 0x3a5   :  { %v2657_v14 = vpop.f32.mrf.mxu1 }
 0x3a6   :  { %v2658_v2 = vadd.f32 %v2657_v14, %v2584_v61 }
 0x3a7   :  { %v3172_v57 = vpop.f32.mrf.mxu1 }
 0x442   :  { %v2506_v11 = vpop.f32.mrf.mxu0 }
 0x443   :  { %v2510_v48 = vadd.f32 %v2506_v11, %v2437_v58 }
 0x444   :  { %v3136_v13 = vpop.f32.mrf.mxu0 }
 0x445   :  { %v2517_v33 = vadd.f32 %v2796_v23, %v2510_v48 }
 0x462   :  { %v2727_v16 = vpop.f32.mrf.mxu0 }
 0x463   :  { %v2731_v62 = vadd.f32 %v2727_v16, %v2658_v2 }
 0x464   :  { %v3207_v20 = vpop.f32.mrf.mxu0 }
 0x465   :  { %v2738_v5 = vadd.f32 %v2800_v12, %v2731_v62 }
 0x467   :  { %v2801_v22 = vmul.f32 -1.442695, %v2738_v5 }
 0x469   :  { %3213 = vpow2.f32 %v2801_v22 }
 0x476   :  { %v3214_v40 = vpop.eup %3213 }
 0x477   :  { %v2742_v29 = vadd.f32 1.0, %v3214_v40 }
 0x479   :  { %3215 = vrcp.f32 %v2742_v29 }
 0x486   :  { %v3216_v34 = vpop.eup %3215 }
 0x487   :  { %v2745_v30 = vmul.f32 %v3216_v34, %v2517_v33 }
 0x489   :  { %2747 = vst.msk [vmem:[%s4564_s21] sm:$0xff] %vm2746_vm0, %v2745_v30 }

// kernel: multi_source_encoder.3
= control target key start
LH: loop header
LB: loop body
LE: loop exit
PB: predicated region body
PF: predicated region fallthrough
CT: control target
= control target key end

     0   :  { %s5760_s0 = inlined_call_operand.vmem [shape: f32[8,32], index: 0, kind: input, shape index: {}]   ;;  %s5761_s1 = inlined_call_operand.vmem [shape: f32[8,8], index: 1, kind: input, shape index: {}]   ;;  %s5762_s2 = inlined_call_operand.vmem [shape: f32[2,8], index: 2, kind: input, shape index: {}]   ;;  %s5763_s3 = inlined_call_operand.vmem [shape: f32[4,32,64], index: 3, kind: input, shape index: {}]   ;;  %s5764_s4 = inlined_call_operand.vmem [shape: f32[4,1,64], index: 4, kind: input, shape index: {}]   ;;  %s5765_s5 = inlined_call_operand.vmem [shape: f32[4,32,64], index: 5, kind: input, shape index: {}]   ;;  %s5766_s6 = inlined_call_operand.vmem [shape: f32[4,1,64], index: 6, kind: input, shape index: {}]   ;;  %s5767_s7 = inlined_call_operand.vmem [shape: f32[4,1,64], index: 7, kind: input, shape index: {}]   ;;  %s5768_s8 = inlined_call_operand.vmem [shape: f32[4,64,128], index: 8, kind: input, shape index: {}]   ;;  %s5769_s9 = inlined_call_operand.vmem [shape: f32[4,1,128], index: 9, kind: input, shape index: {}]   ;;  %s5770_s10 = inlined_call_operand.vmem [shape: f32[4,64,128], index: 10, kind: input, shape index: {}]   ;;  %s5771_s11 = inlined_call_operand.vmem [shape: f32[4,1,128], index: 11, kind: input, shape index: {}]   ;;  %s5772_s12 = inlined_call_operand.vmem [shape: f32[4,1,128], index: 12, kind: input, shape index: {}]   ;;  %s5773_s13 = inlined_call_operand.vmem [shape: f32[128,1], index: 13, kind: input, shape index: {}]   ;;  %s5774_s14 = inlined_call_operand.<no memory space> [shape: f32[1,1], index: 14, kind: input, shape index: {}]   ;;  %s5775_s15 = inlined_call_operand.hbm [shape: f32[2,128], index: 15, kind: output, shape index: {}]  }
   0x1   :  { %v20_v0 = vstv %s5774_s14 }
   0x2   :  { %21 = vst [vmem:[#allocation2] sm:$0x1] %v20_v0 }
   0x3   :  { %v58_v1 = vld [vmem:[%s5763_s3 + $0x18] sm:$0xff]  ;;  %v4613_v2 = vmov 0.0   ;;  %v57_v3 = vld [vmem:[%s5763_s3 + $0x10] sm:$0xff]  ;;  %vm5776_vm0 = vmmov 0   ;;  %v56_v4 = vld [vmem:[%s5763_s3 + $0x8] sm:$0xff] }
   0x4   :  { %4221 = vmatprep.subr.mxu1 %v4613_v2  ;;  %4229 = vmatprep.mubr.msk.f32.mxu1 %vm5776_vm0, %v4613_v2 }
   0x5   :  { %4222 = vmatpush3.msra.mxu1 %v58_v1  ;;  %4259 = vmatprep.subr.mxu0 %v4613_v2 }
   0x6   :  { %4223 = vmatprep.subr.mxu1 %v4613_v2  ;;  %4267 = vmatprep.mubr.msk.f32.mxu0 %vm5776_vm0, %v4613_v2 }
   0x7   :  { %22 = vsyncpa [#allocation4], 0  ;;  %4224 = vmatpush3.msra.mxu1 %v57_v3  ;;  %v55_v5 = vld [vmem:[%s5763_s3] sm:$0xff]  ;;  %vm5778_vm1 = vcmask 261120   ;;  %v78_v7 = vld [vmem:[%s5765_s5 + $0x18] sm:$0xff]  ;;  %v260_v11 = vlaneseq  ;;  %vm391_vm2 = vcmask 523264  }
   0x8   :  { %4225 = vmatprep.subr.mxu1 %v4613_v2  ;;  %v4724_v6 = vld [vmem:[%s5760_s0] sm:$0xff]  ;;  %v77_v8 = vld [vmem:[%s5765_s5 + $0x10] sm:$0xff]  ;;  %v76_v9 = vld [vmem:[%s5765_s5 + $0x8] sm:$0xff]  ;;  %v4615_v16 = vmov 1966171168   ;;  %vm459_vm11 = vcmask 1041409  }
   0x9   :  { %4226 = vmatpush3.msra.mxu1 %v56_v4  ;;  %v75_v10 = vld [vmem:[%s5765_s5] sm:$0xff]  ;;  %v261_v12 = vshrl.u32 %v260_v11, 7  ;;  %v426_v13 = vand.u32 127, %v260_v11  ;;  %v258_v17 = vunpack.c.l.s4 %v4615_v16  ;;  %vm461_vm12 = vcmask 1042434  }
   0xa   :  { %4227 = vmatprep.subr.mxu1 %v4613_v2  ;;  %v4021_v15 = vld [vmem:[%s5764_s4] ss:$0 sm:$0xff]  ;;  %vm463_vm13 = vcmask 1043459   ;;  %vm465_vm14 = vcmask 1044484   ;;  %vm467_vm15 = vcmask 1045509  }
   0xb   :  { %4228 = vmatpush3.msra.mxu1 %v55_v5  ;;  %v4752_v14 = vsub.s32 %v426_v13, %v261_v12  ;;  %v259_v21 = vunpack.c.0.s8 %v258_v17  ;;  %v4023_v22 = vld [vmem:[%s5766_s6] ss:$0 sm:$0xff]  ;;  %v4767_v29 = vsub.s32 0, %v261_v12 }
   0xc   :  { %4230 = vmatmul.mubr.msk.f32.vlgmr.msra.gmra.mxu1 %vm5778_vm1, %v4724_v6  ;;  %4232 = vmatprep.subr.mxu1 %v4613_v2  ;;  %v4025_v49 = vld [vmem:[%s5767_s7] ss:$0 sm:$0xff] }
   0xd   :  { %4233 = vmatpush3.msra.mxu1 %v78_v7  ;;  %4240 = vmatprep.mubr.msk.f32.mxu1 %vm5776_vm0, %v4613_v2  ;;  %v4764_v23 = vsub.s32 %v259_v21, %v261_v12 }
   0xe   :  { %4234 = vmatprep.subr.mxu1 %v4613_v2 }
   0xf   :  { %4235 = vmatpush3.msra.mxu1 %v77_v8 }
  0x10   :  { %4236 = vmatprep.subr.mxu1 %v4613_v2 }
  0x11   :  { %4237 = vmatpush3.msra.mxu1 %v76_v9 }
  0x12   :  { %4238 = vmatprep.subr.mxu1 %v4613_v2 }
  0x13   :  { %4239 = vmatpush3.msra.mxu1 %v75_v10 }
  0x14   :  { %4241 = vmatmul.mubr.msk.f32.vlgmr.msra.gmra.mxu1 %vm5778_vm1, %v4724_v6  ;;  %4243 = vmatprep.subr.mxu1 %v4613_v2 }
  0x15   :  { %4245 = vmatprep.mubr.msk.f32.mxu1 %vm5776_vm0, %v4613_v2 }
  0xcc   :  { %v175_v18 = vpop.f32.mrf.mxu1 }
  0xcd   :  { %v4757_v19 = vadd.f32 %v4021_v15, %v175_v18 }
  0xce   :  { %v4231_v20 = vpop.f32.mrf.mxu1 }
  0xcf   :  { %4244 = vmatpush3.msra.mxu1 %v4757_v19 }
  0xd0   :  { %4248 = vmatprep.subr.mxu1 %v4613_v2 }
  0xd4   :  { %v251_v24 = vpop.f32.mrf.mxu1 }
  0xd5   :  { %v252_v25 = vadd.f32 %v4023_v22, %v251_v24 }
  0xd6   :  { %v4242_v26 = vpop.f32.mrf.mxu1 }
  0xd7   :  { %v256_v27 = vcombine.high %v252_v25, %v252_v25  ;;  %v263_v28 = vrot.slane %v252_v25, %v4764_v23 }
  0xd9   :  { %v270_v30 = vrot.slane %v256_v27, %v4764_v23  ;;  %v271_v31 = vcombine.high %v263_v28, %v263_v28  ;;  %v279_v32 = vrot.slane %v263_v28, %v4764_v23 }
  0xdb   :  { %v272_v33 = vcombine.high %v270_v30, %v270_v30  ;;  %v286_v34 = vrot.slane %v270_v30, %v4764_v23  ;;  %v293_v35 = vrot.slane %v271_v31, %v4764_v23  ;;  %v301_v36 = vcombine.high %v279_v32, %v279_v32 }
  0xdc   :  { %v308_v37 = vrot.slane %v279_v32, %v4767_v29 }
  0xdd   :  { %v300_v38 = vrot.slane %v272_v33, %v4764_v23  ;;  %v303_v39 = vcombine.high %v293_v35, %v293_v35  ;;  %v312_v40 = vrot.slane %v293_v35, %v4767_v29  ;;  %v302_v41 = vcombine.high %v286_v34, %v286_v34 }
  0xde   :  { %v316_v42 = vrot.slane %v301_v36, %v4767_v29  ;;  %v324_v43 = vrot.slane %v286_v34, %v4767_v29  ;;  %v345_v44 = vadd.f32 %v308_v37, %v4757_v19 }
  0xdf   :  { %v304_v45 = vcombine.high %v300_v38, %v300_v38  ;;  %v346_v46 = vadd.f32 %v312_v40, %v4757_v19  ;;  %v320_v47 = vrot.slane %v303_v39, %v4767_v29  ;;  %v328_v48 = vrot.slane %v300_v38, %v4767_v29 }
  0xe0   :  { %vm353_vm3 = vcmp.ge.f32.partialorder %v345_v44, 0.0  ;;  %v361_v50 = vmul.f32 0.2, %v345_v44  ;;  %v347_v51 = vadd.f32 %v316_v42, %v4757_v19  ;;  %v349_v52 = vadd.f32 %v324_v43, %v4757_v19 }
  0xe1   :  { %vm354_vm4 = vcmp.ge.f32.partialorder %v346_v46, 0.0  ;;  %v362_v53 = vmul.f32 0.2, %v346_v46  ;;  %v348_v54 = vadd.f32 %v320_v47, %v4757_v19  ;;  %v350_v55 = vadd.f32 %v328_v48, %v4757_v19  ;;  %v4814_v48 = vld [vmem:[%s5761_s1] sm:$0xff] }
  0xe2   :  { %v369_v56 = vsel %vm353_vm3, %v345_v44, %v361_v50  ;;  %vm355_vm5 = vcmp.ge.f32.partialorder %v347_v51, 0.0  ;;  %v363_v57 = vmul.f32 0.2, %v347_v51  ;;  %vm357_vm6 = vcmp.ge.f32.partialorder %v349_v52, 0.0 }
  0xe3   :  { %v383_v58 = vmul.f32 %v4025_v49, %v369_v56  ;;  %v370_v59 = vsel %vm354_vm4, %v346_v46, %v362_v53  ;;  %vm356_vm7 = vcmp.ge.f32.partialorder %v348_v54, 0.0  ;;  %v364_v60 = vmul.f32 0.2, %v348_v54 }
  0xe4   :  { %v371_v61 = vsel %vm355_vm5, %v347_v51, %v363_v57  ;;  %v384_v62 = vmul.f32 %v4025_v49, %v370_v59  ;;  %v365_v63 = vmul.f32 0.2, %v349_v52  ;;  %vm358_vm8 = vcmp.ge.f32.partialorder %v350_v55, 0.0 }
  0xe5   :  { %v392_v0 = vsel %vm391_vm2, %v383_v58, 0.0  ;;  %v385_v1 = vmul.f32 %v4025_v49, %v371_v61  ;;  %v372_v3 = vsel %vm356_vm7, %v348_v54, %v364_v60  ;;  %v366_v4 = vmul.f32 0.2, %v350_v55 }
  0xe6   :  { %393 = vadd.xlane.f32.xlu0 %v392_v0  ;;  %v373_v5 = vsel %vm357_vm6, %v349_v52, %v365_v63  ;;  %v332_v7 = vrot.slane %v302_v41, %v4767_v29  ;;  %v386_v9 = vmul.f32 %v4025_v49, %v372_v3  ;;  %v336_v10 = vrot.slane %v304_v45, %v4767_v29  ;;  %v82_v63 = vld [vmem:[%s5765_s5 + $0x38] sm:$0xff]  ;;  %v81_v0 = vld [vmem:[%s5765_s5 + $0x30] sm:$0xff]  ;;  %v79_v3 = vld [vmem:[%s5765_s5 + $0x20] sm:$0xff] }
  0xe7   :  { %v398_v8 = vsel %vm391_vm2, %v385_v1, 0.0  ;;  %v374_v11 = vsel %vm358_vm8, %v350_v55, %v366_v4  ;;  %v395_v13 = vsel %vm391_vm2, %v384_v62, 0.0  ;;  %v387_v15 = vmul.f32 %v4025_v49, %v373_v5  ;;  %4260 = vmatpush3.msra.mxu0 %v82_v63  ;;  %v80_v1 = vld [vmem:[%s5765_s5 + $0x28] sm:$0xff] }
  0xe8   :  { %399 = vadd.xlane.f32.xlu1 %v398_v8  ;;  %v351_v12 = vadd.f32 %v332_v7, %v4757_v19  ;;  %v352_v16 = vadd.f32 %v336_v10, %v4757_v19  ;;  %v401_v18 = vsel %vm391_vm2, %v386_v9, 0.0  ;;  %v388_v20 = vmul.f32 %v4025_v49, %v374_v11  ;;  %4261 = vmatprep.subr.mxu0 %v4613_v2  ;;  %v62_v9 = vld [vmem:[%s5763_s3 + $0x38] sm:$0xff]  ;;  %v61_v10 = vld [vmem:[%s5763_s3 + $0x30] sm:$0xff]  ;;  %v60_v11 = vld [vmem:[%s5763_s3 + $0x28] sm:$0xff] }
  0xe9   :  { %v404_v24 = vsel %vm391_vm2, %v387_v15, 0.0  ;;  %vm469_vm3 = vcmask 1046534   ;;  %vm471_vm4 = vcmask 1047559   ;;  %vm416_vm5 = vcmp.gt.f32.partialorder %v4814_v48, 0.0  ;;  %4262 = vmatpush3.msra.mxu0 %v81_v0 }
  0xea   :  { %396 = vadd.xlane.f32.xlu0 %v395_v13  ;;  %vm359_vm9 = vcmp.ge.f32.partialorder %v351_v12, 0.0  ;;  %v367_v17 = vmul.f32 0.2, %v351_v12  ;;  %vm360_vm10 = vcmp.ge.f32.partialorder %v352_v16, 0.0  ;;  %v368_v21 = vmul.f32 0.2, %v352_v16  ;;  %4263 = vmatprep.subr.mxu0 %v4613_v2 }
  0xeb   :  { %v407_v27 = vsel %vm391_vm2, %v388_v20, 0.0  ;;  %vm5779_vm6 = vcmask 64512   ;;  %4264 = vmatpush3.msra.mxu0 %v80_v1 }
  0xec   :  { %402 = vadd.xlane.f32.xlu1 %v401_v18  ;;  %v375_v22 = vsel %vm359_vm9, %v351_v12, %v367_v17  ;;  %v376_v26 = vsel %vm360_vm10, %v352_v16, %v368_v21  ;;  %4265 = vmatprep.subr.mxu0 %v4613_v2  ;;  %v59_v12 = vld [vmem:[%s5763_s3 + $0x20] sm:$0xff] }
  0xed   :  { %v389_v25 = vmul.f32 %v4025_v49, %v375_v22  ;;  %v390_v28 = vmul.f32 %v4025_v49, %v376_v26  ;;  %4266 = vmatpush3.msra.mxu0 %v79_v3  ;;  %v4029_v16 = vld [vmem:[%s5766_s6 + $0x1] ss:$0 sm:$0xff] }
  0xee   :  { %405 = vadd.xlane.f32.xlu0 %v404_v24  ;;  %4268 = vmatmul.mubr.msk.f32.vlgmr.msra.gmra.mxu0 %vm5778_vm1, %v4724_v6 }
  0xef   :  { %v410_v19 = vsel %vm391_vm2, %v389_v25, 0.0  ;;  %v413_v30 = vsel %vm391_vm2, %v390_v28, 0.0  ;;  %4275 = vmatprep.subr.mxu0 %v4613_v2  ;;  %4283 = vmatprep.mubr.msk.f32.mxu0 %vm5776_vm0, %v4613_v2 }
  0xf0   :  { %408 = vadd.xlane.f32.xlu1 %v407_v27 }
  0xf2   :  { %411 = vadd.xlane.f32.xlu0 %v410_v19 }
  0xf4   :  { %414 = vadd.xlane.f32.xlu1 %v413_v30 }
 0x16f   :  { %v394_v31 = vpop.xlane.xlu0 %393 }
 0x170   :  { %v430_v34 = vrot.slane %v394_v31, %v4752_v14 }
 0x171   :  { %v400_v32 = vpop.xlane.xlu1 %399 }
 0x172   :  { %v438_v36 = vrot.slane %v400_v32, %v4752_v14 }
 0x173   :  { %v397_v33 = vpop.xlane.xlu0 %396 }
 0x174   :  { %v434_v35 = vrot.slane %v397_v33, %v4752_v14 }
 0x175   :  { %v403_v37 = vpop.xlane.xlu1 %402 }
 0x176   :  { %v460_v38 = vsel %vm459_vm11, %v434_v35, %v430_v34  ;;  %v442_v39 = vrot.slane %v403_v37, %v4752_v14  ;;  %v4027_v35 = vld [vmem:[%s5764_s4 + $0x1] ss:$0 sm:$0xff] }
 0x177   :  { %v462_v40 = vsel %vm461_vm12, %v438_v36, %v460_v38  ;;  %v406_v41 = vpop.xlane.xlu0 %405 }
 0x178   :  { %v464_v42 = vsel %vm463_vm13, %v442_v39, %v462_v40  ;;  %v446_v43 = vrot.slane %v406_v41, %v4752_v14 }
 0x179   :  { %v409_v44 = vpop.xlane.xlu1 %408 }
 0x17a   :  { %v466_v45 = vsel %vm465_vm14, %v446_v43, %v464_v42  ;;  %v450_v46 = vrot.slane %v409_v44, %v4752_v14 }
 0x17b   :  { %v412_v47 = vpop.xlane.xlu0 %411 }
 0x17c   :  { %v468_v49 = vsel %vm467_vm15, %v450_v46, %v466_v45  ;;  %v454_v50 = vrot.slane %v412_v47, %v4752_v14 }
 0x17d   :  { %v415_v51 = vpop.xlane.xlu1 %414 }
 0x17e   :  { %v458_v52 = vrot.slane %v415_v51, %v4752_v14  ;;  %v470_v53 = vsel %vm469_vm3, %v454_v50, %v468_v49 }
 0x180   :  { %v472_v54 = vsel %vm471_vm4, %v458_v52, %v470_v53  ;;  %v4031_v52 = vld [vmem:[%s5767_s7 + $0x1] ss:$0 sm:$0xff] }
 0x181   :  { %v474_v55 = vsel %vm416_vm5, %v472_v54, -1e+30 }
 0x182   :  { %v476_v56 = vsel %vm5779_vm6, %v474_v55, -inf }
 0x183   :  { %477 = vmax.xlane.f32.xlu0 %v476_v56 }
 0x1ae   :  { %v710_v13 = vpop.f32.mrf.mxu0 }
 0x1af   :  { %v711_v17 = vadd.f32 %v4029_v16, %v710_v13 }
 0x1b0   :  { %v4269_v15 = vpop.f32.mrf.mxu0 }
 0x1b1   :  { %v715_v18 = vcombine.high %v711_v17, %v711_v17  ;;  %v722_v20 = vrot.slane %v711_v17, %v4764_v23 }
 0x1b3   :  { %v729_v21 = vrot.slane %v715_v18, %v4764_v23  ;;  %v730_v22 = vcombine.high %v722_v20, %v722_v20  ;;  %v738_v25 = vrot.slane %v722_v20, %v4764_v23 }
 0x1b5   :  { %v731_v24 = vcombine.high %v729_v21, %v729_v21  ;;  %v752_v26 = vrot.slane %v730_v22, %v4764_v23  ;;  %v745_v27 = vrot.slane %v729_v21, %v4764_v23  ;;  %v760_v31 = vcombine.high %v738_v25, %v738_v25 }
 0x1b6   :  { %v767_v36 = vrot.slane %v738_v25, %v4767_v29 }
 0x1b7   :  { %v759_v28 = vrot.slane %v731_v24, %v4764_v23  ;;  %v762_v32 = vcombine.high %v752_v26, %v752_v26  ;;  %v761_v33 = vcombine.high %v745_v27, %v745_v27  ;;  %v771_v37 = vrot.slane %v752_v26, %v4767_v29 }
 0x1b8   :  { %v775_v38 = vrot.slane %v760_v31, %v4767_v29  ;;  %v783_v40 = vrot.slane %v745_v27, %v4767_v29 }
 0x1b9   :  { %v763_v34 = vcombine.high %v759_v28, %v759_v28  ;;  %v779_v39 = vrot.slane %v762_v32, %v4767_v29  ;;  %v787_v42 = vrot.slane %v759_v28, %v4767_v29  ;;  %v791_v44 = vrot.slane %v761_v33, %v4767_v29 }
 0x1bb   :  { %v795_v43 = vrot.slane %v763_v34, %v4767_v29 }
 0x20c   :  { %v478_v57 = vpop.xlane.xlu0 %477 }
 0x20d   :  { %v479_v58 = vsub.f32 %v474_v55, %v478_v57 }
 0x20f   :  { %v480_v59 = vmul.f32 1.442695, %v479_v58 }
 0x211   :  { %4553 = vpow2.f32 %v480_v59 }
 0x21e   :  { %v4554_v60 = vpop.eup %4553 }
 0x21f   :  { %v482_v61 = vmul.f32 %v4554_v60, %v4814_v48 }
 0x221   :  { %v483_v62 = vsel %vm5779_vm6, %v482_v61, 0.0 }
 0x222   :  { %484 = vadd.xlane.f32.xlu1 %v483_v62 }
 0x2ab   :  { %v485_v4 = vpop.xlane.xlu1 %484 }
 0x2ac   :  { %v486_v5 = vmax.f32 %v485_v4, 1e-30 }
 0x2ae   :  { %4555 = vrcp.f32 %v486_v5 }
 0x2bb   :  { %v4556_v7 = vpop.eup %4555 }
 0x2bc   :  { %v488_v8 = vmul.f32 %v4556_v7, %v482_v61 }
 0x2be   :  { %4246 = vmatmul.mubr.msk.f32.vlgmr.msra.gmra.mxu1 %vm5779_vm6, %v488_v8 }
 0x2bf   :  { %4249 = vmatpush3.msra.mxu1 %v62_v9  ;;  %4256 = vmatprep.mubr.msk.f32.mxu1 %vm5776_vm0, %v4613_v2 }
 0x2c0   :  { %4250 = vmatprep.subr.mxu1 %v4613_v2 }
 0x2c1   :  { %4251 = vmatpush3.msra.mxu1 %v61_v10 }
 0x2c2   :  { %4252 = vmatprep.subr.mxu1 %v4613_v2 }
 0x2c3   :  { %4253 = vmatpush3.msra.mxu1 %v60_v11 }
 0x2c4   :  { %4254 = vmatprep.subr.mxu1 %v4613_v2 }
 0x2c5   :  { %4255 = vmatpush3.msra.mxu1 %v59_v12 }
 0x2c6   :  { %4257 = vmatmul.mubr.msk.f32.vlgmr.msra.gmra.mxu1 %vm5778_vm1, %v4724_v6  ;;  %4270 = vmatprep.subr.mxu1 %v4613_v2 }
 0x2c7   :  { %4272 = vmatprep.mubr.msk.f32.mxu1 %vm5776_vm0, %v4613_v2 }
 0x37e   :  { %v4879_v19 = vpop.f32.mrf.mxu1 }
 0x380   :  { %v4247_v30 = vpop.f32.mrf.mxu1 }
 0x386   :  { %v634_v41 = vpop.f32.mrf.mxu1 }
 0x387   :  { %v635_v45 = vadd.f32 %v4027_v35, %v634_v41 }
 0x388   :  { %v4258_v46 = vpop.f32.mrf.mxu1 }
 0x389   :  { %4271 = vmatpush3.msra.mxu1 %v635_v45  ;;  %v805_v47 = vadd.f32 %v771_v37, %v635_v45  ;;  %v804_v49 = vadd.f32 %v767_v36, %v635_v45  ;;  %v807_v50 = vadd.f32 %v779_v39, %v635_v45  ;;  %v806_v51 = vadd.f32 %v775_v38, %v635_v45 }
 0x38a   :  { %v809_v53 = vadd.f32 %v787_v42, %v635_v45  ;;  %v808_v54 = vadd.f32 %v783_v40, %v635_v45  ;;  %v811_v55 = vadd.f32 %v795_v43, %v635_v45  ;;  %v810_v56 = vadd.f32 %v791_v44, %v635_v45  ;;  %4286 = vmatprep.subr.mxu1 %v4613_v2 }
 0x38b   :  { %vm813_vm7 = vcmp.ge.f32.partialorder %v805_v47, 0.0  ;;  %v821_v57 = vmul.f32 0.2, %v805_v47  ;;  %vm812_vm8 = vcmp.ge.f32.partialorder %v804_v49, 0.0  ;;  %v820_v58 = vmul.f32 0.2, %v804_v49 }
 0x38c   :  { %vm815_vm9 = vcmp.ge.f32.partialorder %v807_v50, 0.0  ;;  %v823_v59 = vmul.f32 0.2, %v807_v50  ;;  %vm814_vm10 = vcmp.ge.f32.partialorder %v806_v51, 0.0  ;;  %v822_v60 = vmul.f32 0.2, %v806_v51 }
 0x38d   :  { %v829_v61 = vsel %vm813_vm7, %v805_v47, %v821_v57  ;;  %v828_v62 = vsel %vm812_vm8, %v804_v49, %v820_v58  ;;  %vm817_vm0 = vcmp.ge.f32.partialorder %v809_v53, 0.0  ;;  %v825_v63 = vmul.f32 0.2, %v809_v53 }
 0x38e   :  { %v843_v0 = vmul.f32 %v4031_v52, %v829_v61  ;;  %v842_v1 = vmul.f32 %v4031_v52, %v828_v62  ;;  %v831_v3 = vsel %vm815_vm9, %v807_v50, %v823_v59  ;;  %v830_v4 = vsel %vm814_vm10, %v806_v51, %v822_v60 }
 0x38f   :  { %v845_v5 = vmul.f32 %v4031_v52, %v831_v3  ;;  %vm816_vm1 = vcmp.ge.f32.partialorder %v808_v54, 0.0  ;;  %v844_v9 = vmul.f32 %v4031_v52, %v830_v4  ;;  %v824_v10 = vmul.f32 0.2, %v808_v54  ;;  %v63_v3 = vld [vmem:[%s5763_s3 + $0x40] sm:$0xff] }
 0x390   :  { %v853_v7 = vsel %vm391_vm2, %v843_v0, 0.0  ;;  %v850_v8 = vsel %vm391_vm2, %v842_v1, 0.0  ;;  %v833_v11 = vsel %vm817_vm0, %v809_v53, %v825_v63  ;;  %v827_v12 = vmul.f32 0.2, %v811_v55  ;;  %v66_v63 = vld [vmem:[%s5763_s3 + $0x58] sm:$0xff]  ;;  %v65_v0 = vld [vmem:[%s5763_s3 + $0x50] sm:$0xff] }
 0x391   :  { %854 = vadd.xlane.f32.xlu1 %v853_v7  ;;  %851 = vadd.xlane.f32.xlu0 %v850_v8  ;;  %v832_v13 = vsel %vm816_vm1, %v808_v54, %v824_v10  ;;  %vm819_vm7 = vcmp.ge.f32.partialorder %v811_v55, 0.0  ;;  %vm818_vm8 = vcmp.ge.f32.partialorder %v810_v56, 0.0  ;;  %v826_v15 = vmul.f32 0.2, %v810_v56  ;;  %v64_v1 = vld [vmem:[%s5763_s3 + $0x48] sm:$0xff]  ;;  %v85_v10 = vld [vmem:[%s5765_s5 + $0x50] sm:$0xff] }
 0x392   :  { %v859_v16 = vsel %vm391_vm2, %v845_v5, 0.0  ;;  %v856_v17 = vsel %vm391_vm2, %v844_v9, 0.0  ;;  %v847_v18 = vmul.f32 %v4031_v52, %v833_v11  ;;  %v846_v20 = vmul.f32 %v4031_v52, %v832_v13  ;;  %4276 = vmatpush3.msra.mxu0 %v66_v63  ;;  %v86_v9 = vld [vmem:[%s5765_s5 + $0x58] sm:$0xff]  ;;  %v84_v11 = vld [vmem:[%s5765_s5 + $0x48] sm:$0xff]  ;;  %v4033_v13 = vld [vmem:[%s5764_s4 + $0x2] ss:$0 sm:$0xff] }
 0x393   :  { %v835_v21 = vsel %vm819_vm7, %v811_v55, %v827_v12  ;;  %v834_v22 = vsel %vm818_vm8, %v810_v56, %v826_v15  ;;  %4277 = vmatprep.subr.mxu0 %v4613_v2  ;;  %vm5780_vm0 = vcmask 261120   ;;  %vm5781_vm1 = vmmov 0   ;;  %v83_v12 = vld [vmem:[%s5765_s5 + $0x40] sm:$0xff] }
 0x394   :  { %v865_v24 = vsel %vm391_vm2, %v847_v18, 0.0  ;;  %v862_v25 = vsel %vm391_vm2, %v846_v20, 0.0  ;;  %v849_v26 = vmul.f32 %v4031_v52, %v835_v21  ;;  %v848_v27 = vmul.f32 %v4031_v52, %v834_v22  ;;  %4278 = vmatpush3.msra.mxu0 %v65_v0  ;;  %vm5782_vm9 = vmmov %vm5780_vm0  ;;  %v4035_v21 = vld [vmem:[%s5766_s6 + $0x2] ss:$0 sm:$0xff] }
 0x395   :  { %860 = vadd.xlane.f32.xlu1 %v859_v16  ;;  %857 = vadd.xlane.f32.xlu0 %v856_v17 }
 0x396   :  { %v871_v28 = vsel %vm391_vm2, %v849_v26, 0.0  ;;  %v868_v30 = vsel %vm391_vm2, %v848_v27, 0.0  ;;  %4279 = vmatprep.subr.mxu0 %v4613_v2 }
 0x397   :  { %4280 = vmatpush3.msra.mxu0 %v64_v1 }
 0x398   :  { %4281 = vmatprep.subr.mxu0 %v4613_v2 }
 0x399   :  { %866 = vadd.xlane.f32.xlu1 %v865_v24  ;;  %863 = vadd.xlane.f32.xlu0 %v862_v25 }
 0x39a   :  { %4282 = vmatpush3.msra.mxu0 %v63_v3 }
 0x39b   :  { %4284 = vmatmul.mubr.msk.f32.vlgmr.msra.gmra.mxu0 %vm5780_vm0, %v4724_v6  ;;  %4297 = vmatprep.subr.mxu0 %v4613_v2 }
 0x39c   :  { %4299 = vmatprep.mubr.msk.f32.mxu0 %vm5781_vm1, %v4613_v2 }
 0x39d   :  { %872 = vadd.xlane.f32.xlu1 %v871_v28  ;;  %869 = vadd.xlane.f32.xlu0 %v868_v30 }
 0x41a   :  { %v855_v31 = vpop.xlane.xlu1 %854  ;;  %v852_v32 = vpop.xlane.xlu0 %851 }
 0x41b   :  { %v889_v33 = vrot.slane %v855_v31, %v4752_v14  ;;  %v885_v34 = vrot.slane %v852_v32, %v4752_v14 }
 0x41d   :  { %v914_v38 = vsel %vm459_vm11, %v889_v33, %v885_v34 }
 0x41e   :  { %v861_v35 = vpop.xlane.xlu1 %860  ;;  %v858_v36 = vpop.xlane.xlu0 %857 }
 0x41f   :  { %v893_v37 = vrot.slane %v858_v36, %v4752_v14  ;;  %v897_v39 = vrot.slane %v861_v35, %v4752_v14 }
 0x421   :  { %v915_v40 = vsel %vm461_vm12, %v893_v37, %v914_v38 }
 0x422   :  { %v867_v41 = vpop.xlane.xlu1 %866  ;;  %v864_v42 = vpop.xlane.xlu0 %863  ;;  %v916_v45 = vsel %vm463_vm13, %v897_v39, %v915_v40 }
 0x423   :  { %v901_v43 = vrot.slane %v864_v42, %v4752_v14  ;;  %v905_v44 = vrot.slane %v867_v41, %v4752_v14 }
 0x425   :  { %v917_v46 = vsel %vm465_vm14, %v901_v43, %v916_v45 }
 0x426   :  { %v873_v47 = vpop.xlane.xlu1 %872  ;;  %v870_v49 = vpop.xlane.xlu0 %869  ;;  %v918_v52 = vsel %vm467_vm15, %v905_v44, %v917_v46 }
 0x427   :  { %v913_v50 = vrot.slane %v873_v47, %v4752_v14  ;;  %v909_v51 = vrot.slane %v870_v49, %v4752_v14  ;;  %v4037_v49 = vld [vmem:[%s5767_s7 + $0x2] ss:$0 sm:$0xff] }
 0x429   :  { %v919_v53 = vsel %vm469_vm3, %v909_v51, %v918_v52 }
 0x42a   :  { %v920_v54 = vsel %vm471_vm4, %v913_v50, %v919_v53 }
 0x42b   :  { %v922_v55 = vsel %vm416_vm5, %v920_v54, -1e+30 }
 0x42c   :  { %v923_v56 = vsel %vm5779_vm6, %v922_v55, -inf }
 0x42d   :  { %924 = vmax.xlane.f32.xlu0 %v923_v56 }
 0x45b   :  { %v1082_v15 = vpop.f32.mrf.mxu0 }
 0x45c   :  { %v4970_v16 = vadd.f32 %v4033_v13, %v1082_v15 }
 0x45d   :  { %v4285_v17 = vpop.f32.mrf.mxu0 }
 0x45e   :  { %4298 = vmatpush3.msra.mxu0 %v4970_v16 }
 0x45f   :  { %4313 = vmatprep.subr.mxu0 %v4613_v2 }
 0x4b6   :  { %v925_v57 = vpop.xlane.xlu0 %924 }
 0x4b7   :  { %v926_v58 = vsub.f32 %v922_v55, %v925_v57 }
 0x4b9   :  { %v927_v59 = vmul.f32 1.442695, %v926_v58 }
 0x4bb   :  { %4557 = vpow2.f32 %v927_v59 }
 0x4c8   :  { %v4558_v60 = vpop.eup %4557 }
 0x4c9   :  { %v929_v61 = vmul.f32 %v4558_v60, %v4814_v48 }
 0x4cb   :  { %v930_v62 = vsel %vm5779_vm6, %v929_v61, 0.0 }
 0x4cc   :  { %931 = vadd.xlane.f32.xlu1 %v930_v62 }
 0x555   :  { %v932_v4 = vpop.xlane.xlu1 %931 }
 0x556   :  { %v933_v5 = vmax.f32 %v932_v4, 1e-30 }
 0x558   :  { %4559 = vrcp.f32 %v933_v5 }
 0x565   :  { %v4560_v7 = vpop.eup %4559 }
 0x566   :  { %v935_v8 = vmul.f32 %v4560_v7, %v929_v61 }
 0x568   :  { %4273 = vmatmul.mubr.msk.f32.vlgmr.msra.gmra.mxu1 %vm5779_vm6, %v935_v8 }
 0x569   :  { %4287 = vmatpush3.msra.mxu1 %v86_v9  ;;  %4294 = vmatprep.mubr.msk.f32.mxu1 %vm5781_vm1, %v4613_v2 }
 0x56a   :  { %4288 = vmatprep.subr.mxu1 %v4613_v2 }
 0x56b   :  { %4289 = vmatpush3.msra.mxu1 %v85_v10 }
 0x56c   :  { %4290 = vmatprep.subr.mxu1 %v4613_v2 }
 0x56d   :  { %4291 = vmatpush3.msra.mxu1 %v84_v11 }
 0x56e   :  { %4292 = vmatprep.subr.mxu1 %v4613_v2 }
 0x56f   :  { %4293 = vmatpush3.msra.mxu1 %v83_v12 }
 0x570   :  { %4295 = vmatmul.mubr.msk.f32.vlgmr.msra.gmra.mxu1 %vm5782_vm9, %v4724_v6  ;;  %4302 = vmatprep.subr.mxu1 %v4613_v2 }
 0x571   :  { %4310 = vmatprep.mubr.msk.f32.mxu1 %vm5781_vm1, %v4613_v2 }
 0x628   :  { %v4974_v18 = vpop.f32.mrf.mxu1 }
 0x62a   :  { %v4274_v20 = vpop.f32.mrf.mxu1 }
 0x630   :  { %v1158_v22 = vpop.f32.mrf.mxu1 }
 0x631   :  { %v1159_v24 = vadd.f32 %v4035_v21, %v1158_v22 }
 0x632   :  { %v4296_v25 = vpop.f32.mrf.mxu1 }
 0x633   :  { %v1163_v26 = vcombine.high %v1159_v24, %v1159_v24  ;;  %v1170_v27 = vrot.slane %v1159_v24, %v4764_v23 }
 0x635   :  { %v1177_v28 = vrot.slane %v1163_v26, %v4764_v23  ;;  %v1178_v30 = vcombine.high %v1170_v27, %v1170_v27  ;;  %v1186_v31 = vrot.slane %v1170_v27, %v4764_v23 }
 0x637   :  { %v1179_v32 = vcombine.high %v1177_v28, %v1177_v28  ;;  %v1193_v33 = vrot.slane %v1177_v28, %v4764_v23  ;;  %v1200_v34 = vrot.slane %v1178_v30, %v4764_v23  ;;  %v1208_v35 = vcombine.high %v1186_v31, %v1186_v31 }
 0x638   :  { %v1215_v36 = vrot.slane %v1186_v31, %v4767_v29 }
 0x639   :  { %v1207_v37 = vrot.slane %v1179_v32, %v4764_v23  ;;  %v1210_v38 = vcombine.high %v1200_v34, %v1200_v34  ;;  %v1219_v39 = vrot.slane %v1200_v34, %v4767_v29  ;;  %v1209_v40 = vcombine.high %v1193_v33, %v1193_v33 }
 0x63a   :  { %v1223_v41 = vrot.slane %v1208_v35, %v4767_v29  ;;  %v1231_v42 = vrot.slane %v1193_v33, %v4767_v29  ;;  %v1252_v43 = vadd.f32 %v1215_v36, %v4970_v16 }
 0x63b   :  { %v1211_v44 = vcombine.high %v1207_v37, %v1207_v37  ;;  %v1253_v45 = vadd.f32 %v1219_v39, %v4970_v16  ;;  %v1227_v46 = vrot.slane %v1210_v38, %v4767_v29  ;;  %v1235_v47 = vrot.slane %v1207_v37, %v4767_v29 }
 0x63c   :  { %vm1260_vm10 = vcmp.ge.f32.partialorder %v1252_v43, 0.0  ;;  %v1268_v50 = vmul.f32 0.2, %v1252_v43  ;;  %v1254_v51 = vadd.f32 %v1223_v41, %v4970_v16  ;;  %v1256_v52 = vadd.f32 %v1231_v42, %v4970_v16 }
 0x63d   :  { %vm1261_vm7 = vcmp.ge.f32.partialorder %v1253_v45, 0.0  ;;  %v1269_v53 = vmul.f32 0.2, %v1253_v45  ;;  %v1255_v54 = vadd.f32 %v1227_v46, %v4970_v16  ;;  %v1257_v55 = vadd.f32 %v1235_v47, %v4970_v16 }
 0x63e   :  { %v1276_v56 = vsel %vm1260_vm10, %v1252_v43, %v1268_v50  ;;  %vm1262_vm8 = vcmp.ge.f32.partialorder %v1254_v51, 0.0  ;;  %v1270_v57 = vmul.f32 0.2, %v1254_v51  ;;  %vm1264_vm0 = vcmp.ge.f32.partialorder %v1256_v52, 0.0 }
 0x63f   :  { %v1290_v58 = vmul.f32 %v4037_v49, %v1276_v56  ;;  %v1277_v59 = vsel %vm1261_vm7, %v1253_v45, %v1269_v53  ;;  %vm1263_vm9 = vcmp.ge.f32.partialorder %v1255_v54, 0.0  ;;  %v1271_v60 = vmul.f32 0.2, %v1255_v54 }
 0x640   :  { %v1291_v61 = vmul.f32 %v4037_v49, %v1277_v59  ;;  %v1278_v62 = vsel %vm1262_vm8, %v1254_v51, %v1270_v57  ;;  %v1272_v63 = vmul.f32 0.2, %v1256_v52  ;;  %vm1265_vm6 = vcmp.ge.f32.partialorder %v1257_v55, 0.0 }
 0x641   :  { %v1298_v0 = vsel %vm391_vm2, %v1290_v58, 0.0  ;;  %v1292_v1 = vmul.f32 %v4037_v49, %v1278_v62  ;;  %v1279_v3 = vsel %vm1263_vm9, %v1255_v54, %v1271_v60  ;;  %v1273_v4 = vmul.f32 0.2, %v1257_v55 }
 0x642   :  { %1299 = vadd.xlane.f32.xlu0 %v1298_v0  ;;  %v1301_v5 = vsel %vm391_vm2, %v1291_v61, 0.0  ;;  %v1293_v7 = vmul.f32 %v4037_v49, %v1279_v3  ;;  %v1280_v8 = vsel %vm1264_vm0, %v1256_v52, %v1272_v63  ;;  %v1239_v9 = vrot.slane %v1209_v40, %v4767_v29  ;;  %v69_v3 = vld [vmem:[%s5763_s3 + $0x70] sm:$0xff] }
 0x643   :  { %1302 = vadd.xlane.f32.xlu1 %v1301_v5  ;;  %v1281_v10 = vsel %vm1265_vm6, %v1257_v55, %v1273_v4  ;;  %v1243_v11 = vrot.slane %v1211_v44, %v4767_v29  ;;  %v1304_v13 = vsel %vm391_vm2, %v1292_v1, 0.0  ;;  %v1294_v15 = vmul.f32 %v4037_v49, %v1280_v8  ;;  %v70_v1 = vld [vmem:[%s5763_s3 + $0x78] sm:$0xff]  ;;  %v68_v4 = vld [vmem:[%s5763_s3 + $0x68] sm:$0xff]  ;;  %v67_v5 = vld [vmem:[%s5763_s3 + $0x60] sm:$0xff] }
 0x644   :  { %v1258_v12 = vadd.f32 %v1239_v9, %v4970_v16  ;;  %v1307_v20 = vsel %vm391_vm2, %v1293_v7, 0.0  ;;  %v1295_v21 = vmul.f32 %v4037_v49, %v1281_v10  ;;  %vm5783_vm6 = vcmask 64512   ;;  %4303 = vmatpush3.msra.mxu1 %v70_v1 }
 0x645   :  { %v1259_v17 = vadd.f32 %v1243_v11, %v4970_v16  ;;  %v1310_v26 = vsel %vm391_vm2, %v1294_v15, 0.0  ;;  %vm5784_vm8 = vmmov %vm5783_vm6  ;;  %4304 = vmatprep.subr.mxu1 %v4613_v2  ;;  %vm5785_vm0 = vcmask 261120   ;;  %v90_v11 = vld [vmem:[%s5765_s5 + $0x78] sm:$0xff]  ;;  %v4589_v15 = vld [vmem:[%s5760_s0] sm:$0xff] }
 0x646   :  { %1305 = vadd.xlane.f32.xlu0 %v1304_v13  ;;  %vm1266_vm10 = vcmp.ge.f32.partialorder %v1258_v12, 0.0  ;;  %v1274_v22 = vmul.f32 0.2, %v1258_v12  ;;  %v1313_v30 = vsel %vm391_vm2, %v1295_v21, 0.0  ;;  %4305 = vmatpush3.msra.mxu1 %v69_v3  ;;  %vm5786_vm9 = vmmov %vm5783_vm6  ;;  %v87_v13 = vld [vmem:[%s5765_s5 + $0x60] sm:$0xff] }
 0x647   :  { %1308 = vadd.xlane.f32.xlu1 %v1307_v20  ;;  %vm1267_vm7 = vcmp.ge.f32.partialorder %v1259_v17, 0.0  ;;  %v1275_v24 = vmul.f32 0.2, %v1259_v17  ;;  %4306 = vmatprep.subr.mxu1 %v4613_v2 }
 0x648   :  { %v1282_v25 = vsel %vm1266_vm10, %v1258_v12, %v1274_v22  ;;  %4307 = vmatpush3.msra.mxu1 %v68_v4  ;;  %v88_v12 = vld [vmem:[%s5765_s5 + $0x68] sm:$0xff]  ;;  %vm5787_vm10 = vmmov %vm5785_vm0 }
 0x649   :  { %v1296_v27 = vmul.f32 %v4037_v49, %v1282_v25  ;;  %v1283_v28 = vsel %vm1267_vm7, %v1259_v17, %v1275_v24  ;;  %4308 = vmatprep.subr.mxu1 %v4613_v2  ;;  %v4039_v17 = vld [vmem:[%s5764_s4 + $0x3] ss:$0 sm:$0xff]  ;;  %v1009_v24 = vmax.f32 %v4879_v19, %v4974_v18 }
 0x64a   :  { %1311 = vadd.xlane.f32.xlu0 %v1310_v26  ;;  %v1297_v31 = vmul.f32 %v4037_v49, %v1283_v28  ;;  %4309 = vmatpush3.msra.mxu1 %v67_v5  ;;  %v4041_v28 = vld [vmem:[%s5766_s6 + $0x3] ss:$0 sm:$0xff] }
 0x64b   :  { %1314 = vadd.xlane.f32.xlu1 %v1313_v30  ;;  %v1316_v16 = vsel %vm391_vm2, %v1296_v27, 0.0  ;;  %4311 = vmatmul.mubr.msk.f32.vlgmr.msra.gmra.mxu1 %vm5785_vm0, %v4724_v6  ;;  %v89_v6 = vld [vmem:[%s5765_s5 + $0x70] sm:$0xff] }
 0x64c   :  { %v1319_v32 = vsel %vm391_vm2, %v1297_v31, 0.0  ;;  %4324 = vmatprep.subr.mxu1 %v4613_v2  ;;  %4326 = vmatprep.mubr.msk.f32.mxu1 %vm5781_vm1, %v4613_v2 }
 0x64e   :  { %1317 = vadd.xlane.f32.xlu0 %v1316_v16 }
 0x64f   :  { %1320 = vadd.xlane.f32.xlu1 %v1319_v32 }
 0x6cb   :  { %v1300_v33 = vpop.xlane.xlu0 %1299 }
 0x6cc   :  { %v1303_v34 = vpop.xlane.xlu1 %1302  ;;  %v1333_v35 = vrot.slane %v1300_v33, %v4752_v14 }
 0x6cd   :  { %v1337_v36 = vrot.slane %v1303_v34, %v4752_v14 }
 0x6cf   :  { %v1362_v37 = vsel %vm459_vm11, %v1337_v36, %v1333_v35  ;;  %v1306_v38 = vpop.xlane.xlu0 %1305 }
 0x6d0   :  { %v1341_v39 = vrot.slane %v1306_v38, %v4752_v14  ;;  %v1309_v40 = vpop.xlane.xlu1 %1308 }
 0x6d1   :  { %v1345_v41 = vrot.slane %v1309_v40, %v4752_v14 }
 0x6d2   :  { %v1363_v42 = vsel %vm461_vm12, %v1341_v39, %v1362_v37 }
 0x6d3   :  { %v1364_v43 = vsel %vm463_vm13, %v1345_v41, %v1363_v42  ;;  %v1312_v44 = vpop.xlane.xlu0 %1311 }
 0x6d4   :  { %v1349_v45 = vrot.slane %v1312_v44, %v4752_v14  ;;  %v1315_v46 = vpop.xlane.xlu1 %1314 }
 0x6d5   :  { %v1353_v47 = vrot.slane %v1315_v46, %v4752_v14 }
 0x6d6   :  { %v1365_v49 = vsel %vm465_vm14, %v1349_v45, %v1364_v43 }
 0x6d7   :  { %v1366_v50 = vsel %vm467_vm15, %v1353_v47, %v1365_v49  ;;  %v1318_v51 = vpop.xlane.xlu0 %1317 }
 0x6d8   :  { %v1357_v52 = vrot.slane %v1318_v51, %v4752_v14  ;;  %v1321_v53 = vpop.xlane.xlu1 %1320 }
 0x6d9   :  { %v1361_v54 = vrot.slane %v1321_v53, %v4752_v14 }
 0x6da   :  { %v1367_v55 = vsel %vm469_vm3, %v1357_v52, %v1366_v50  ;;  %v4043_v52 = vld [vmem:[%s5767_s7 + $0x3] ss:$0 sm:$0xff] }
 0x6db   :  { %v1368_v56 = vsel %vm471_vm4, %v1361_v54, %v1367_v55 }
 0x6dc   :  { %v1370_v57 = vsel %vm416_vm5, %v1368_v56, -1e+30 }
 0x6dd   :  { %v1371_v58 = vsel %vm5783_vm6, %v1370_v57, -inf }
 0x6de   :  { %1372 = vmax.xlane.f32.xlu0 %v1371_v58 }
 0x70b   :  { %v1530_v20 = vpop.f32.mrf.mxu1 }
 0x70c   :  { %v5081_v21 = vadd.f32 %v4039_v17, %v1530_v20 }
 0x70d   :  { %v4312_v22 = vpop.f32.mrf.mxu1 }
 0x70e   :  { %4325 = vmatpush3.msra.mxu1 %v5081_v21 }
 0x70f   :  { %4348 = vmatprep.subr.mxu1 %v4613_v2 }
 0x767   :  { %v1373_v59 = vpop.xlane.xlu0 %1372 }
 0x768   :  { %v1374_v60 = vsub.f32 %v1370_v57, %v1373_v59 }
 0x76a   :  { %v1375_v61 = vmul.f32 1.442695, %v1374_v60 }
 0x76c   :  { %4561 = vpow2.f32 %v1375_v61 }
 0x779   :  { %v4562_v62 = vpop.eup %4561 }
 0x77a   :  { %v1377_v63 = vmul.f32 %v4562_v62, %v4814_v48 }
 0x77c   :  { %v1378_v0 = vsel %vm5784_vm8, %v1377_v63, 0.0 }
 0x77d   :  { %1379 = vadd.xlane.f32.xlu1 %v1378_v0 }
 0x806   :  { %v1380_v7 = vpop.xlane.xlu1 %1379 }
 0x807   :  { %v1381_v8 = vmax.f32 %v1380_v7, 1e-30 }
 0x809   :  { %4563 = vrcp.f32 %v1381_v8 }
 0x816   :  { %v4564_v9 = vpop.eup %4563 }
 0x817   :  { %v1383_v10 = vmul.f32 %v4564_v9, %v1377_v63 }
 0x819   :  { %4300 = vmatmul.mubr.msk.f32.vlgmr.msra.gmra.mxu0 %vm5786_vm9, %v1383_v10 }
 0x81a   :  { %4314 = vmatpush3.msra.mxu0 %v90_v11  ;;  %4321 = vmatprep.mubr.msk.f32.mxu0 %vm5781_vm1, %v4613_v2 }
 0x81b   :  { %4315 = vmatprep.subr.mxu0 %v4613_v2 }
 0x81c   :  { %4316 = vmatpush3.msra.mxu0 %v89_v6 }
 0x81d   :  { %4317 = vmatprep.subr.mxu0 %v4613_v2 }
 0x81e   :  { %4318 = vmatpush3.msra.mxu0 %v88_v12 }
 0x81f   :  { %4319 = vmatprep.subr.mxu0 %v4613_v2 }
 0x820   :  { %4320 = vmatpush3.msra.mxu0 %v87_v13 }
 0x821   :  { %4322 = vmatmul.mubr.msk.f32.vlgmr.msra.gmra.mxu0 %vm5787_vm10, %v4589_v15  ;;  %4329 = vmatprep.subr.mxu0 %v4613_v2 }
 0x822   :  { %4345 = vmatprep.mubr.msk.f32.mxu0 %vm5781_vm1, %v4613_v2 }
 0x8d9   :  { %v1453_v25 = vpop.f32.mrf.mxu0 }
 0x8da   :  { %v5087_v26 = vmax.f32 %v1009_v24, %v1453_v25 }
 0x8db   :  { %v4301_v27 = vpop.f32.mrf.mxu0 }
 0x8e1   :  { %v1606_v30 = vpop.f32.mrf.mxu0 }
 0x8e2   :  { %v1607_v31 = vadd.f32 %v4041_v28, %v1606_v30 }
 0x8e3   :  { %v4323_v16 = vpop.f32.mrf.mxu0 }
 0x8e4   :  { %v1611_v32 = vcombine.high %v1607_v31, %v1607_v31  ;;  %v1618_v33 = vrot.slane %v1607_v31, %v4764_v23 }
 0x8e6   :  { %v1625_v34 = vrot.slane %v1611_v32, %v4764_v23  ;;  %v1626_v35 = vcombine.high %v1618_v33, %v1618_v33  ;;  %v1634_v36 = vrot.slane %v1618_v33, %v4764_v23 }
 0x8e8   :  { %v1627_v19 = vcombine.high %v1625_v34, %v1625_v34  ;;  %v1641_v18 = vrot.slane %v1625_v34, %v4764_v23  ;;  %v1648_v37 = vrot.slane %v1626_v35, %v4764_v23  ;;  %v1656_v38 = vcombine.high %v1634_v36, %v1634_v36 }
 0x8e9   :  { %v1663_v39 = vrot.slane %v1634_v36, %v4767_v29 }
 0x8ea   :  { %v1655_v40 = vrot.slane %v1627_v19, %v4764_v23  ;;  %v1658_v41 = vcombine.high %v1648_v37, %v1648_v37  ;;  %v1667_v42 = vrot.slane %v1648_v37, %v4767_v29  ;;  %v1657_v43 = vcombine.high %v1641_v18, %v1641_v18 }
 0x8eb   :  { %v1671_v44 = vrot.slane %v1656_v38, %v4767_v29  ;;  %v1679_v45 = vrot.slane %v1641_v18, %v4767_v29  ;;  %v1700_v46 = vadd.f32 %v1663_v39, %v5081_v21 }
 0x8ec   :  { %v1659_v47 = vcombine.high %v1655_v40, %v1655_v40  ;;  %v1701_v49 = vadd.f32 %v1667_v42, %v5081_v21  ;;  %v1675_v50 = vrot.slane %v1658_v41, %v4767_v29  ;;  %v1683_v51 = vrot.slane %v1655_v40, %v4767_v29 }
 0x8ed   :  { %vm1708_vm7 = vcmp.ge.f32.partialorder %v1700_v46, 0.0  ;;  %v1716_v53 = vmul.f32 0.2, %v1700_v46  ;;  %v1702_v54 = vadd.f32 %v1671_v44, %v5081_v21  ;;  %v1704_v55 = vadd.f32 %v1679_v45, %v5081_v21 }
 0x8ee   :  { %vm1709_vm6 = vcmp.ge.f32.partialorder %v1701_v49, 0.0  ;;  %v1717_v56 = vmul.f32 0.2, %v1701_v49  ;;  %v1703_v57 = vadd.f32 %v1675_v50, %v5081_v21  ;;  %v1705_v58 = vadd.f32 %v1683_v51, %v5081_v21 }
 0x8ef   :  { %v1724_v59 = vsel %vm1708_vm7, %v1700_v46, %v1716_v53  ;;  %vm1710_vm8 = vcmp.ge.f32.partialorder %v1702_v54, 0.0  ;;  %v1718_v60 = vmul.f32 0.2, %v1702_v54  ;;  %vm1712_vm0 = vcmp.ge.f32.partialorder %v1704_v55, 0.0 }
 0x8f0   :  { %v1738_v61 = vmul.f32 %v4043_v52, %v1724_v59  ;;  %v1725_v62 = vsel %vm1709_vm6, %v1701_v49, %v1717_v56  ;;  %vm1711_vm9 = vcmp.ge.f32.partialorder %v1703_v57, 0.0  ;;  %v1719_v63 = vmul.f32 0.2, %v1703_v57 }
 0x8f1   :  { %v1739_v0 = vmul.f32 %v4043_v52, %v1725_v62  ;;  %v1726_v1 = vsel %vm1710_vm8, %v1702_v54, %v1718_v60  ;;  %v1720_v3 = vmul.f32 0.2, %v1704_v55  ;;  %vm1713_vm10 = vcmp.ge.f32.partialorder %v1705_v58, 0.0 }
 0x8f2   :  { %v1746_v4 = vsel %vm391_vm2, %v1738_v61, 0.0  ;;  %v1740_v5 = vmul.f32 %v4043_v52, %v1726_v1  ;;  %v1727_v7 = vsel %vm1711_vm9, %v1703_v57, %v1719_v63  ;;  %v1721_v8 = vmul.f32 0.2, %v1705_v58 }
 0x8f3   :  { %1747 = vadd.xlane.f32.xlu0 %v1746_v4  ;;  %v1749_v9 = vsel %vm391_vm2, %v1739_v0, 0.0  ;;  %v1741_v10 = vmul.f32 %v4043_v52, %v1727_v7  ;;  %v1728_v11 = vsel %vm1712_vm0, %v1704_v55, %v1720_v3  ;;  %v1687_v6 = vrot.slane %v1657_v43, %v4767_v29  ;;  %v1913_v3 = vld [vmem:[%s5768_s8 + $0x38] sm:$0xff]  ;;  %v1912_v4 = vld [vmem:[%s5768_s8 + $0x30] sm:$0xff]  ;;  %v1910_v7 = vld [vmem:[%s5768_s8 + $0x20] sm:$0xff] }
 0x8f4   :  { %1750 = vadd.xlane.f32.xlu1 %v1749_v9  ;;  %v1729_v12 = vsel %vm1713_vm10, %v1705_v58, %v1721_v8  ;;  %v1691_v13 = vrot.slane %v1659_v47, %v4767_v29  ;;  %v1752_v17 = vsel %vm391_vm2, %v1740_v5, 0.0  ;;  %v1742_v20 = vmul.f32 %v4043_v52, %v1728_v11  ;;  %4330 = vmatpush3.msra.mxu0 %v1913_v3  ;;  %v1911_v5 = vld [vmem:[%s5768_s8 + $0x28] sm:$0xff]  ;;  %v1909_v8 = vld [vmem:[%s5768_s8 + $0x18] sm:$0xff]  ;;  %v1908_v9 = vld [vmem:[%s5768_s8 + $0x10] sm:$0xff] }
 0x8f5   :  { %v1706_v15 = vadd.f32 %v1687_v6, %v5081_v21  ;;  %v1755_v24 = vsel %vm391_vm2, %v1741_v10, 0.0  ;;  %v1743_v25 = vmul.f32 %v4043_v52, %v1729_v12  ;;  %vm5788_vm8 = vcmask 64512   ;;  %4331 = vmatprep.subr.mxu0 %v4613_v2  ;;  %v4049_v3 = vld [vmem:[%s5772_s12] ss:$0 sm:$0xff] }
 0x8f6   :  { %v1707_v22 = vadd.f32 %v1691_v13, %v5081_v21  ;;  %v1758_v31 = vsel %vm391_vm2, %v1742_v20, 0.0  ;;  %vm5789_vm0 = vmmov %vm5788_vm8  ;;  %4332 = vmatpush3.msra.mxu0 %v1912_v4  ;;  %v1949_v13 = vld [vmem:[%s5770_s10 + $0x38] sm:$0xff]  ;;  %v1946_v20 = vld [vmem:[%s5770_s10 + $0x20] sm:$0xff] }
 0x8f7   :  { %1753 = vadd.xlane.f32.xlu0 %v1752_v17  ;;  %vm1714_vm7 = vcmp.ge.f32.partialorder %v1706_v15, 0.0  ;;  %v1722_v27 = vmul.f32 0.2, %v1706_v15  ;;  %v1761_v33 = vsel %vm391_vm2, %v1743_v25, 0.0  ;;  %4333 = vmatprep.subr.mxu0 %v4613_v2  ;;  %vm5790_vm9 = vmmov %vm5789_vm0  ;;  %v1947_v17 = vld [vmem:[%s5770_s10 + $0x28] sm:$0xff] }
 0x8f8   :  { %1756 = vadd.xlane.f32.xlu1 %v1755_v24  ;;  %vm1715_vm6 = vcmp.ge.f32.partialorder %v1707_v22, 0.0  ;;  %v1723_v28 = vmul.f32 0.2, %v1707_v22  ;;  %4334 = vmatpush3.msra.mxu0 %v1911_v5  ;;  %v1944_v24 = vld [vmem:[%s5770_s10 + $0x10] sm:$0xff]  ;;  %v1943_v25 = vld [vmem:[%s5770_s10 + $0x8] sm:$0xff] }
 0x8f9   :  { %v1730_v30 = vsel %vm1714_vm7, %v1706_v15, %v1722_v27  ;;  %4335 = vmatprep.subr.mxu0 %v4613_v2  ;;  %v1948_v15 = vld [vmem:[%s5770_s10 + $0x30] sm:$0xff]  ;;  %v1907_v27 = vld [vmem:[%s5768_s8 + $0x8] sm:$0xff] }
 0x8fa   :  { %v1744_v16 = vmul.f32 %v4043_v52, %v1730_v30  ;;  %v1731_v32 = vsel %vm1715_vm6, %v1707_v22, %v1723_v28  ;;  %4336 = vmatpush3.msra.mxu0 %v1910_v7  ;;  %v1945_v22 = vld [vmem:[%s5770_s10 + $0x18] sm:$0xff]  ;;  %v1942_v28 = vld [vmem:[%s5770_s10] sm:$0xff] }
 0x8fb   :  { %1759 = vadd.xlane.f32.xlu0 %v1758_v31  ;;  %v1745_v34 = vmul.f32 %v4043_v52, %v1731_v32  ;;  %4337 = vmatprep.subr.mxu0 %v4613_v2  ;;  %v1906_v30 = vld [vmem:[%s5768_s8] sm:$0xff]  ;;  %v1921_v32 = vld [vmem:[%s5768_s8 + $0x78] sm:$0xff] }
 0x8fc   :  { %1762 = vadd.xlane.f32.xlu1 %v1761_v33  ;;  %v1764_v21 = vsel %vm391_vm2, %v1744_v16, 0.0  ;;  %4338 = vmatpush3.msra.mxu0 %v1909_v8 }
 0x8fd   :  { %v1767_v35 = vsel %vm391_vm2, %v1745_v34, 0.0  ;;  %4339 = vmatprep.subr.mxu0 %v4613_v2  ;;  %v1920_v34 = vld [vmem:[%s5768_s8 + $0x70] sm:$0xff] }
 0x8fe   :  { %4340 = vmatpush3.msra.mxu0 %v1908_v9 }
 0x8ff   :  { %1765 = vadd.xlane.f32.xlu0 %v1764_v21  ;;  %4341 = vmatprep.subr.mxu0 %v4613_v2  ;;  %v1918_v21 = vld [vmem:[%s5768_s8 + $0x60] sm:$0xff] }
 0x900   :  { %1768 = vadd.xlane.f32.xlu1 %v1767_v35  ;;  %4342 = vmatpush3.msra.mxu0 %v1907_v27  ;;  %v1917_v35 = vld [vmem:[%s5768_s8 + $0x58] sm:$0xff] }
 0x901   :  { %4343 = vmatprep.subr.mxu0 %v4613_v2 }
 0x902   :  { %4344 = vmatpush3.msra.mxu0 %v1906_v30 }
 0x903   :  { %4367 = vmatprep.subr.mxu0 %v4613_v2 }
 0x97c   :  { %v1748_v36 = vpop.xlane.xlu0 %1747 }
 0x97d   :  { %v1751_v19 = vpop.xlane.xlu1 %1750  ;;  %v1781_v18 = vrot.slane %v1748_v36, %v4752_v14  ;;  %v1916_v36 = vld [vmem:[%s5768_s8 + $0x50] sm:$0xff] }
 0x97e   :  { %v1785_v37 = vrot.slane %v1751_v19, %v4752_v14  ;;  %v1915_v19 = vld [vmem:[%s5768_s8 + $0x48] sm:$0xff] }
 0x980   :  { %v1810_v38 = vsel %vm459_vm11, %v1785_v37, %v1781_v18  ;;  %v1754_v39 = vpop.xlane.xlu0 %1753  ;;  %v1914_v18 = vld [vmem:[%s5768_s8 + $0x40] sm:$0xff] }
 0x981   :  { %v1789_v40 = vrot.slane %v1754_v39, %v4752_v14  ;;  %v1757_v41 = vpop.xlane.xlu1 %1756  ;;  %v4045_v37 = vld [vmem:[%s5769_s9] ss:$0 sm:$0xff] }
 0x982   :  { %v1793_v42 = vrot.slane %v1757_v41, %v4752_v14 }
 0x983   :  { %v1811_v43 = vsel %vm461_vm12, %v1789_v40, %v1810_v38  ;;  %v4047_v38 = vld [vmem:[%s5771_s11] ss:$0 sm:$0xff] }
 0x984   :  { %v1812_v44 = vsel %vm463_vm13, %v1793_v42, %v1811_v43  ;;  %v1760_v45 = vpop.xlane.xlu0 %1759 }
 0x985   :  { %v1797_v46 = vrot.slane %v1760_v45, %v4752_v14  ;;  %v1763_v47 = vpop.xlane.xlu1 %1762 }
 0x986   :  { %v1801_v49 = vrot.slane %v1763_v47, %v4752_v14 }
 0x987   :  { %v1813_v50 = vsel %vm465_vm14, %v1797_v46, %v1812_v44 }
 0x988   :  { %v1814_v51 = vsel %vm467_vm15, %v1801_v49, %v1813_v50  ;;  %v1766_v52 = vpop.xlane.xlu0 %1765 }
 0x989   :  { %v1805_v53 = vrot.slane %v1766_v52, %v4752_v14  ;;  %v1769_v54 = vpop.xlane.xlu1 %1768 }
 0x98a   :  { %v1809_v55 = vrot.slane %v1769_v54, %v4752_v14 }
 0x98b   :  { %v1815_v56 = vsel %vm469_vm3, %v1805_v53, %v1814_v51 }
 0x98c   :  { %v1816_v57 = vsel %vm471_vm4, %v1809_v55, %v1815_v56 }
 0x98d   :  { %v1818_v58 = vsel %vm416_vm5, %v1816_v57, -1e+30 }
 0x98e   :  { %v1819_v59 = vsel %vm5788_vm8, %v1818_v58, -inf }
 0x98f   :  { %1820 = vmax.xlane.f32.xlu0 %v1819_v59 }
 0xa18   :  { %v1821_v60 = vpop.xlane.xlu0 %1820 }
 0xa19   :  { %v1822_v61 = vsub.f32 %v1818_v58, %v1821_v60 }
 0xa1b   :  { %v1823_v62 = vmul.f32 1.442695, %v1822_v61 }
 0xa1d   :  { %4565 = vpow2.f32 %v1823_v62 }
 0xa2a   :  { %v4566_v63 = vpop.eup %4565 }
 0xa2b   :  { %v1825_v0 = vmul.f32 %v4566_v63, %v4814_v48  ;;  %v3758_v48 = vld [vmem:[%s5773_s13 + $0x70] sm:$0xff] }
 0xa2d   :  { %v1826_v1 = vsel %vm5789_vm0, %v1825_v0, 0.0 }
 0xa2e   :  { %1827 = vadd.xlane.f32.xlu1 %v1826_v1 }
 0xab7   :  { %v1828_v10 = vpop.xlane.xlu1 %1827 }
 0xab8   :  { %v1829_v11 = vmax.f32 %v1828_v10, 1e-30 }
 0xaba   :  { %4567 = vrcp.f32 %v1829_v11 }
 0xac7   :  { %v4568_v6 = vpop.eup %4567 }
 0xac8   :  { %v1831_v12 = vmul.f32 %v4568_v6, %v1825_v0  ;;  %v4051_v6 = vld [vmem:[%s5769_s9 + $0x1] ss:$0 sm:$0xff] }
 0xaca   :  { %4327 = vmatmul.mubr.msk.f32.vlgmr.msra.gmra.mxu1 %vm5790_vm9, %v1831_v12 }
 0xacb   :  { %4349 = vmatpush3.msra.mxu1 %v1949_v13  ;;  %4364 = vmatprep.mubr.msk.f32.mxu1 %vm5781_vm1, %v4613_v2 }
 0xacc   :  { %4350 = vmatprep.subr.mxu1 %v4613_v2 }
 0xacd   :  { %4351 = vmatpush3.msra.mxu1 %v1948_v15 }
 0xace   :  { %4352 = vmatprep.subr.mxu1 %v4613_v2 }
 0xacf   :  { %4353 = vmatpush3.msra.mxu1 %v1947_v17 }
 0xad0   :  { %4354 = vmatprep.subr.mxu1 %v4613_v2 }
 0xad1   :  { %4355 = vmatpush3.msra.mxu1 %v1946_v20 }
 0xad2   :  { %4356 = vmatprep.subr.mxu1 %v4613_v2 }
 0xad3   :  { %4357 = vmatpush3.msra.mxu1 %v1945_v22 }
 0xad4   :  { %4358 = vmatprep.subr.mxu1 %v4613_v2 }
 0xad5   :  { %4359 = vmatpush3.msra.mxu1 %v1944_v24 }
 0xad6   :  { %4360 = vmatprep.subr.mxu1 %v4613_v2 }
 0xad7   :  { %4361 = vmatpush3.msra.mxu1 %v1943_v25 }
 0xad8   :  { %4362 = vmatprep.subr.mxu1 %v4613_v2 }
 0xad9   :  { %4363 = vmatpush3.msra.mxu1 %v1942_v28 }
 0xada   :  { %4372 = vmatprep.subr.mxu1 %v4613_v2 }
 0xb8a   :  { %v1901_v31 = vpop.f32.mrf.mxu1 }
 0xb8b   :  { %v5214_v16 = vmax.f32 %v5087_v26, %v1901_v31  ;;  %v1919_v26 = vld [vmem:[%s5768_s8 + $0x68] sm:$0xff] }
 0xb8c   :  { %v4328_v33 = vpop.f32.mrf.mxu1 }
 0xb8d   :  { %4346 = vmatmul.mubr.msk.f32.vlgmr.msra.gmra.mxu0 %vm391_vm2, %v5214_v16  ;;  %4365 = vmatmul.mubr.msk.f32.vlgmr.msra.gmra.mxu1 %vm391_vm2, %v5214_v16 }
 0xb8e   :  { %4373 = vmatpush3.msra.mxu1 %v1921_v32  ;;  %4388 = vmatprep.mubr.msk.f32.mxu1 %vm5781_vm1, %v4613_v2 }
 0xb8f   :  { %4374 = vmatprep.subr.mxu1 %v4613_v2  ;;  %4369 = vmatprep.mubr.msk.f32.mxu0 %vm5781_vm1, %v4613_v2 }
 0xb90   :  { %4375 = vmatpush3.msra.mxu1 %v1920_v34 }
 0xb91   :  { %4376 = vmatprep.subr.mxu1 %v4613_v2 }
 0xb92   :  { %4377 = vmatpush3.msra.mxu1 %v1919_v26 }
 0xb93   :  { %4378 = vmatprep.subr.mxu1 %v4613_v2 }
 0xb94   :  { %4379 = vmatpush3.msra.mxu1 %v1918_v21 }
 0xb95   :  { %4380 = vmatprep.subr.mxu1 %v4613_v2 }
 0xb96   :  { %4381 = vmatpush3.msra.mxu1 %v1917_v35 }
 0xb97   :  { %4382 = vmatprep.subr.mxu1 %v4613_v2 }
 0xb98   :  { %4383 = vmatpush3.msra.mxu1 %v1916_v36 }
 0xb99   :  { %4384 = vmatprep.subr.mxu1 %v4613_v2 }
 0xb9a   :  { %4385 = vmatpush3.msra.mxu1 %v1915_v19 }
 0xb9b   :  { %4386 = vmatprep.subr.mxu1 %v4613_v2 }
 0xb9c   :  { %4387 = vmatpush3.msra.mxu1 %v1914_v18 }
 0xb9d   :  { %4389 = vmatmul.mubr.msk.f32.vlgmr.msra.gmra.mxu1 %vm391_vm2, %v5214_v16  ;;  %4410 = vmatprep.subr.mxu1 %v4613_v2 }
 0xb9e   :  { %4412 = vmatprep.mubr.msk.f32.mxu1 %vm5781_vm1, %v4613_v2 }
 0xc4d   :  { %v2057_v39 = vpop.f32.mrf.mxu0  ;;  %v2133_v40 = vpop.f32.mrf.mxu1 }
 0xc4e   :  { %v5266_v41 = vadd.f32 %v4045_v37, %v2057_v39  ;;  %v2134_v42 = vadd.f32 %v4047_v38, %v2133_v40 }
 0xc4f   :  { %v4347_v43 = vpop.f32.mrf.mxu0  ;;  %v4366_v44 = vpop.f32.mrf.mxu1 }
 0xc50   :  { %v2138_v45 = vcombine.high %v2134_v42, %v2134_v42  ;;  %v2145_v46 = vrot.slane %v2134_v42, %v4764_v23  ;;  %4368 = vmatpush3.msra.mxu0 %v5266_v41 }
 0xc51   :  { %4391 = vmatprep.subr.mxu0 %v4613_v2 }
 0xc52   :  { %v2152_v47 = vrot.slane %v2138_v45, %v4764_v23  ;;  %v2153_v49 = vcombine.high %v2145_v46, %v2145_v46  ;;  %v2161_v50 = vrot.slane %v2145_v46, %v4764_v23 }
 0xc54   :  { %v2154_v51 = vcombine.high %v2152_v47, %v2152_v47  ;;  %v2168_v52 = vrot.slane %v2152_v47, %v4764_v23  ;;  %v2175_v53 = vrot.slane %v2153_v49, %v4764_v23  ;;  %v2183_v54 = vcombine.high %v2161_v50, %v2161_v50 }
 0xc55   :  { %v2190_v55 = vrot.slane %v2161_v50, %v4767_v29 }
 0xc56   :  { %v2182_v56 = vrot.slane %v2154_v51, %v4764_v23  ;;  %v2185_v57 = vcombine.high %v2175_v53, %v2175_v53  ;;  %v2194_v58 = vrot.slane %v2175_v53, %v4767_v29  ;;  %v2198_v59 = vrot.slane %v2183_v54, %v4767_v29 }
 0xc57   :  { %v2206_v60 = vrot.slane %v2168_v52, %v4767_v29  ;;  %v2227_v61 = vadd.f32 %v2190_v55, %v5266_v41  ;;  %v2184_v62 = vcombine.high %v2168_v52, %v2168_v52 }
 0xc58   :  { %v2228_v63 = vadd.f32 %v2194_v58, %v5266_v41  ;;  %v2202_v0 = vrot.slane %v2185_v57, %v4767_v29  ;;  %v2210_v1 = vrot.slane %v2182_v56, %v4767_v29  ;;  %v2229_v5 = vadd.f32 %v2198_v59, %v5266_v41 }
 0xc59   :  { %vm2235_vm10 = vcmp.ge.f32.partialorder %v2227_v61, 0.0  ;;  %v2243_v4 = vmul.f32 0.2, %v2227_v61  ;;  %v2231_v7 = vadd.f32 %v2206_v60, %v5266_v41  ;;  %v2186_v11 = vcombine.high %v2182_v56, %v2182_v56 }
 0xc5a   :  { %vm2236_vm7 = vcmp.ge.f32.partialorder %v2228_v63, 0.0  ;;  %v2244_v8 = vmul.f32 0.2, %v2228_v63  ;;  %v2230_v9 = vadd.f32 %v2202_v0, %v5266_v41  ;;  %v2232_v10 = vadd.f32 %v2210_v1, %v5266_v41 }
 0xc5b   :  { %v2251_v12 = vsel %vm2235_vm10, %v2227_v61, %v2243_v4  ;;  %vm2237_vm6 = vcmp.ge.f32.partialorder %v2229_v5, 0.0  ;;  %v2245_v13 = vmul.f32 0.2, %v2229_v5  ;;  %v2247_v27 = vmul.f32 0.2, %v2231_v7 }
 0xc5c   :  { %v2265_v15 = vmul.f32 %v4049_v3, %v2251_v12  ;;  %v2252_v17 = vsel %vm2236_vm7, %v2228_v63, %v2244_v8  ;;  %vm2238_vm8 = vcmp.ge.f32.partialorder %v2230_v9, 0.0  ;;  %v2246_v20 = vmul.f32 0.2, %v2230_v9  ;;  %v5323_v12 = vld [vmem:[%s5761_s1] sm:$0xff] }
 0xc5d   :  { %v2496_v22 = vpop.f32.mrf.mxu1  ;;  %v2266_v24 = vmul.f32 %v4049_v3, %v2252_v17  ;;  %v2253_v25 = vsel %vm2237_vm6, %v2229_v5, %v2245_v13  ;;  %vm2239_vm0 = vcmp.ge.f32.partialorder %v2231_v7, 0.0  ;;  %v2248_v31 = vmul.f32 0.2, %v2232_v10 }
 0xc5e   :  { %v5294_v28 = vadd.f32 %v4051_v6, %v2496_v22  ;;  %2273 = vadd.xlane.f32.xlu0 %v2265_v15  ;;  %v2254_v30 = vsel %vm2238_vm8, %v2230_v9, %v2246_v20  ;;  %vm2240_vm9 = vcmp.ge.f32.partialorder %v2232_v10, 0.0  ;;  %v2214_v33 = vrot.slane %v2184_v62, %v4767_v29 }
 0xc5f   :  { %v4390_v32 = vpop.f32.mrf.mxu1  ;;  %2275 = vadd.xlane.f32.xlu1 %v2266_v24  ;;  %v2218_v34 = vrot.slane %v2186_v11, %v4767_v29  ;;  %v2267_v26 = vmul.f32 %v4049_v3, %v2253_v25  ;;  %v2268_v21 = vmul.f32 %v4049_v3, %v2254_v30  ;;  %v2255_v35 = vsel %vm2239_vm0, %v2231_v7, %v2247_v27  ;;  %v1957_v25 = vld [vmem:[%s5770_s10 + $0x78] sm:$0xff]  ;;  %v1956_v27 = vld [vmem:[%s5770_s10 + $0x70] sm:$0xff]  ;;  %v1955_v30 = vld [vmem:[%s5770_s10 + $0x68] sm:$0xff] }
 0xc60   :  { %4411 = vmatpush3.msra.mxu1 %v5294_v28  ;;  %v2233_v36 = vadd.f32 %v2214_v33, %v5266_v41  ;;  %v2256_v18 = vsel %vm2240_vm9, %v2232_v10, %v2248_v31  ;;  %v2269_v39 = vmul.f32 %v4049_v3, %v2255_v35  ;;  %vm5791_vm6 = vcmask 64512   ;;  %v1954_v31 = vld [vmem:[%s5770_s10 + $0x60] sm:$0xff]  ;;  %v1953_v32 = vld [vmem:[%s5770_s10 + $0x58] sm:$0xff]  ;;  %v1952_v33 = vld [vmem:[%s5770_s10 + $0x50] sm:$0xff] }
 0xc61   :  { %v2234_v19 = vadd.f32 %v2218_v34, %v5266_v41  ;;  %4434 = vmatprep.subr.mxu1 %v4613_v2  ;;  %v2270_v40 = vmul.f32 %v4049_v3, %v2256_v18  ;;  %vm5792_vm8 = vmmov %vm5791_vm6  ;;  %v1951_v34 = vld [vmem:[%s5770_s10 + $0x48] sm:$0xff]  ;;  %v1928_v35 = vld [vmem:[%s5768_s8 + $0xb0] sm:$0xff] }
 0xc62   :  { %2277 = vadd.xlane.f32.xlu0 %v2267_v26  ;;  %vm2241_vm10 = vcmp.ge.f32.partialorder %v2233_v36, 0.0  ;;  %v2249_v37 = vmul.f32 0.2, %v2233_v36  ;;  %vm5793_vm0 = vmmov %vm5791_vm6  ;;  %v1950_v26 = vld [vmem:[%s5770_s10 + $0x40] sm:$0xff]  ;;  %v1925_v18 = vld [vmem:[%s5768_s8 + $0x98] sm:$0xff] }
 0xc63   :  { %2279 = vadd.xlane.f32.xlu1 %v2268_v21  ;;  %vm2242_vm7 = vcmp.ge.f32.partialorder %v2234_v19, 0.0  ;;  %v2250_v38 = vmul.f32 0.2, %v2234_v19  ;;  %v1929_v21 = vld [vmem:[%s5768_s8 + $0xb8] sm:$0xff] }
 0xc64   :  { %v2257_v42 = vsel %vm2241_vm10, %v2233_v36, %v2249_v37  ;;  %v1927_v36 = vld [vmem:[%s5768_s8 + $0xa8] sm:$0xff]  ;;  %v1924_v37 = vld [vmem:[%s5768_s8 + $0x90] sm:$0xff] }
 0xc65   :  { %v2258_v43 = vsel %vm2242_vm7, %v2234_v19, %v2250_v38  ;;  %v2271_v44 = vmul.f32 %v4049_v3, %v2257_v42  ;;  %v1926_v19 = vld [vmem:[%s5768_s8 + $0xa0] sm:$0xff]  ;;  %v1923_v38 = vld [vmem:[%s5768_s8 + $0x88] sm:$0xff] }
 0xc66   :  { %2281 = vadd.xlane.f32.xlu0 %v2269_v39  ;;  %v2272_v45 = vmul.f32 %v4049_v3, %v2258_v43  ;;  %v1922_v39 = vld [vmem:[%s5768_s8 + $0x80] sm:$0xff] }
 0xc67   :  { %2283 = vadd.xlane.f32.xlu1 %v2270_v40  ;;  %v4053_v43 = vld [vmem:[%s5771_s11 + $0x1] ss:$0 sm:$0xff] }
 0xc6a   :  { %2285 = vadd.xlane.f32.xlu0 %v2271_v44 }
 0xc6b   :  { %2287 = vadd.xlane.f32.xlu1 %v2272_v45 }
 0xce7   :  { %v2274_v41 = vpop.xlane.xlu0 %2273 }
 0xce8   :  { %v2276_v46 = vpop.xlane.xlu1 %2275  ;;  %v2300_v47 = vrot.slane %v2274_v41, %v4752_v14 }
 0xce9   :  { %v2304_v49 = vrot.slane %v2276_v46, %v4752_v14 }
 0xceb   :  { %v2329_v50 = vsel %vm459_vm11, %v2304_v49, %v2300_v47  ;;  %v2278_v51 = vpop.xlane.xlu0 %2277 }
 0xcec   :  { %v2308_v52 = vrot.slane %v2278_v51, %v4752_v14  ;;  %v2280_v53 = vpop.xlane.xlu1 %2279 }
 0xced   :  { %v2312_v54 = vrot.slane %v2280_v53, %v4752_v14 }
 0xcee   :  { %v2330_v55 = vsel %vm461_vm12, %v2308_v52, %v2329_v50 }
 0xcef   :  { %v2331_v56 = vsel %vm463_vm13, %v2312_v54, %v2330_v55  ;;  %v2282_v57 = vpop.xlane.xlu0 %2281 }
 0xcf0   :  { %v2316_v58 = vrot.slane %v2282_v57, %v4752_v14  ;;  %v2284_v59 = vpop.xlane.xlu1 %2283 }
 0xcf1   :  { %v2320_v60 = vrot.slane %v2284_v59, %v4752_v14 }
 0xcf2   :  { %v2332_v61 = vsel %vm465_vm14, %v2316_v58, %v2331_v56 }
 0xcf3   :  { %v2333_v62 = vsel %vm467_vm15, %v2320_v60, %v2332_v61  ;;  %v2286_v63 = vpop.xlane.xlu0 %2285 }
 0xcf4   :  { %v2324_v0 = vrot.slane %v2286_v63, %v4752_v14  ;;  %v2288_v1 = vpop.xlane.xlu1 %2287 }
 0xcf5   :  { %v2328_v3 = vrot.slane %v2288_v1, %v4752_v14 }
 0xcf6   :  { %v2334_v4 = vsel %vm469_vm3, %v2324_v0, %v2333_v62 }
 0xcf7   :  { %v2335_v5 = vsel %vm471_vm4, %v2328_v3, %v2334_v4  ;;  %v4055_v4 = vld [vmem:[%s5772_s12 + $0x1] ss:$0 sm:$0xff] }
 0xcf8   :  { %v2337_v7 = vsel %vm416_vm5, %v2335_v5, -1e+30 }
 0xcf9   :  { %v2338_v8 = vsel %vm5791_vm6, %v2337_v7, -inf }
 0xcfa   :  { %2339 = vmax.xlane.f32.xlu0 %v2338_v8 }
 0xd83   :  { %v2340_v9 = vpop.xlane.xlu0 %2339 }
 0xd84   :  { %v2341_v10 = vsub.f32 %v2337_v7, %v2340_v9 }
 0xd86   :  { %v2342_v11 = vmul.f32 1.442695, %v2341_v10 }
 0xd88   :  { %4569 = vpow2.f32 %v2342_v11 }
 0xd95   :  { %v4570_v6 = vpop.eup %4569 }
 0xd96   :  { %v2344_v13 = vmul.f32 %v5323_v12, %v4570_v6 }
 0xd98   :  { %v2345_v15 = vsel %vm5792_vm8, %v2344_v13, 0.0 }
 0xd99   :  { %2346 = vadd.xlane.f32.xlu1 %v2345_v15 }
 0xe22   :  { %v2347_v17 = vpop.xlane.xlu1 %2346 }
 0xe23   :  { %v2348_v20 = vmax.f32 %v2347_v17, 1e-30 }
 0xe25   :  { %4571 = vrcp.f32 %v2348_v20 }
 0xe32   :  { %v4572_v22 = vpop.eup %4571 }
 0xe33   :  { %v2350_v24 = vmul.f32 %v4572_v22, %v2344_v13  ;;  %v4057_v13 = vld [vmem:[%s5769_s9 + $0x2] ss:$0 sm:$0xff] }
 0xe35   :  { %4370 = vmatmul.mubr.msk.f32.vlgmr.msra.gmra.mxu0 %vm5793_vm0, %v2350_v24 }
 0xe36   :  { %4392 = vmatpush3.msra.mxu0 %v1957_v25  ;;  %4407 = vmatprep.mubr.msk.f32.mxu0 %vm5781_vm1, %v4613_v2 }
 0xe37   :  { %4393 = vmatprep.subr.mxu0 %v4613_v2 }
 0xe38   :  { %4394 = vmatpush3.msra.mxu0 %v1956_v27 }
 0xe39   :  { %4395 = vmatprep.subr.mxu0 %v4613_v2 }
 0xe3a   :  { %4396 = vmatpush3.msra.mxu0 %v1955_v30 }
 0xe3b   :  { %4397 = vmatprep.subr.mxu0 %v4613_v2 }
 0xe3c   :  { %4398 = vmatpush3.msra.mxu0 %v1954_v31 }
 0xe3d   :  { %4399 = vmatprep.subr.mxu0 %v4613_v2 }
 0xe3e   :  { %4400 = vmatpush3.msra.mxu0 %v1953_v32 }
 0xe3f   :  { %4401 = vmatprep.subr.mxu0 %v4613_v2 }
 0xe40   :  { %4402 = vmatpush3.msra.mxu0 %v1952_v33 }
 0xe41   :  { %4403 = vmatprep.subr.mxu0 %v4613_v2 }
 0xe42   :  { %4404 = vmatpush3.msra.mxu0 %v1951_v34 }
 0xe43   :  { %4405 = vmatprep.subr.mxu0 %v4613_v2 }
 0xe44   :  { %4406 = vmatpush3.msra.mxu0 %v1950_v26 }
 0xe45   :  { %4408 = vmatmul.mubr.msk.f32.vlgmr.msra.gmra.mxu0 %vm391_vm2, %v5214_v16  ;;  %4415 = vmatprep.subr.mxu0 %v4613_v2 }
 0xe46   :  { %4416 = vmatpush3.msra.mxu0 %v1929_v21  ;;  %4431 = vmatprep.mubr.msk.f32.mxu0 %vm5781_vm1, %v4613_v2 }
 0xe47   :  { %4417 = vmatprep.subr.mxu0 %v4613_v2 }
 0xe48   :  { %4418 = vmatpush3.msra.mxu0 %v1928_v35 }
 0xe49   :  { %4419 = vmatprep.subr.mxu0 %v4613_v2 }
 0xe4a   :  { %4420 = vmatpush3.msra.mxu0 %v1927_v36 }
 0xe4b   :  { %4421 = vmatprep.subr.mxu0 %v4613_v2 }
 0xe4c   :  { %4422 = vmatpush3.msra.mxu0 %v1926_v19 }
 0xe4d   :  { %4423 = vmatprep.subr.mxu0 %v4613_v2 }
 0xe4e   :  { %4424 = vmatpush3.msra.mxu0 %v1925_v18 }
 0xe4f   :  { %4425 = vmatprep.subr.mxu0 %v4613_v2 }
 0xe50   :  { %4426 = vmatpush3.msra.mxu0 %v1924_v37 }
 0xe51   :  { %4427 = vmatprep.subr.mxu0 %v4613_v2 }
 0xe52   :  { %4428 = vmatpush3.msra.mxu0 %v1923_v38 }
 0xe53   :  { %4429 = vmatprep.subr.mxu0 %v4613_v2 }
 0xe54   :  { %4430 = vmatpush3.msra.mxu0 %v1922_v39 }
 0xe55   :  { %4432 = vmatmul.mubr.msk.f32.vlgmr.msra.gmra.mxu0 %vm391_vm2, %v5214_v16  ;;  %4453 = vmatprep.subr.mxu0 %v4613_v2 }
 0xe56   :  { %4455 = vmatprep.mubr.msk.f32.mxu0 %vm5781_vm1, %v4613_v2 }
 0xef5   :  { %v5402_v40 = vpop.f32.mrf.mxu0 }
 0xef7   :  { %v4371_v42 = vpop.f32.mrf.mxu0 }
 0xf05   :  { %v2572_v44 = vpop.f32.mrf.mxu0 }
 0xf06   :  { %v2573_v45 = vadd.f32 %v4053_v43, %v2572_v44 }
 0xf07   :  { %v4409_v41 = vpop.f32.mrf.mxu0 }
 0xf08   :  { %v2577_v46 = vcombine.high %v2573_v45, %v2573_v45  ;;  %v2584_v47 = vrot.slane %v2573_v45, %v4764_v23 }
 0xf0a   :  { %v2591_v49 = vrot.slane %v2577_v46, %v4764_v23  ;;  %v2592_v50 = vcombine.high %v2584_v47, %v2584_v47  ;;  %v2600_v51 = vrot.slane %v2584_v47, %v4764_v23 }
 0xf0c   :  { %v2593_v52 = vcombine.high %v2591_v49, %v2591_v49  ;;  %v2607_v53 = vrot.slane %v2591_v49, %v4764_v23  ;;  %v2614_v54 = vrot.slane %v2592_v50, %v4764_v23  ;;  %v2622_v55 = vcombine.high %v2600_v51, %v2600_v51 }
 0xf0d   :  { %v2629_v56 = vrot.slane %v2600_v51, %v4767_v29 }
 0xf0e   :  { %v2621_v57 = vrot.slane %v2593_v52, %v4764_v23  ;;  %v2624_v58 = vcombine.high %v2614_v54, %v2614_v54  ;;  %v2633_v59 = vrot.slane %v2614_v54, %v4767_v29  ;;  %v2637_v60 = vrot.slane %v2622_v55, %v4767_v29 }
 0xf0f   :  { %v2645_v61 = vrot.slane %v2607_v53, %v4767_v29  ;;  %v2666_v62 = vadd.f32 %v2629_v56, %v5294_v28  ;;  %v2623_v63 = vcombine.high %v2607_v53, %v2607_v53 }
 0xf10   :  { %v2667_v0 = vadd.f32 %v2633_v59, %v5294_v28  ;;  %v2641_v1 = vrot.slane %v2624_v58, %v4767_v29  ;;  %v2649_v3 = vrot.slane %v2621_v57, %v4767_v29  ;;  %v2668_v7 = vadd.f32 %v2637_v60, %v5294_v28 }
 0xf11   :  { %vm2674_vm9 = vcmp.ge.f32.partialorder %v2666_v62, 0.0  ;;  %v2682_v5 = vmul.f32 0.2, %v2666_v62  ;;  %v2670_v8 = vadd.f32 %v2645_v61, %v5294_v28  ;;  %v2625_v6 = vcombine.high %v2621_v57, %v2621_v57 }
 0xf12   :  { %vm2675_vm10 = vcmp.ge.f32.partialorder %v2667_v0, 0.0  ;;  %v2683_v9 = vmul.f32 0.2, %v2667_v0  ;;  %v2669_v10 = vadd.f32 %v2641_v1, %v5294_v28  ;;  %v2671_v11 = vadd.f32 %v2649_v3, %v5294_v28 }
 0xf13   :  { %v2690_v15 = vsel %vm2674_vm9, %v2666_v62, %v2682_v5  ;;  %vm2676_vm7 = vcmp.ge.f32.partialorder %v2668_v7, 0.0  ;;  %v2684_v17 = vmul.f32 0.2, %v2668_v7  ;;  %v2686_v31 = vmul.f32 0.2, %v2670_v8 }
 0xf14   :  { %v2704_v20 = vmul.f32 %v4055_v4, %v2690_v15  ;;  %v2691_v22 = vsel %vm2675_vm10, %v2667_v0, %v2683_v9  ;;  %vm2677_vm6 = vcmp.ge.f32.partialorder %v2669_v10, 0.0  ;;  %v2685_v24 = vmul.f32 0.2, %v2669_v10 }
 0xf15   :  { %v2936_v25 = vpop.f32.mrf.mxu0  ;;  %v2705_v27 = vmul.f32 %v4055_v4, %v2691_v22  ;;  %v2692_v30 = vsel %vm2676_vm7, %v2668_v7, %v2684_v17  ;;  %vm2678_vm8 = vcmp.ge.f32.partialorder %v2670_v8, 0.0  ;;  %v2687_v34 = vmul.f32 0.2, %v2671_v11 }
 0xf16   :  { %v5431_v32 = vadd.f32 %v4057_v13, %v2936_v25  ;;  %2712 = vadd.xlane.f32.xlu0 %v2704_v20  ;;  %v2693_v33 = vsel %vm2677_vm6, %v2669_v10, %v2685_v24  ;;  %vm2679_vm0 = vcmp.ge.f32.partialorder %v2671_v11, 0.0  ;;  %v2653_v21 = vrot.slane %v2623_v63, %v4767_v29 }
 0xf17   :  { %v4433_v26 = vpop.f32.mrf.mxu0  ;;  %2714 = vadd.xlane.f32.xlu1 %v2705_v27  ;;  %v2657_v35 = vrot.slane %v2625_v6, %v4767_v29  ;;  %v2706_v36 = vmul.f32 %v4055_v4, %v2692_v30  ;;  %v2707_v19 = vmul.f32 %v4055_v4, %v2693_v33  ;;  %v2694_v18 = vsel %vm2678_vm8, %v2670_v8, %v2686_v31  ;;  %v1965_v31 = vld [vmem:[%s5770_s10 + $0xb8] sm:$0xff]  ;;  %v1964_v33 = vld [vmem:[%s5770_s10 + $0xb0] sm:$0xff] }
 0xf18   :  { %4454 = vmatpush3.msra.mxu0 %v5431_v32  ;;  %v2672_v37 = vadd.f32 %v2653_v21, %v5294_v28  ;;  %v2695_v39 = vsel %vm2679_vm0, %v2671_v11, %v2687_v34  ;;  %v2708_v44 = vmul.f32 %v4055_v4, %v2694_v18  ;;  %vm5794_vm7 = vcmask 64512   ;;  %v1963_v34 = vld [vmem:[%s5770_s10 + $0xa8] sm:$0xff]  ;;  %v1962_v26 = vld [vmem:[%s5770_s10 + $0xa0] sm:$0xff]  ;;  %v1961_v21 = vld [vmem:[%s5770_s10 + $0x98] sm:$0xff] }
 0xf19   :  { %v2673_v38 = vadd.f32 %v2657_v35, %v5294_v28  ;;  %4477 = vmatprep.subr.mxu0 %v4613_v2  ;;  %v2709_v45 = vmul.f32 %v4055_v4, %v2695_v39  ;;  %vm5795_vm6 = vmmov %vm5794_vm7  ;;  %v1960_v35 = vld [vmem:[%s5770_s10 + $0x90] sm:$0xff]  ;;  %v1937_v18 = vld [vmem:[%s5768_s8 + $0xf8] sm:$0xff] }
 0xf1a   :  { %2716 = vadd.xlane.f32.xlu0 %v2706_v36  ;;  %vm2680_vm9 = vcmp.ge.f32.partialorder %v2672_v37, 0.0  ;;  %v2688_v42 = vmul.f32 0.2, %v2672_v37  ;;  %vm5796_vm8 = vmmov %vm5795_vm6  ;;  %v1959_v36 = vld [vmem:[%s5770_s10 + $0x88] sm:$0xff]  ;;  %v1934_v39 = vld [vmem:[%s5768_s8 + $0xe0] sm:$0xff] }
 0xf1b   :  { %2718 = vadd.xlane.f32.xlu1 %v2707_v19  ;;  %vm2681_vm10 = vcmp.ge.f32.partialorder %v2673_v38, 0.0  ;;  %v2689_v43 = vmul.f32 0.2, %v2673_v38  ;;  %v1958_v19 = vld [vmem:[%s5770_s10 + $0x80] sm:$0xff] }
 0xf1c   :  { %v2696_v41 = vsel %vm2680_vm9, %v2672_v37, %v2688_v42  ;;  %v1936_v37 = vld [vmem:[%s5768_s8 + $0xf0] sm:$0xff]  ;;  %v1933_v42 = vld [vmem:[%s5768_s8 + $0xd8] sm:$0xff] }
 0xf1d   :  { %v2697_v46 = vsel %vm2681_vm10, %v2673_v38, %v2689_v43  ;;  %v2710_v47 = vmul.f32 %v4055_v4, %v2696_v41  ;;  %v1935_v38 = vld [vmem:[%s5768_s8 + $0xe8] sm:$0xff]  ;;  %v1932_v43 = vld [vmem:[%s5768_s8 + $0xd0] sm:$0xff] }
 0xf1e   :  { %2720 = vadd.xlane.f32.xlu0 %v2708_v44  ;;  %v2711_v49 = vmul.f32 %v4055_v4, %v2697_v46  ;;  %v1931_v44 = vld [vmem:[%s5768_s8 + $0xc8] sm:$0xff] }
 0xf1f   :  { %2722 = vadd.xlane.f32.xlu1 %v2709_v45  ;;  %v1930_v45 = vld [vmem:[%s5768_s8 + $0xc0] sm:$0xff] }
 0xf22   :  { %2724 = vadd.xlane.f32.xlu0 %v2710_v47  ;;  %v4059_v47 = vld [vmem:[%s5771_s11 + $0x2] ss:$0 sm:$0xff] }
 0xf23   :  { %2726 = vadd.xlane.f32.xlu1 %v2711_v49 }
 0xf9f   :  { %v2713_v28 = vpop.xlane.xlu0 %2712 }
 0xfa0   :  { %v2715_v50 = vpop.xlane.xlu1 %2714  ;;  %v2739_v51 = vrot.slane %v2713_v28, %v4752_v14 }
 0xfa1   :  { %v2743_v52 = vrot.slane %v2715_v50, %v4752_v14 }
 0xfa3   :  { %v2768_v53 = vsel %vm459_vm11, %v2743_v52, %v2739_v51  ;;  %v2717_v54 = vpop.xlane.xlu0 %2716 }
 0xfa4   :  { %v2747_v55 = vrot.slane %v2717_v54, %v4752_v14  ;;  %v2719_v56 = vpop.xlane.xlu1 %2718 }
 0xfa5   :  { %v2751_v57 = vrot.slane %v2719_v56, %v4752_v14 }
 0xfa6   :  { %v2769_v58 = vsel %vm461_vm12, %v2747_v55, %v2768_v53 }
 0xfa7   :  { %v2770_v59 = vsel %vm463_vm13, %v2751_v57, %v2769_v58  ;;  %v2721_v60 = vpop.xlane.xlu0 %2720 }
 0xfa8   :  { %v2755_v61 = vrot.slane %v2721_v60, %v4752_v14  ;;  %v2723_v62 = vpop.xlane.xlu1 %2722 }
 0xfa9   :  { %v2759_v63 = vrot.slane %v2723_v62, %v4752_v14 }
 0xfaa   :  { %v2771_v0 = vsel %vm465_vm14, %v2755_v61, %v2770_v59 }
 0xfab   :  { %v2772_v1 = vsel %vm467_vm15, %v2759_v63, %v2771_v0  ;;  %v2725_v3 = vpop.xlane.xlu0 %2724 }
 0xfac   :  { %v2763_v4 = vrot.slane %v2725_v3, %v4752_v14  ;;  %v2727_v5 = vpop.xlane.xlu1 %2726 }
 0xfad   :  { %v2767_v7 = vrot.slane %v2727_v5, %v4752_v14 }
 0xfae   :  { %v2773_v8 = vsel %vm469_vm3, %v2763_v4, %v2772_v1 }
 0xfaf   :  { %v2774_v9 = vsel %vm471_vm4, %v2767_v7, %v2773_v8 }
 0xfb0   :  { %v2776_v10 = vsel %vm416_vm5, %v2774_v9, -1e+30  ;;  %v4061_v9 = vld [vmem:[%s5772_s12 + $0x2] ss:$0 sm:$0xff] }
 0xfb1   :  { %v2777_v11 = vsel %vm5794_vm7, %v2776_v10, -inf }
 0xfb2   :  { %2778 = vmax.xlane.f32.xlu0 %v2777_v11 }
0x103b   :  { %v2779_v6 = vpop.xlane.xlu0 %2778 }
0x103c   :  { %v2780_v13 = vsub.f32 %v2776_v10, %v2779_v6 }
0x103e   :  { %v2781_v15 = vmul.f32 1.442695, %v2780_v13 }
0x1040   :  { %4573 = vpow2.f32 %v2781_v15 }
0x104d   :  { %v4574_v17 = vpop.eup %4573 }
0x104e   :  { %v2783_v20 = vmul.f32 %v5323_v12, %v4574_v17 }
0x1050   :  { %v2784_v22 = vsel %vm5795_vm6, %v2783_v20, 0.0 }
0x1051   :  { %2785 = vadd.xlane.f32.xlu1 %v2784_v22 }
0x10da   :  { %v2786_v24 = vpop.xlane.xlu1 %2785 }
0x10db   :  { %v2787_v25 = vmax.f32 %v2786_v24, 1e-30  ;;  %v4063_v24 = vld [vmem:[%s5769_s9 + $0x3] ss:$0 sm:$0xff] }
0x10dd   :  { %4575 = vrcp.f32 %v2787_v25 }
0x10ea   :  { %v4576_v27 = vpop.eup %4575 }
0x10eb   :  { %v2789_v30 = vmul.f32 %v4576_v27, %v2783_v20 }
0x10ed   :  { %4413 = vmatmul.mubr.msk.f32.vlgmr.msra.gmra.mxu1 %vm5796_vm8, %v2789_v30 }
0x10ee   :  { %4435 = vmatpush3.msra.mxu1 %v1965_v31  ;;  %4450 = vmatprep.mubr.msk.f32.mxu1 %vm5781_vm1, %v4613_v2 }
0x10ef   :  { %4436 = vmatprep.subr.mxu1 %v4613_v2 }
0x10f0   :  { %4437 = vmatpush3.msra.mxu1 %v1964_v33 }
0x10f1   :  { %4438 = vmatprep.subr.mxu1 %v4613_v2 }
0x10f2   :  { %4439 = vmatpush3.msra.mxu1 %v1963_v34 }
0x10f3   :  { %4440 = vmatprep.subr.mxu1 %v4613_v2 }
0x10f4   :  { %4441 = vmatpush3.msra.mxu1 %v1962_v26 }
0x10f5   :  { %4442 = vmatprep.subr.mxu1 %v4613_v2 }
0x10f6   :  { %4443 = vmatpush3.msra.mxu1 %v1961_v21 }
0x10f7   :  { %4444 = vmatprep.subr.mxu1 %v4613_v2 }
0x10f8   :  { %4445 = vmatpush3.msra.mxu1 %v1960_v35 }
0x10f9   :  { %4446 = vmatprep.subr.mxu1 %v4613_v2 }
0x10fa   :  { %4447 = vmatpush3.msra.mxu1 %v1959_v36 }
0x10fb   :  { %4448 = vmatprep.subr.mxu1 %v4613_v2 }
0x10fc   :  { %4449 = vmatpush3.msra.mxu1 %v1958_v19 }
0x10fd   :  { %4451 = vmatmul.mubr.msk.f32.vlgmr.msra.gmra.mxu1 %vm391_vm2, %v5214_v16  ;;  %4458 = vmatprep.subr.mxu1 %v4613_v2 }
0x10fe   :  { %4459 = vmatpush3.msra.mxu1 %v1937_v18  ;;  %4474 = vmatprep.mubr.msk.f32.mxu1 %vm5781_vm1, %v4613_v2 }
0x10ff   :  { %4460 = vmatprep.subr.mxu1 %v4613_v2 }
0x1100   :  { %4461 = vmatpush3.msra.mxu1 %v1936_v37 }
0x1101   :  { %4462 = vmatprep.subr.mxu1 %v4613_v2 }
0x1102   :  { %4463 = vmatpush3.msra.mxu1 %v1935_v38 }
0x1103   :  { %4464 = vmatprep.subr.mxu1 %v4613_v2 }
0x1104   :  { %4465 = vmatpush3.msra.mxu1 %v1934_v39 }
0x1105   :  { %4466 = vmatprep.subr.mxu1 %v4613_v2 }
0x1106   :  { %4467 = vmatpush3.msra.mxu1 %v1933_v42 }
0x1107   :  { %4468 = vmatprep.subr.mxu1 %v4613_v2 }
0x1108   :  { %4469 = vmatpush3.msra.mxu1 %v1932_v43 }
0x1109   :  { %4470 = vmatprep.subr.mxu1 %v4613_v2 }
0x110a   :  { %4471 = vmatpush3.msra.mxu1 %v1931_v44 }
0x110b   :  { %4472 = vmatprep.subr.mxu1 %v4613_v2 }
0x110c   :  { %4473 = vmatpush3.msra.mxu1 %v1930_v45 }
0x110d   :  { %4475 = vmatmul.mubr.msk.f32.vlgmr.msra.gmra.mxu1 %vm391_vm2, %v5214_v16  ;;  %4496 = vmatprep.subr.mxu1 %v4613_v2 }
0x110e   :  { %4498 = vmatprep.mubr.msk.f32.mxu1 %vm5781_vm1, %v4613_v2 }
0x11ad   :  { %v5534_v41 = vpop.f32.mrf.mxu1 }
0x11af   :  { %v4414_v46 = vpop.f32.mrf.mxu1 }
0x11bd   :  { %v3012_v49 = vpop.f32.mrf.mxu1 }
0x11be   :  { %v3013_v28 = vadd.f32 %v4059_v47, %v3012_v49 }
0x11bf   :  { %v4452_v50 = vpop.f32.mrf.mxu1 }
0x11c0   :  { %v3017_v51 = vcombine.high %v3013_v28, %v3013_v28  ;;  %v3024_v52 = vrot.slane %v3013_v28, %v4764_v23 }
0x11c2   :  { %v3031_v53 = vrot.slane %v3017_v51, %v4764_v23  ;;  %v3032_v54 = vcombine.high %v3024_v52, %v3024_v52  ;;  %v3040_v55 = vrot.slane %v3024_v52, %v4764_v23 }
0x11c4   :  { %v3033_v56 = vcombine.high %v3031_v53, %v3031_v53  ;;  %v3047_v57 = vrot.slane %v3031_v53, %v4764_v23  ;;  %v3054_v58 = vrot.slane %v3032_v54, %v4764_v23  ;;  %v3062_v59 = vcombine.high %v3040_v55, %v3040_v55 }
0x11c5   :  { %v3069_v60 = vrot.slane %v3040_v55, %v4767_v29 }
0x11c6   :  { %v3061_v61 = vrot.slane %v3033_v56, %v4764_v23  ;;  %v3064_v62 = vcombine.high %v3054_v58, %v3054_v58  ;;  %v3073_v63 = vrot.slane %v3054_v58, %v4767_v29  ;;  %v3077_v0 = vrot.slane %v3062_v59, %v4767_v29 }
0x11c7   :  { %v3085_v1 = vrot.slane %v3047_v57, %v4767_v29  ;;  %v3106_v3 = vadd.f32 %v3069_v60, %v5431_v32  ;;  %v3063_v4 = vcombine.high %v3047_v57, %v3047_v57 }
0x11c8   :  { %v3107_v5 = vadd.f32 %v3073_v63, %v5431_v32  ;;  %v3081_v7 = vrot.slane %v3064_v62, %v4767_v29  ;;  %v3089_v8 = vrot.slane %v3061_v61, %v4767_v29  ;;  %v3108_v11 = vadd.f32 %v3077_v0, %v5431_v32 }
0x11c9   :  { %vm3114_vm0 = vcmp.ge.f32.partialorder %v3106_v3, 0.0  ;;  %v3122_v10 = vmul.f32 0.2, %v3106_v3  ;;  %v3110_v6 = vadd.f32 %v3085_v1, %v5431_v32  ;;  %v3065_v20 = vcombine.high %v3061_v61, %v3061_v61 }
0x11ca   :  { %vm3115_vm9 = vcmp.ge.f32.partialorder %v3107_v5, 0.0  ;;  %v3123_v13 = vmul.f32 0.2, %v3107_v5  ;;  %v3109_v15 = vadd.f32 %v3081_v7, %v5431_v32  ;;  %v3111_v17 = vadd.f32 %v3089_v8, %v5431_v32 }
0x11cb   :  { %v3130_v22 = vsel %vm3114_vm0, %v3106_v3, %v3122_v10  ;;  %vm3116_vm10 = vcmp.ge.f32.partialorder %v3108_v11, 0.0  ;;  %v3124_v25 = vmul.f32 0.2, %v3108_v11  ;;  %v3126_v21 = vmul.f32 0.2, %v3110_v6 }
0x11cc   :  { %v3144_v27 = vmul.f32 %v4061_v9, %v3130_v22  ;;  %v3131_v30 = vsel %vm3115_vm9, %v3107_v5, %v3123_v13  ;;  %vm3117_vm7 = vcmp.ge.f32.partialorder %v3109_v15, 0.0  ;;  %v3125_v31 = vmul.f32 0.2, %v3109_v15 }
0x11cd   :  { %v3376_v33 = vpop.f32.mrf.mxu1  ;;  %v3145_v34 = vmul.f32 %v4061_v9, %v3131_v30  ;;  %v3132_v26 = vsel %vm3116_vm10, %v3108_v11, %v3124_v25  ;;  %vm3118_vm6 = vcmp.ge.f32.partialorder %v3110_v6, 0.0  ;;  %v3127_v19 = vmul.f32 0.2, %v3111_v17 }
0x11ce   :  { %3152 = vadd.xlane.f32.xlu0 %v3144_v27  ;;  %v5563_v35 = vadd.f32 %v4063_v24, %v3376_v33  ;;  %v3133_v36 = vsel %vm3117_vm7, %v3109_v15, %v3125_v31  ;;  %vm3119_vm8 = vcmp.ge.f32.partialorder %v3111_v17, 0.0  ;;  %v3093_v37 = vrot.slane %v3063_v4, %v4767_v29 }
0x11cf   :  { %3154 = vadd.xlane.f32.xlu1 %v3145_v34  ;;  %v4476_v18 = vpop.f32.mrf.mxu1  ;;  %v3097_v38 = vrot.slane %v3065_v20, %v4767_v29  ;;  %v3146_v39 = vmul.f32 %v4061_v9, %v3132_v26  ;;  %v3147_v42 = vmul.f32 %v4061_v9, %v3133_v36  ;;  %v3134_v43 = vsel %vm3118_vm6, %v3110_v6, %v3126_v21  ;;  %v1973_v36 = vld [vmem:[%s5770_s10 + $0xf8] sm:$0xff] }
0x11d0   :  { %4497 = vmatpush3.msra.mxu1 %v5563_v35  ;;  %v3112_v44 = vadd.f32 %v3093_v37, %v5431_v32  ;;  %v3135_v46 = vsel %vm3119_vm8, %v3111_v17, %v3127_v19  ;;  %v3148_v28 = vmul.f32 %v4061_v9, %v3134_v43  ;;  %vm5797_vm10 = vcmask 64512   ;;  %v1972_v19 = vld [vmem:[%s5770_s10 + $0xf0] sm:$0xff]  ;;  %v1971_v18 = vld [vmem:[%s5770_s10 + $0xe8] sm:$0xff]  ;;  %v1970_v37 = vld [vmem:[%s5770_s10 + $0xe0] sm:$0xff] }
0x11d1   :  { %v3113_v45 = vadd.f32 %v3097_v38, %v5431_v32  ;;  %4536 = vmatprep.subr.mxu1 %v4613_v2  ;;  %v3149_v50 = vmul.f32 %v4061_v9, %v3135_v46  ;;  %vm5798_vm7 = vmmov %vm5797_vm10  ;;  %v1969_v38 = vld [vmem:[%s5770_s10 + $0xd8] sm:$0xff]  ;;  %v1966_v43 = vld [vmem:[%s5770_s10 + $0xc0] sm:$0xff] }
0x11d2   :  { %3156 = vadd.xlane.f32.xlu0 %v3146_v39  ;;  %vm3120_vm0 = vcmp.ge.f32.partialorder %v3112_v44, 0.0  ;;  %v3128_v47 = vmul.f32 0.2, %v3112_v44  ;;  %vm5799_vm6 = vmmov %vm5798_vm7  ;;  %v1968_v39 = vld [vmem:[%s5770_s10 + $0xd0] sm:$0xff] }
0x11d3   :  { %3158 = vadd.xlane.f32.xlu1 %v3147_v42  ;;  %vm3121_vm9 = vcmp.ge.f32.partialorder %v3113_v45, 0.0  ;;  %v3129_v49 = vmul.f32 0.2, %v3113_v45  ;;  %v1967_v42 = vld [vmem:[%s5770_s10 + $0xc8] sm:$0xff] }
0x11d4   :  { %v3136_v51 = vsel %vm3120_vm0, %v3112_v44, %v3128_v47  ;;  %v2863_v44 = vmax.f32 %v5402_v40, %v5534_v41 }
0x11d5   :  { %v3137_v52 = vsel %vm3121_vm9, %v3113_v45, %v3129_v49  ;;  %v3150_v53 = vmul.f32 %v4061_v9, %v3136_v51  ;;  %v4065_v49 = vld [vmem:[%s5771_s11 + $0x3] ss:$0 sm:$0xff] }
0x11d6   :  { %3160 = vadd.xlane.f32.xlu0 %v3148_v28  ;;  %v3151_v54 = vmul.f32 %v4061_v9, %v3137_v52 }
0x11d7   :  { %3162 = vadd.xlane.f32.xlu1 %v3149_v50 }
0x11da   :  { %3164 = vadd.xlane.f32.xlu0 %v3150_v53 }
0x11db   :  { %3166 = vadd.xlane.f32.xlu1 %v3151_v54 }
0x1257   :  { %v3153_v32 = vpop.xlane.xlu0 %3152 }
0x1258   :  { %v3155_v55 = vpop.xlane.xlu1 %3154  ;;  %v3179_v56 = vrot.slane %v3153_v32, %v4752_v14 }
0x1259   :  { %v3183_v57 = vrot.slane %v3155_v55, %v4752_v14 }
0x125b   :  { %v3208_v58 = vsel %vm459_vm11, %v3183_v57, %v3179_v56  ;;  %v3157_v59 = vpop.xlane.xlu0 %3156 }
0x125c   :  { %v3187_v60 = vrot.slane %v3157_v59, %v4752_v14  ;;  %v3159_v61 = vpop.xlane.xlu1 %3158 }
0x125d   :  { %v3191_v62 = vrot.slane %v3159_v61, %v4752_v14 }
0x125e   :  { %v3209_v63 = vsel %vm461_vm12, %v3187_v60, %v3208_v58 }
0x125f   :  { %v3210_v0 = vsel %vm463_vm13, %v3191_v62, %v3209_v63  ;;  %v3161_v1 = vpop.xlane.xlu0 %3160 }
0x1260   :  { %v3195_v3 = vrot.slane %v3161_v1, %v4752_v14  ;;  %v3163_v4 = vpop.xlane.xlu1 %3162 }
0x1261   :  { %v3199_v5 = vrot.slane %v3163_v4, %v4752_v14 }
0x1262   :  { %v3211_v7 = vsel %vm465_vm14, %v3195_v3, %v3210_v0 }
0x1263   :  { %v3212_v8 = vsel %vm467_vm15, %v3199_v5, %v3211_v7  ;;  %v3165_v9 = vpop.xlane.xlu0 %3164 }
0x1264   :  { %v3203_v10 = vrot.slane %v3165_v9, %v4752_v14  ;;  %v3167_v11 = vpop.xlane.xlu1 %3166 }
0x1265   :  { %v3207_v6 = vrot.slane %v3167_v11, %v4752_v14 }
0x1266   :  { %v3213_v13 = vsel %vm469_vm3, %v3203_v10, %v3212_v8 }
0x1267   :  { %v3214_v15 = vsel %vm471_vm4, %v3207_v6, %v3213_v13 }
0x1268   :  { %v3216_v17 = vsel %vm416_vm5, %v3214_v15, -1e+30 }
0x1269   :  { %v3217_v20 = vsel %vm5797_vm10, %v3216_v17, -inf }
0x126a   :  { %3218 = vmax.xlane.f32.xlu0 %v3217_v20 }
0x12f3   :  { %v3219_v22 = vpop.xlane.xlu0 %3218 }
0x12f4   :  { %v3220_v24 = vsub.f32 %v3216_v17, %v3219_v22 }
0x12f6   :  { %v3221_v25 = vmul.f32 1.442695, %v3220_v24 }
0x12f8   :  { %4577 = vpow2.f32 %v3221_v25 }
0x1305   :  { %v4578_v27 = vpop.eup %4577 }
0x1306   :  { %v3223_v30 = vmul.f32 %v5323_v12, %v4578_v27 }
0x1308   :  { %v3224_v31 = vsel %vm5798_vm7, %v3223_v30, 0.0 }
0x1309   :  { %3225 = vadd.xlane.f32.xlu1 %v3224_v31 }
0x1392   :  { %v3226_v33 = vpop.xlane.xlu1 %3225 }
0x1393   :  { %v3227_v34 = vmax.f32 %v3226_v33, 1e-30 }
0x1395   :  { %4579 = vrcp.f32 %v3227_v34 }
0x13a2   :  { %v4580_v26 = vpop.eup %4579 }
0x13a3   :  { %v3229_v21 = vmul.f32 %v4580_v26, %v3223_v30 }
0x13a5   :  { %4456 = vmatmul.mubr.msk.f32.vlgmr.msra.gmra.mxu0 %vm5799_vm6, %v3229_v21 }
0x13a6   :  { %4478 = vmatpush3.msra.mxu0 %v1973_v36  ;;  %4493 = vmatprep.mubr.msk.f32.mxu0 %vm5781_vm1, %v4613_v2 }
0x13a7   :  { %4479 = vmatprep.subr.mxu0 %v4613_v2 }
0x13a8   :  { %4480 = vmatpush3.msra.mxu0 %v1972_v19 }
0x13a9   :  { %4481 = vmatprep.subr.mxu0 %v4613_v2 }
0x13aa   :  { %4482 = vmatpush3.msra.mxu0 %v1971_v18 }
0x13ab   :  { %4483 = vmatprep.subr.mxu0 %v4613_v2 }
0x13ac   :  { %4484 = vmatpush3.msra.mxu0 %v1970_v37 }
0x13ad   :  { %4485 = vmatprep.subr.mxu0 %v4613_v2 }
0x13ae   :  { %4486 = vmatpush3.msra.mxu0 %v1969_v38 }
0x13af   :  { %4487 = vmatprep.subr.mxu0 %v4613_v2 }
0x13b0   :  { %4488 = vmatpush3.msra.mxu0 %v1968_v39 }
0x13b1   :  { %4489 = vmatprep.subr.mxu0 %v4613_v2 }
0x13b2   :  { %4490 = vmatpush3.msra.mxu0 %v1967_v42 }
0x13b3   :  { %4491 = vmatprep.subr.mxu0 %v4613_v2 }
0x13b4   :  { %4492 = vmatpush3.msra.mxu0 %v1966_v43 }
0x13b5   :  { %4494 = vmatmul.mubr.msk.f32.vlgmr.msra.gmra.mxu0 %vm391_vm2, %v5214_v16  ;;  %4501 = vmatprep.subr.mxu0 %v4613_v2 }
0x13b6   :  { %4533 = vmatprep.mubr.msk.f32.mxu0 %vm5781_vm1, %v4613_v2 }
0x1465   :  { %v3299_v45 = vpop.f32.mrf.mxu0 }
0x1466   :  { %v5632_v46 = vmax.f32 %v2863_v44, %v3299_v45 }
0x1467   :  { %v4457_v47 = vpop.f32.mrf.mxu0 }
0x1475   :  { %v3452_v28 = vpop.f32.mrf.mxu0 }
0x1476   :  { %v3453_v50 = vadd.f32 %v4065_v49, %v3452_v28 }
0x1477   :  { %v4495_v51 = vpop.f32.mrf.mxu0 }
0x1478   :  { %v3457_v16 = vcombine.high %v3453_v50, %v3453_v50  ;;  %v3464_v52 = vrot.slane %v3453_v50, %v4764_v23 }
0x147a   :  { %v3471_v53 = vrot.slane %v3457_v16, %v4764_v23  ;;  %v3472_v54 = vcombine.high %v3464_v52, %v3464_v52  ;;  %v3480_v32 = vrot.slane %v3464_v52, %v4764_v23 }
0x147c   :  { %v3473_v40 = vcombine.high %v3471_v53, %v3471_v53  ;;  %v3487_v41 = vrot.slane %v3471_v53, %v4764_v23  ;;  %v3494_v55 = vrot.slane %v3472_v54, %v4764_v23  ;;  %v3502_v56 = vcombine.high %v3480_v32, %v3480_v32 }
0x147d   :  { %v3509_v57 = vrot.slane %v3480_v32, %v4767_v29 }
0x147e   :  { %v3501_v58 = vrot.slane %v3473_v40, %v4764_v23  ;;  %v3504_v59 = vcombine.high %v3494_v55, %v3494_v55  ;;  %v3513_v60 = vrot.slane %v3494_v55, %v4767_v29  ;;  %v3517_v61 = vrot.slane %v3502_v56, %v4767_v29  ;;  %v4067_v23 = vld [vmem:[%s5772_s12 + $0x3] ss:$0 sm:$0xff] }
0x147f   :  { %v3525_v62 = vrot.slane %v3487_v41, %v4767_v29  ;;  %v3546_v63 = vadd.f32 %v3509_v57, %v5563_v35  ;;  %v3503_v0 = vcombine.high %v3487_v41, %v3487_v41 }
0x1480   :  { %v3547_v1 = vadd.f32 %v3513_v60, %v5563_v35  ;;  %v3521_v3 = vrot.slane %v3504_v59, %v4767_v29  ;;  %v3529_v4 = vrot.slane %v3501_v58, %v4767_v29  ;;  %v3548_v7 = vadd.f32 %v3517_v61, %v5563_v35 }
0x1481   :  { %vm3554_vm2 = vcmp.ge.f32.partialorder %v3546_v63, 0.0  ;;  %v3562_v5 = vmul.f32 0.2, %v3546_v63  ;;  %v3550_v8 = vadd.f32 %v3525_v62, %v5563_v35  ;;  %v3505_v6 = vcombine.high %v3501_v58, %v3501_v58 }
0x1482   :  { %vm3555_vm8 = vcmp.ge.f32.partialorder %v3547_v1, 0.0  ;;  %v3563_v9 = vmul.f32 0.2, %v3547_v1  ;;  %v3549_v10 = vadd.f32 %v3521_v3, %v5563_v35  ;;  %v3551_v11 = vadd.f32 %v3529_v4, %v5563_v35 }
0x1483   :  { %v3570_v13 = vsel %vm3554_vm2, %v3546_v63, %v3562_v5  ;;  %vm3556_vm0 = vcmp.ge.f32.partialorder %v3548_v7, 0.0  ;;  %v3564_v15 = vmul.f32 0.2, %v3548_v7  ;;  %v3566_v27 = vmul.f32 0.2, %v3550_v8 }
0x1484   :  { %v3584_v17 = vmul.f32 %v4067_v23, %v3570_v13  ;;  %v3571_v20 = vsel %vm3555_vm8, %v3547_v1, %v3563_v9  ;;  %vm3557_vm9 = vcmp.ge.f32.partialorder %v3549_v10, 0.0  ;;  %v3565_v22 = vmul.f32 0.2, %v3549_v10  ;;  %v3754_v13 = vld [vmem:[%s5773_s13 + $0x50] sm:$0xff] }
0x1485   :  { %v3585_v24 = vmul.f32 %v4067_v23, %v3571_v20  ;;  %v3572_v25 = vsel %vm3556_vm0, %v3548_v7, %v3564_v15  ;;  %vm3558_vm10 = vcmp.ge.f32.partialorder %v3550_v8, 0.0  ;;  %v3567_v31 = vmul.f32 0.2, %v3551_v11  ;;  %v3753_v15 = vld [vmem:[%s5773_s13 + $0x48] sm:$0xff]  ;;  %v3751_v20 = vld [vmem:[%s5773_s13 + $0x38] sm:$0xff] }
0x1486   :  { %3592 = vadd.xlane.f32.xlu0 %v3584_v17  ;;  %v3573_v30 = vsel %vm3557_vm9, %v3549_v10, %v3565_v22  ;;  %v3533_v33 = vrot.slane %v3503_v0, %v4767_v29  ;;  %vm3559_vm7 = vcmp.ge.f32.partialorder %v3551_v11, 0.0  ;;  %v3537_v34 = vrot.slane %v3505_v6, %v4767_v29  ;;  %v3755_v6 = vld [vmem:[%s5773_s13 + $0x58] sm:$0xff]  ;;  %v3752_v17 = vld [vmem:[%s5773_s13 + $0x40] sm:$0xff]  ;;  %v3750_v22 = vld [vmem:[%s5773_s13 + $0x30] sm:$0xff] }
0x1487   :  { %3594 = vadd.xlane.f32.xlu1 %v3585_v24  ;;  %v3586_v26 = vmul.f32 %v4067_v23, %v3572_v25  ;;  %v3587_v36 = vmul.f32 %v4067_v23, %v3573_v30  ;;  %v3574_v19 = vsel %vm3558_vm10, %v3550_v8, %v3566_v27  ;;  %v3575_v37 = vsel %vm3559_vm7, %v3551_v11, %v3567_v31  ;;  %v3757_v11 = vld [vmem:[%s5773_s13 + $0x68] sm:$0xff]  ;;  %v3748_v25 = vld [vmem:[%s5773_s13 + $0x20] sm:$0xff]  ;;  %v3747_v27 = vld [vmem:[%s5773_s13 + $0x18] sm:$0xff] }
0x1488   :  { %v3552_v21 = vadd.f32 %v3533_v33, %v5563_v35  ;;  %v3553_v18 = vadd.f32 %v3537_v34, %v5563_v35  ;;  %v3588_v42 = vmul.f32 %v4067_v23, %v3574_v19  ;;  %v3589_v43 = vmul.f32 %v4067_v23, %v3575_v37  ;;  %v3749_v24 = vld [vmem:[%s5773_s13 + $0x28] sm:$0xff]  ;;  %v3746_v30 = vld [vmem:[%s5773_s13 + $0x10] sm:$0xff] }
0x148a   :  { %3596 = vadd.xlane.f32.xlu0 %v3586_v26  ;;  %vm3560_vm6 = vcmp.ge.f32.partialorder %v3552_v21, 0.0  ;;  %v3568_v38 = vmul.f32 0.2, %v3552_v21  ;;  %vm3561_vm2 = vcmp.ge.f32.partialorder %v3553_v18, 0.0  ;;  %v3569_v39 = vmul.f32 0.2, %v3553_v18 }
0x148b   :  { %3598 = vadd.xlane.f32.xlu1 %v3587_v36  ;;  %v3744_v36 = vld [vmem:[%s5773_s13] sm:$0xff] }
0x148c   :  { %v3576_v44 = vsel %vm3560_vm6, %v3552_v21, %v3568_v38  ;;  %v3577_v45 = vsel %vm3561_vm2, %v3553_v18, %v3569_v39  ;;  %v3745_v21 = vld [vmem:[%s5773_s13 + $0x8] sm:$0xff]  ;;  %v4616_v38 = vmov 0   ;;  %v4069_v39 = vld [vmem:[#allocation2] ss:$0 sm:$0xff] }
0x148d   :  { %v3590_v29 = vmul.f32 %v4067_v23, %v3576_v44  ;;  %v3591_v47 = vmul.f32 %v4067_v23, %v3577_v45  ;;  %4551 = vset.pattern.permute.xlu0 %v4616_v38  ;;  %4552 = vset.pattern.permute.xlu1 %v4616_v38 }
0x148e   :  { %3600 = vadd.xlane.f32.xlu0 %v3588_v42 }
0x148f   :  { %3602 = vadd.xlane.f32.xlu1 %v3589_v43 }
0x1492   :  { %3604 = vadd.xlane.f32.xlu0 %v3590_v29 }
0x1493   :  { %3606 = vadd.xlane.f32.xlu1 %v3591_v47 }
0x150f   :  { %v3593_v49 = vpop.xlane.xlu0 %3592 }
0x1510   :  { %v3595_v28 = vpop.xlane.xlu1 %3594  ;;  %v3619_v35 = vrot.slane %v3593_v49, %v4752_v14 }
0x1511   :  { %v3623_v50 = vrot.slane %v3595_v28, %v4752_v14 }
0x1513   :  { %v3648_v51 = vsel %vm459_vm11, %v3623_v50, %v3619_v35  ;;  %v3597_v16 = vpop.xlane.xlu0 %3596  ;;  %vm5800_vm11 = vcmask 64512  }
0x1514   :  { %v3627_v52 = vrot.slane %v3597_v16, %v4752_v14  ;;  %v3599_v53 = vpop.xlane.xlu1 %3598 }
0x1515   :  { %v3631_v54 = vrot.slane %v3599_v53, %v4752_v14 }
0x1516   :  { %v3649_v32 = vsel %vm461_vm12, %v3627_v52, %v3648_v51  ;;  %vm5801_vm12 = vmmov %vm5800_vm11 }
0x1517   :  { %v3650_v40 = vsel %vm463_vm13, %v3631_v54, %v3649_v32  ;;  %v3601_v41 = vpop.xlane.xlu0 %3600  ;;  %vm5802_vm13 = vmmov %vm5800_vm11 }
0x1518   :  { %v3635_v55 = vrot.slane %v3601_v41, %v4752_v14  ;;  %v3603_v56 = vpop.xlane.xlu1 %3602 }
0x1519   :  { %v3639_v57 = vrot.slane %v3603_v56, %v4752_v14 }
0x151a   :  { %v3651_v58 = vsel %vm465_vm14, %v3635_v55, %v3650_v40  ;;  %vm3837_vm14 = vcmask 7168  }
0x151b   :  { %v3652_v59 = vsel %vm467_vm15, %v3639_v57, %v3651_v58  ;;  %v3605_v60 = vpop.xlane.xlu0 %3604  ;;  %vm5803_vm15 = vmmov %vm5800_vm11 }
0x151c   :  { %v3643_v61 = vrot.slane %v3605_v60, %v4752_v14  ;;  %v3607_v62 = vpop.xlane.xlu1 %3606 }
0x151d   :  { %v3647_v63 = vrot.slane %v3607_v62, %v4752_v14  ;;  %v3759_v14 = vld [vmem:[%s5773_s13 + $0x78] sm:$0xff] }
0x151e   :  { %v3653_v0 = vsel %vm469_vm3, %v3643_v61, %v3652_v59  ;;  %4502 = vmatpush3.msra.mxu0 %v3759_v14  ;;  %vm5804_vm3 = vmmov %vm5800_vm11 }
0x151f   :  { %v3654_v1 = vsel %vm471_vm4, %v3647_v63, %v3653_v0  ;;  %4503 = vmatprep.subr.mxu0 %v4613_v2 }
0x1520   :  { %v3656_v3 = vsel %vm416_vm5, %v3654_v1, -1e+30  ;;  %4504 = vmatpush3.msra.mxu0 %v3758_v48 }
0x1521   :  { %v3657_v4 = vsel %vm5800_vm11, %v3656_v3, -inf  ;;  %4505 = vmatprep.subr.mxu0 %v4613_v2 }
0x1522   :  { %3658 = vmax.xlane.f32.xlu0 %v3657_v4  ;;  %4506 = vmatpush3.msra.mxu0 %v3757_v11 }
0x1523   :  { %4507 = vmatprep.subr.mxu0 %v4613_v2 }
0x15ab   :  { %v3659_v23 = vpop.xlane.xlu0 %3658 }
0x15ac   :  { %v3660_v5 = vsub.f32 %v3656_v3, %v3659_v23 }
0x15ae   :  { %v3661_v7 = vmul.f32 1.442695, %v3660_v5 }
0x15b0   :  { %4581 = vpow2.f32 %v3661_v7 }
0x15bd   :  { %v4582_v8 = vpop.eup %4581 }
0x15be   :  { %v3663_v9 = vmul.f32 %v5323_v12, %v4582_v8  ;;  %v3756_v12 = vld [vmem:[%s5773_s13 + $0x60] sm:$0xff] }
0x15bf   :  { %4508 = vmatpush3.msra.mxu0 %v3756_v12 }
0x15c0   :  { %v3664_v10 = vsel %vm5801_vm12, %v3663_v9, 0.0  ;;  %4509 = vmatprep.subr.mxu0 %v4613_v2 }
0x15c1   :  { %3665 = vadd.xlane.f32.xlu1 %v3664_v10  ;;  %4510 = vmatpush3.msra.mxu0 %v3755_v6 }
0x15c2   :  { %4511 = vmatprep.subr.mxu0 %v4613_v2 }
0x15c3   :  { %4512 = vmatpush3.msra.mxu0 %v3754_v13 }
0x15c4   :  { %4513 = vmatprep.subr.mxu0 %v4613_v2 }
0x15c5   :  { %4514 = vmatpush3.msra.mxu0 %v3753_v15 }
0x15c6   :  { %4515 = vmatprep.subr.mxu0 %v4613_v2 }
0x15c7   :  { %4516 = vmatpush3.msra.mxu0 %v3752_v17 }
0x15c8   :  { %4517 = vmatprep.subr.mxu0 %v4613_v2 }
0x15c9   :  { %4518 = vmatpush3.msra.mxu0 %v3751_v20 }
0x15ca   :  { %4519 = vmatprep.subr.mxu0 %v4613_v2 }
0x15cb   :  { %4520 = vmatpush3.msra.mxu0 %v3750_v22 }
0x15cc   :  { %4521 = vmatprep.subr.mxu0 %v4613_v2 }
0x15cd   :  { %4522 = vmatpush3.msra.mxu0 %v3749_v24 }
0x15ce   :  { %4523 = vmatprep.subr.mxu0 %v4613_v2 }
0x15cf   :  { %4524 = vmatpush3.msra.mxu0 %v3748_v25 }
0x15d0   :  { %4525 = vmatprep.subr.mxu0 %v4613_v2 }
0x15d1   :  { %4526 = vmatpush3.msra.mxu0 %v3747_v27 }
0x15d2   :  { %4527 = vmatprep.subr.mxu0 %v4613_v2 }
0x15d3   :  { %4528 = vmatpush3.msra.mxu0 %v3746_v30 }
0x15d4   :  { %4529 = vmatprep.subr.mxu0 %v4613_v2 }
0x15d5   :  { %4530 = vmatpush3.msra.mxu0 %v3745_v21 }
0x15d6   :  { %4531 = vmatprep.subr.mxu0 %v4613_v2 }
0x15d7   :  { %4532 = vmatpush3.msra.mxu0 %v3744_v36 }
0x164a   :  { %v3666_v31 = vpop.xlane.xlu1 %3665 }
0x164b   :  { %v3667_v33 = vmax.f32 %v3666_v31, 1e-30 }
0x164d   :  { %4583 = vrcp.f32 %v3667_v33 }
0x165a   :  { %v4584_v34 = vpop.eup %4583 }
0x165b   :  { %v3669_v26 = vmul.f32 %v4584_v34, %v3663_v9 }
0x165d   :  { %4499 = vmatmul.mubr.msk.f32.vlgmr.msra.gmra.mxu1 %vm5802_vm13, %v3669_v26 }
0x165e   :  { %4538 = vmatprep.mubr.msk.f32.mxu1 %vm5781_vm1, %v4613_v2 }
0x171d   :  { %v3739_v19 = vpop.f32.mrf.mxu1 }
0x171e   :  { %v3743_v18 = vmax.f32 %v5632_v46, %v3739_v19  ;;  %v3848_v46 = vld [vmem:[%s5762_s2] sm:$0x3]  ;;  %s4617_s2 = smov [#allocation3]  }
0x171f   :  { %v4500_v37 = vpop.f32.mrf.mxu1  ;;  %s4013_s27 = sshll.u32 %s4617_s2, 4  ;;  %s4014_s27 = int_to_ptr.vmem [resolvable:$true] %s4013_s27 }
0x1720   :  { %4534 = vmatmul.mubr.f32.vlgmr.msra.gmra.mxu0 %v3743_v18  ;;  %s4591_s1 = scalar_lea.vmem %s4014_s27, 32  ;;  %p4596_p1 = scmp.lt.s32.totalorder %s4014_s27, %s4014_s27 }
0x1721   :  { %p4592_p0 = scmp.ne.s32.totalorder %s4014_s27, %s4591_s1  ;;  %p4597_p2 = scmp.lt.s32.totalorder %s4591_s1, %s4591_s1 }
0x1723   :  { %p4598_p3 = por %p4597_p2, %p4596_p1 }
0x1725   :  { %p4599_p4 = pnand %p4598_p3, %p4592_p0 }
0x17e0   :  { %v3833_v42 = vpop.f32.mrf.mxu0 }
0x17e1   :  { %v3834_v43 = vadd.f32 %v4069_v39, %v3833_v42 }
0x17e2   :  { %v4535_v44 = vpop.f32.mrf.mxu0 }
0x17e3   :  { %v3838_v45 = vsel %vm3837_vm14, %v3834_v43, -inf }
0x17e4   :  { %v3839_v29 = vrot.slane %v3838_v45, 4 }
0x17e6   :  { %v3840_v47 = vmax.f32 %v3838_v45, %v3839_v29 }
0x17e8   :  { %v3841_v49 = vrot.slane %v3840_v47, 2 }
0x17ea   :  { %v3842_v28 = vmax.f32 %v3840_v47, %v3841_v49 }
0x17ec   :  { %v3843_v35 = vrot.slane %v3842_v28, 1 }
0x17ee   :  { %v3844_v50 = vmax.f32 %v3842_v28, %v3843_v35 }
0x17f0   :  { %v3845_v51 = vsub.f32 %v3834_v43, %v3844_v50 }
0x17f2   :  { %v3846_v16 = vmul.f32 1.442695, %v3845_v51 }
0x17f4   :  { %4585 = vpow2.f32 %v3846_v16 }
0x1801   :  { %v4586_v52 = vpop.eup %4585 }
0x1802   :  { %3924 = vperm.xlu0 %4551, %v4586_v52   ;;  %4537 = vmatpush3.msra.mxu1 %v4586_v52 }
0x1803   :  { %4539 = vmatmul.mubr.msk.f32.vlgmr.msra.gmra.mxu1 %vm5803_vm15, %v3848_v46  ;;  %4541 = vmatprep.subr.mxu1 %v4613_v2 }
0x1804   :  { %4543 = vmatprep.mubr.msk.f32.mxu1 %vm5781_vm1, %v4613_v2 }
0x187d   :  { %v3925_v53 = vpop.permute.xlu0 %3924 }
0x187e   :  { %v3927_v54 = vmul.f32 %v3925_v53, %v3743_v18 }
0x1880   :  { %4542 = vmatpush3.msra.mxu1 %v3927_v54 }
0x1881   :  { %4544 = vmatmul.mubr.msk.f32.vlgmr.msra.gmra.mxu1 %vm5804_vm3, %v3848_v46 }
0x18c3   :  { %v3918_v32 = vpop.f32.mrf.mxu1 }
0x18c4   :  { %v3998_v40 = vmax.f32 %v3918_v32, 1e-30 }
0x18c5   :  { %v4540_v41 = vpop.f32.mrf.mxu1 }
0x18c6   :  { %4001 = vperm.xlu1 %4552, %v3998_v40  }
0x1941   :  { %v4002_v55 = vpop.permute.xlu1 %4001  ;;  %v3994_v56 = vpop.f32.mrf.mxu1 }
0x1942   :  { %4587 = vrcp.f32 %v4002_v55 }
0x1943   :  { %v4545_v57 = vpop.f32.mrf.mxu1 }
0x194f   :  { %v4588_v58 = vpop.eup %4587 }
0x1950   :  { %v4005_v59 = vmul.f32 %v4588_v58, %v3994_v56 }
0x1952   :  { %4006 = vst [vmem:[#allocation3] sm:$0x3] %v4005_v59 }
0x1953   :  { %4602 = shalt.err (!%p4599_p4)
}
0x1954   :  { %4016 = dma.vmem_to_hbm [thread:$0]  %s4014_s27, 32, %s5775_s15, [#allocation4]  }
0x1955   :  { %4611 = dma.done.wait [#allocation4], 32  }
0x1956   :  { %4612 = vsyncadd [#allocation4], 4294967264 }
0x1957   :  { %4020 = vsyncpa [#allocation4], 1 }

</bundles_post_ra>
